<compile_context>
chip_gen: v7x
topology: tpu7x:2x2x1
jax: 0.10.0
libtpu: 0.0.40
codegen_flags: <defaults>
</compile_context>

<pallas_src>
import functools

import jax
import jax.numpy as jnp
from jax.experimental import pallas as pl
from jax.experimental.pallas import tpu as pltpu


# -----------------------------------------------------------------------------
# Static shape bookkeeping (mirrors CNN1DDoubleMaxpool's output-size formulas)
# -----------------------------------------------------------------------------
def _conv_l_out(l_in, k, pad, stride=1, dilation=1):
    return (l_in + 2 * pad - dilation * (k - 1) - 1) // stride + 1


def _pool_l_out(l_in, k):
    return (l_in - k) // k + 1


def _block_plan(channel_input, l_input, layers_param):
    """Per-block static metadata: kernel/pad/channel/length bookkeeping."""
    plan = []
    c_in, l_cur = channel_input, l_input
    for c_key, k_key, mp_key in (("cnn1", "kernel_1", "maxpool_1"),
                                 ("cnn2", "kernel_2", "maxpool_2"),
                                 ("cnn3", "kernel_3", "maxpool_3")):
        c_out = layers_param[c_key]
        K = layers_param[k_key]
        mp = layers_param[mp_key]
        mp = 1 if mp is None else mp          # max_pool1d with k=1 == identity
        pad = (K - 1) // 2                    # CNN1DDoubleMaxpool.padding_same
        l1 = _conv_l_out(l_cur, K, pad)       # after conv1
        l2 = _conv_l_out(l1, K, pad)          # after conv2
        l3 = _pool_l_out(l2, mp)              # after maxpool
        plan.append(dict(K=K, pad=pad, c_in=c_in, c_out=c_out,
                         l_in=l_cur, l1=l1, l2=l2, l_out=l3, mp=mp))
        c_in, l_cur = c_out, l3
    return plan, c_in, l_cur


# -----------------------------------------------------------------------------
# The fused kernel: whole batch, whole network, one invocation, all in VMEM
# -----------------------------------------------------------------------------
def _fused_forward_kernel(x_ref,
                          w11, b11, w12, b12,
                          w21, b21, w22, b22,
                          w31, b31, w32, b32,
                          wd1, bd1, wd2, bd2, wg, bg,
                          out_ref,
                          pad_scr, feat_scr,
                          *, plan, batch):
    conv_params = ((w11, b11, w12, b12),
                   (w21, b21, w22, b22),
                   (w31, b31, w32, b32))
    f32 = jnp.float32

    def conv_relu(w_ref, b_ref, L, Cin, Cout, K, pad):
        """'same' Conv1d + bias + ReLU.

        The (L, Cin) input is expected in pad_scr rows [pad, pad+L), cols [0, Cin).
        Halo rows are zeroed in-kernel; the conv is K shifted (L, Cin)@(Cin, Cout)
        MXU matmuls accumulated in f32.
        """
        Lout = _conv_l_out(L, K, pad)
        if pad > 0:
            halo = jnp.zeros((pad, Cin), f32)
            pad_scr[0:pad, 0:Cin] = halo
            pad_scr[pad + L:pad + L + pad, 0:Cin] = halo
        acc = jnp.zeros((Lout, Cout), f32)
        for t in range(K):                       # static tap loop
            acc = acc + jnp.dot(pad_scr[t:t + Lout, 0:Cin], w_ref[t],
                                preferred_element_type=f32)
        return jnp.maximum(acc + b_ref[...], 0.0)

    # ----- 3x CNN1DDoubleMaxpool, one (statically unrolled) batch element at a time
    for b in range(batch):
        p0 = plan[0]
        # stage the channels-last input of this batch element into the padded scratch
        pad_scr[p0["pad"]:p0["pad"] + p0["l_in"], 0:p0["c_in"]] = x_ref[b]
        for bi, p in enumerate(plan):
            w1_r, b1_r, w2_r, b2_r = conv_params[bi]
            h = conv_relu(w1_r, b1_r, p["l_in"], p["c_in"], p["c_out"],
                          p["K"], p["pad"])
            pad_scr[p["pad"]:p["pad"] + p["l1"], 0:p["c_out"]] = h
            h = conv_relu(w2_r, b2_r, p["l1"], p["c_out"], p["c_out"],
                          p["K"], p["pad"])
            # MaxPool1d(kernel=stride=mp) on the conv2 result while still in vregs.
            # Pooled rows go straight into the next conv's padded staging interior
            # (or into the flatten/feature scratch after the last block).
            k = p["mp"]
            last = bi == len(plan) - 1
            nxt_pad = 0 if last else plan[bi + 1]["pad"]
            for i in range(p["l_out"]):
                row = jnp.max(h[i * k:(i + 1) * k, :], axis=0, keepdims=True)
                if last:
                    feat_scr[i, b:b + 1, :] = row
                else:
                    pad_scr[nxt_pad + i:nxt_pad + i + 1, 0:p["c_out"]] = row
            # Dropout (conv2_drop): identity at inference.

    # ----- dense1 + ReLU -> dense2 + ReLU -> generator Linear (batched) -----
    # wd1 is pre-arranged to (L_flat, C_last, d1), so the PyTorch flatten
    # (B, C, L).view(B, C*L) @ W1 becomes sum_l feat[l] @ wd1[l]: no transpose or
    # reshape of activations inside the kernel.
    l_flat = feat_scr.shape[0]
    d1 = wd1.shape[-1]
    acc1 = jnp.zeros((batch, d1), f32)
    for l in range(l_flat):
        acc1 = acc1 + jnp.dot(feat_scr[l], wd1[l], preferred_element_type=f32)
    h1 = jnp.maximum(acc1 + bd1[...], 0.0)                       # dense1 + ReLU
    h2 = jnp.maximum(jnp.dot(h1, wd2[...], preferred_element_type=f32)
                     + bd2[...], 0.0)                            # dense2 + ReLU
    out_ref[...] = (jnp.dot(h2, wg[...], preferred_element_type=f32)
                    + bg[...])                                   # generator Linear


# -----------------------------------------------------------------------------
# Wrapper: single pallas_call, no grid, everything resident in VMEM
# -----------------------------------------------------------------------------
def conv1d_into_dense_forward(x_ncl, params, layers_param):
    """x_ncl: (B, channel_input, l_input) float32 (PyTorch NCL layout)."""
    # TODO(synk): BatchNorm1d branches (batch_norm=True) are not implemented.
    assert not layers_param.get("batch_norm", False)
    B, c0, l0 = x_ncl.shape
    plan, c_last, l_flat = _block_plan(c0, l0, layers_param)

    x_nlc = jnp.transpose(x_ncl, (0, 2, 1)).astype(jnp.float32)  # channels-last

    d = params["dense"]
    d1 = d["w1"].shape[1]
    n_out = d["wg"].shape[1]
    # PyTorch-flatten-ordered (C*L, d1) -> (L, C, d1): free offline permutation that
    # removes the flatten transpose/reshape from the kernel.
    wd1 = jnp.transpose(d["w1"].reshape(c_last, l_flat, d1), (1, 0, 2))

    lp_max = max(max(p["l_in"], p["l1"]) + 2 * p["pad"] for p in plan)
    c_max = max(max(p["c_in"], p["c_out"]) for p in plan)

    kernel = functools.partial(_fused_forward_kernel, plan=plan, batch=B)
    return pl.pallas_call(
        kernel,
        out_shape=jax.ShapeDtypeStruct((B, n_out), jnp.float32),
        scratch_shapes=[
            pltpu.VMEM((lp_max, c_max), jnp.float32),      # padded conv/pool staging
            pltpu.VMEM((l_flat, B, c_last), jnp.float32),  # flattened features
        ],
    )(x_nlc,
      params["cnn1"]["w1"], params["cnn1"]["b1"],
      params["cnn1"]["w2"], params["cnn1"]["b2"],
      params["cnn2"]["w1"], params["cnn2"]["b1"],
      params["cnn2"]["w2"], params["cnn2"]["b2"],
      params["cnn3"]["w1"], params["cnn3"]["b1"],
      params["cnn3"]["w2"], params["cnn3"]["b2"],
      wd1, d["b1"], d["w2"], d["b2"], d["wg"], d["bg"])


# -----------------------------------------------------------------------------
# Pure-JAX reference (mirrors the PyTorch module, eval mode) for validation
# -----------------------------------------------------------------------------
def _conv1d_relu_ref(x_nlc, w, b):
    K = w.shape[0]
    pad = (K - 1) // 2
    L = _conv_l_out(x_nlc.shape[1], K, pad)
    xpad = jnp.pad(x_nlc, ((0, 0), (pad, pad), (0, 0)))
    acc = jnp.zeros((x_nlc.shape[0], L, w.shape[2]), jnp.float32) + b.reshape(1, 1, -1)
    for t in range(K):
        acc = acc + jnp.einsum("blc,co->blo", xpad[:, t:t + L, :], w[t])
    return jnp.maximum(acc, 0.0)


def _maxpool1d_ref(x_nlc, k):
    B, L, C = x_nlc.shape
    lout = _pool_l_out(L, k)
    return jnp.max(x_nlc[:, :lout * k, :].reshape(B, lout, k, C), axis=2)


def forward_ref(x_ncl, params, layers_param):
    h = jnp.transpose(x_ncl, (0, 2, 1)).astype(jnp.float32)      # NCL -> NLC
    for name in ("cnn1", "cnn2", "cnn3"):
        p = params[name]
        h = _conv1d_relu_ref(h, p["w1"], p["b1"])
        h = _conv1d_relu_ref(h, p["w2"], p["b2"])
        if p["maxpool"] > 1:
            h = _maxpool1d_ref(h, p["maxpool"])
    B = h.shape[0]
    flat = jnp.transpose(h, (0, 2, 1)).reshape(B, -1)            # PyTorch .view(B, C*L)
    d = params["dense"]
    h1 = jnp.maximum(flat @ d["w1"] + d["b1"], 0.0)
    h2 = jnp.maximum(h1 @ d["w2"] + d["b2"], 0.0)
    return h2 @ d["wg"] + d["bg"]


# -----------------------------------------------------------------------------
# Deterministic parameter init
# -----------------------------------------------------------------------------
def init_params(key, channel_input, l_input, layers_param, output_size):
    def nrm(k, shape):
        return 0.1 * jax.random.normal(k, shape, dtype=jnp.float32)

    plan, c_last, l_flat = _block_plan(channel_input, l_input, layers_param)
    keys = iter(jax.random.split(key, 32))
    params = {}
    for name, p in zip(("cnn1", "cnn2", "cnn3"), plan):
        params[name] = {
            "w1": nrm(next(keys), (p["K"], p["c_in"], p["c_out"])),
            "b1": nrm(next(keys), (1, p["c_out"])),
            "w2": nrm(next(keys), (p["K"], p["c_out"], p["c_out"])),
            "b2": nrm(next(keys), (1, p["c_out"])),
            "maxpool": p["mp"],
        }
    f0 = c_last * l_flat                       # cnn_3.output_channel * cnn_3.l_out
    d1, d2 = layers_param["dense1"], layers_param["dense2"]
    params["dense"] = {
        # w1 rows are in PyTorch flatten order: row index = c * l_out + l
        "w1": nrm(next(keys), (f0, d1)), "b1": nrm(next(keys), (1, d1)),
        "w2": nrm(next(keys), (d1, d2)), "b2": nrm(next(keys), (1, d2)),
        "wg": nrm(next(keys), (d2, output_size)),
        "bg": nrm(next(keys), (1, output_size)),
    }
    return params


# -----------------------------------------------------------------------------
if __name__ == "__main__":
    layers_param = {
        "cnn1": 8, "kernel_1": 3, "maxpool_1": 2,
        "cnn2": 8, "kernel_2": 3, "maxpool_2": 2,
        "cnn3": 8, "kernel_3": 3, "maxpool_3": 2,
        "dense1": 32, "dense2": 16,
        "dropout": 0.5,        # identity at inference
        "batch_norm": False,
    }
    B, C_IN, L_IN, OUT = 2, 4, 16, 4

    root = jax.random.PRNGKey(0)
    k_x, k_p = jax.random.split(root)
    x_ncl = jax.random.normal(k_x, (B, C_IN, L_IN), dtype=jnp.float32)  # PyTorch NCL
    params = init_params(k_p, C_IN, L_IN, layers_param, OUT)

    fwd = jax.jit(lambda x: conv1d_into_dense_forward(x, params, layers_param))
    out = jax.block_until_ready(fwd(x_ncl))

    ref = jax.block_until_ready(forward_ref(x_ncl, params, layers_param))
    assert out.shape == (B, OUT), out.shape
    # Tolerance absorbs TPU default-matmul-precision (bf16-pass) differences between
    # the XLA reference and the kernel's f32 MXU accumulation.
    assert jnp.allclose(out, ref, rtol=2e-2, atol=1e-2), (out, ref)

    print("KERNEL_OK")
</pallas_src>

<mosaic_0001>
module attributes {stable_mosaic.version = 11 : i64} {
  func.func @_fused_forward_kernel(%arg0: memref<2x16x4xf32, #tpu.memory_space<vmem>>, %arg1: memref<3x4x8xf32, #tpu.memory_space<vmem>>, %arg2: memref<1x8xf32, #tpu.memory_space<vmem>>, %arg3: memref<3x8x8xf32, #tpu.memory_space<vmem>>, %arg4: memref<1x8xf32, #tpu.memory_space<vmem>>, %arg5: memref<3x8x8xf32, #tpu.memory_space<vmem>>, %arg6: memref<1x8xf32, #tpu.memory_space<vmem>>, %arg7: memref<3x8x8xf32, #tpu.memory_space<vmem>>, %arg8: memref<1x8xf32, #tpu.memory_space<vmem>>, %arg9: memref<3x8x8xf32, #tpu.memory_space<vmem>>, %arg10: memref<1x8xf32, #tpu.memory_space<vmem>>, %arg11: memref<3x8x8xf32, #tpu.memory_space<vmem>>, %arg12: memref<1x8xf32, #tpu.memory_space<vmem>>, %arg13: memref<2x8x32xf32, #tpu.memory_space<vmem>>, %arg14: memref<1x32xf32, #tpu.memory_space<vmem>>, %arg15: memref<32x16xf32, #tpu.memory_space<vmem>>, %arg16: memref<1x16xf32, #tpu.memory_space<vmem>>, %arg17: memref<16x4xf32, #tpu.memory_space<vmem>>, %arg18: memref<1x4xf32, #tpu.memory_space<vmem>>, %arg19: memref<2x4xf32, #tpu.memory_space<vmem>>, %arg20: memref<18x8xf32, #tpu.memory_space<vmem>>, %arg21: memref<2x2x8xf32, #tpu.memory_space<vmem>>) attributes {dimension_semantics = [], scalar_prefetch = 0 : i64, scratch_operands = 2 : i64, tpu.core_type = #tpu.core_type<tc>} {
    %c0 = arith.constant 0 : index
    %c0_0 = arith.constant 0 : index
    %c0_1 = arith.constant 0 : index
    %0 = vector.load %arg0[%c0, %c0_0, %c0_1] : memref<2x16x4xf32, #tpu.memory_space<vmem>>, vector<1x16x4xf32>
    %1 = vector.shape_cast %0 : vector<1x16x4xf32> to vector<16x4xf32>
    %c1 = arith.constant 1 : index
    %c0_2 = arith.constant 0 : index
    %2 = vector.load %arg20[%c1, %c0_2] : memref<18x8xf32, #tpu.memory_space<vmem>>, vector<16x4xf32>
    tpu.vector_store %arg20[%c1, %c0_2], %1 {strides = array<i32>} : memref<18x8xf32, #tpu.memory_space<vmem>>, vector<16x4xf32>,
    %cst = arith.constant 0.000000e+00 : f32
    %3 = vector.broadcast %cst : f32 to vector<1x4xf32>
    %c0_3 = arith.constant 0 : index
    %c0_4 = arith.constant 0 : index
    %4 = vector.load %arg20[%c0_3, %c0_4] : memref<18x8xf32, #tpu.memory_space<vmem>>, vector<1x4xf32>
    tpu.vector_store %arg20[%c0_3, %c0_4], %3 {strides = array<i32>} : memref<18x8xf32, #tpu.memory_space<vmem>>, vector<1x4xf32>,
    %c17 = arith.constant 17 : index
    %c0_5 = arith.constant 0 : index
    %5 = vector.load %arg20[%c17, %c0_5] : memref<18x8xf32, #tpu.memory_space<vmem>>, vector<1x4xf32>
    tpu.vector_store %arg20[%c17, %c0_5], %3 {strides = array<i32>} : memref<18x8xf32, #tpu.memory_space<vmem>>, vector<1x4xf32>,
    %cst_6 = arith.constant 0.000000e+00 : f32
    %6 = vector.broadcast %cst_6 : f32 to vector<16x8xf32>
    %c0_7 = arith.constant 0 : index
    %c0_8 = arith.constant 0 : index
    %7 = vector.load %arg20[%c0_7, %c0_8] : memref<18x8xf32, #tpu.memory_space<vmem>>, vector<16x4xf32>
    %c0_9 = arith.constant 0 : index
    %c0_10 = arith.constant 0 : index
    %c0_11 = arith.constant 0 : index
    %8 = vector.load %arg1[%c0_9, %c0_10, %c0_11] : memref<3x4x8xf32, #tpu.memory_space<vmem>>, vector<1x4x8xf32>
    %9 = vector.shape_cast %8 : vector<1x4x8xf32> to vector<4x8xf32>
    %cst_12 = arith.constant dense<0.000000e+00> : vector<16x8xf32>
    %10 = tpu.matmul %7, %9, %cst_12 {dimension_numbers = #tpu.dot_dimension_numbers<[1], [0], [0], [1], [0, 0, 1, 1], [], []>} : vector<16x4xf32>, vector<4x8xf32>, vector<16x8xf32> -> vector<16x8xf32>
    %11 = arith.addf %6, %10 : vector<16x8xf32>
    %c1_13 = arith.constant 1 : index
    %c0_14 = arith.constant 0 : index
    %12 = vector.load %arg20[%c1_13, %c0_14] : memref<18x8xf32, #tpu.memory_space<vmem>>, vector<16x4xf32>
    %c1_15 = arith.constant 1 : index
    %c0_16 = arith.constant 0 : index
    %c0_17 = arith.constant 0 : index
    %13 = vector.load %arg1[%c1_15, %c0_16, %c0_17] : memref<3x4x8xf32, #tpu.memory_space<vmem>>, vector<1x4x8xf32>
    %14 = vector.shape_cast %13 : vector<1x4x8xf32> to vector<4x8xf32>
    %cst_18 = arith.constant dense<0.000000e+00> : vector<16x8xf32>
    %15 = tpu.matmul %12, %14, %cst_18 {dimension_numbers = #tpu.dot_dimension_numbers<[1], [0], [0], [1], [0, 0, 1, 1], [], []>} : vector<16x4xf32>, vector<4x8xf32>, vector<16x8xf32> -> vector<16x8xf32>
    %16 = arith.addf %11, %15 : vector<16x8xf32>
    %c2 = arith.constant 2 : index
    %c0_19 = arith.constant 0 : index
    %17 = vector.load %arg20[%c2, %c0_19] : memref<18x8xf32, #tpu.memory_space<vmem>>, vector<16x4xf32>
    %c2_20 = arith.constant 2 : index
    %c0_21 = arith.constant 0 : index
    %c0_22 = arith.constant 0 : index
    %18 = vector.load %arg1[%c2_20, %c0_21, %c0_22] : memref<3x4x8xf32, #tpu.memory_space<vmem>>, vector<1x4x8xf32>
    %19 = vector.shape_cast %18 : vector<1x4x8xf32> to vector<4x8xf32>
    %cst_23 = arith.constant dense<0.000000e+00> : vector<16x8xf32>
    %20 = tpu.matmul %17, %19, %cst_23 {dimension_numbers = #tpu.dot_dimension_numbers<[1], [0], [0], [1], [0, 0, 1, 1], [], []>} : vector<16x4xf32>, vector<4x8xf32>, vector<16x8xf32> -> vector<16x8xf32>
    %21 = arith.addf %16, %20 : vector<16x8xf32>
    %c0_24 = arith.constant 0 : index
    %c0_25 = arith.constant 0 : index
    %22 = vector.load %arg2[%c0_24, %c0_25] : memref<1x8xf32, #tpu.memory_space<vmem>>, vector<1x8xf32>
    %23 = vector.broadcast %22 : vector<1x8xf32> to vector<16x8xf32>
    %24 = arith.addf %21, %23 : vector<16x8xf32>
    %cst_26 = arith.constant 0.000000e+00 : f32
    %25 = vector.broadcast %cst_26 : f32 to vector<16x8xf32>
    %26 = arith.maximumf %24, %25 : vector<16x8xf32>
    %c1_27 = arith.constant 1 : index
    %c0_28 = arith.constant 0 : index
    %27 = vector.load %arg20[%c1_27, %c0_28] : memref<18x8xf32, #tpu.memory_space<vmem>>, vector<16x8xf32>
    tpu.vector_store %arg20[%c1_27, %c0_28], %26 {strides = array<i32>} : memref<18x8xf32, #tpu.memory_space<vmem>>, vector<16x8xf32>,
    %cst_29 = arith.constant 0.000000e+00 : f32
    %28 = vector.broadcast %cst_29 : f32 to vector<1x8xf32>
    %c0_30 = arith.constant 0 : index
    %c0_31 = arith.constant 0 : index
    %29 = vector.load %arg20[%c0_30, %c0_31] : memref<18x8xf32, #tpu.memory_space<vmem>>, vector<1x8xf32>
    tpu.vector_store %arg20[%c0_30, %c0_31], %28 {strides = array<i32>} : memref<18x8xf32, #tpu.memory_space<vmem>>, vector<1x8xf32>,
    %c17_32 = arith.constant 17 : index
    %c0_33 = arith.constant 0 : index
    %30 = vector.load %arg20[%c17_32, %c0_33] : memref<18x8xf32, #tpu.memory_space<vmem>>, vector<1x8xf32>
    tpu.vector_store %arg20[%c17_32, %c0_33], %28 {strides = array<i32>} : memref<18x8xf32, #tpu.memory_space<vmem>>, vector<1x8xf32>,
    %cst_34 = arith.constant 0.000000e+00 : f32
    %31 = vector.broadcast %cst_34 : f32 to vector<16x8xf32>
    %c0_35 = arith.constant 0 : index
    %c0_36 = arith.constant 0 : index
    %32 = vector.load %arg20[%c0_35, %c0_36] : memref<18x8xf32, #tpu.memory_space<vmem>>, vector<16x8xf32>
    %c0_37 = arith.constant 0 : index
    %c0_38 = arith.constant 0 : index
    %c0_39 = arith.constant 0 : index
    %33 = vector.load %arg3[%c0_37, %c0_38, %c0_39] : memref<3x8x8xf32, #tpu.memory_space<vmem>>, vector<1x8x8xf32>
    %34 = vector.shape_cast %33 : vector<1x8x8xf32> to vector<8x8xf32>
    %cst_40 = arith.constant dense<0.000000e+00> : vector<16x8xf32>
    %35 = tpu.matmul %32, %34, %cst_40 {dimension_numbers = #tpu.dot_dimension_numbers<[1], [0], [0], [1], [0, 0, 1, 1], [], []>} : vector<16x8xf32>, vector<8x8xf32>, vector<16x8xf32> -> vector<16x8xf32>
    %36 = arith.addf %31, %35 : vector<16x8xf32>
    %c1_41 = arith.constant 1 : index
    %c0_42 = arith.constant 0 : index
    %37 = vector.load %arg20[%c1_41, %c0_42] : memref<18x8xf32, #tpu.memory_space<vmem>>, vector<16x8xf32>
    %c1_43 = arith.constant 1 : index
    %c0_44 = arith.constant 0 : index
    %c0_45 = arith.constant 0 : index
    %38 = vector.load %arg3[%c1_43, %c0_44, %c0_45] : memref<3x8x8xf32, #tpu.memory_space<vmem>>, vector<1x8x8xf32>
    %39 = vector.shape_cast %38 : vector<1x8x8xf32> to vector<8x8xf32>
    %cst_46 = arith.constant dense<0.000000e+00> : vector<16x8xf32>
    %40 = tpu.matmul %37, %39, %cst_46 {dimension_numbers = #tpu.dot_dimension_numbers<[1], [0], [0], [1], [0, 0, 1, 1], [], []>} : vector<16x8xf32>, vector<8x8xf32>, vector<16x8xf32> -> vector<16x8xf32>
    %41 = arith.addf %36, %40 : vector<16x8xf32>
    %c2_47 = arith.constant 2 : index
    %c0_48 = arith.constant 0 : index
    %42 = vector.load %arg20[%c2_47, %c0_48] : memref<18x8xf32, #tpu.memory_space<vmem>>, vector<16x8xf32>
    %c2_49 = arith.constant 2 : index
    %c0_50 = arith.constant 0 : index
    %c0_51 = arith.constant 0 : index
    %43 = vector.load %arg3[%c2_49, %c0_50, %c0_51] : memref<3x8x8xf32, #tpu.memory_space<vmem>>, vector<1x8x8xf32>
    %44 = vector.shape_cast %43 : vector<1x8x8xf32> to vector<8x8xf32>
    %cst_52 = arith.constant dense<0.000000e+00> : vector<16x8xf32>
    %45 = tpu.matmul %42, %44, %cst_52 {dimension_numbers = #tpu.dot_dimension_numbers<[1], [0], [0], [1], [0, 0, 1, 1], [], []>} : vector<16x8xf32>, vector<8x8xf32>, vector<16x8xf32> -> vector<16x8xf32>
    %46 = arith.addf %41, %45 : vector<16x8xf32>
    %c0_53 = arith.constant 0 : index
    %c0_54 = arith.constant 0 : index
    %47 = vector.load %arg4[%c0_53, %c0_54] : memref<1x8xf32, #tpu.memory_space<vmem>>, vector<1x8xf32>
    %48 = vector.broadcast %47 : vector<1x8xf32> to vector<16x8xf32>
    %49 = arith.addf %46, %48 : vector<16x8xf32>
    %cst_55 = arith.constant 0.000000e+00 : f32
    %50 = vector.broadcast %cst_55 : f32 to vector<16x8xf32>
    %51 = arith.maximumf %49, %50 : vector<16x8xf32>
    %52 = vector.extract_strided_slice %51 {offsets = [0, 0], sizes = [2, 8], strides = [1, 1]} : vector<16x8xf32> to vector<2x8xf32>
    %cst_56 = arith.constant dense<0xFF800000> : vector<8xf32>
    %53 = vector.multi_reduction <maximumf>, %52, %cst_56 [0] : vector<2x8xf32> to vector<8xf32>
    %54 = vector.shape_cast %53 : vector<8xf32> to vector<1x8xf32>
    %c1_57 = arith.constant 1 : index
    %c0_58 = arith.constant 0 : index
    %55 = vector.load %arg20[%c1_57, %c0_58] : memref<18x8xf32, #tpu.memory_space<vmem>>, vector<1x8xf32>
    tpu.vector_store %arg20[%c1_57, %c0_58], %54 {strides = array<i32>} : memref<18x8xf32, #tpu.memory_space<vmem>>, vector<1x8xf32>,
    %56 = vector.extract_strided_slice %51 {offsets = [2, 0], sizes = [2, 8], strides = [1, 1]} : vector<16x8xf32> to vector<2x8xf32>
    %cst_59 = arith.constant dense<0xFF800000> : vector<8xf32>
    %57 = vector.multi_reduction <maximumf>, %56, %cst_59 [0] : vector<2x8xf32> to vector<8xf32>
    %58 = vector.shape_cast %57 : vector<8xf32> to vector<1x8xf32>
    %c2_60 = arith.constant 2 : index
    %c0_61 = arith.constant 0 : index
    %59 = vector.load %arg20[%c2_60, %c0_61] : memref<18x8xf32, #tpu.memory_space<vmem>>, vector<1x8xf32>
    tpu.vector_store %arg20[%c2_60, %c0_61], %58 {strides = array<i32>} : memref<18x8xf32, #tpu.memory_space<vmem>>, vector<1x8xf32>,
    %60 = vector.extract_strided_slice %51 {offsets = [4, 0], sizes = [2, 8], strides = [1, 1]} : vector<16x8xf32> to vector<2x8xf32>
    %cst_62 = arith.constant dense<0xFF800000> : vector<8xf32>
    %61 = vector.multi_reduction <maximumf>, %60, %cst_62 [0] : vector<2x8xf32> to vector<8xf32>
    %62 = vector.shape_cast %61 : vector<8xf32> to vector<1x8xf32>
    %c3 = arith.constant 3 : index
    %c0_63 = arith.constant 0 : index
    %63 = vector.load %arg20[%c3, %c0_63] : memref<18x8xf32, #tpu.memory_space<vmem>>, vector<1x8xf32>
    tpu.vector_store %arg20[%c3, %c0_63], %62 {strides = array<i32>} : memref<18x8xf32, #tpu.memory_space<vmem>>, vector<1x8xf32>,
    %64 = vector.extract_strided_slice %51 {offsets = [6, 0], sizes = [2, 8], strides = [1, 1]} : vector<16x8xf32> to vector<2x8xf32>
    %cst_64 = arith.constant dense<0xFF800000> : vector<8xf32>
    %65 = vector.multi_reduction <maximumf>, %64, %cst_64 [0] : vector<2x8xf32> to vector<8xf32>
    %66 = vector.shape_cast %65 : vector<8xf32> to vector<1x8xf32>
    %c4 = arith.constant 4 : index
    %c0_65 = arith.constant 0 : index
    %67 = vector.load %arg20[%c4, %c0_65] : memref<18x8xf32, #tpu.memory_space<vmem>>, vector<1x8xf32>
    tpu.vector_store %arg20[%c4, %c0_65], %66 {strides = array<i32>} : memref<18x8xf32, #tpu.memory_space<vmem>>, vector<1x8xf32>,
    %68 = vector.extract_strided_slice %51 {offsets = [8, 0], sizes = [2, 8], strides = [1, 1]} : vector<16x8xf32> to vector<2x8xf32>
    %cst_66 = arith.constant dense<0xFF800000> : vector<8xf32>
    %69 = vector.multi_reduction <maximumf>, %68, %cst_66 [0] : vector<2x8xf32> to vector<8xf32>
    %70 = vector.shape_cast %69 : vector<8xf32> to vector<1x8xf32>
    %c5 = arith.constant 5 : index
    %c0_67 = arith.constant 0 : index
    %71 = vector.load %arg20[%c5, %c0_67] : memref<18x8xf32, #tpu.memory_space<vmem>>, vector<1x8xf32>
    tpu.vector_store %arg20[%c5, %c0_67], %70 {strides = array<i32>} : memref<18x8xf32, #tpu.memory_space<vmem>>, vector<1x8xf32>,
    %72 = vector.extract_strided_slice %51 {offsets = [10, 0], sizes = [2, 8], strides = [1, 1]} : vector<16x8xf32> to vector<2x8xf32>
    %cst_68 = arith.constant dense<0xFF800000> : vector<8xf32>
    %73 = vector.multi_reduction <maximumf>, %72, %cst_68 [0] : vector<2x8xf32> to vector<8xf32>
    %74 = vector.shape_cast %73 : vector<8xf32> to vector<1x8xf32>
    %c6 = arith.constant 6 : index
    %c0_69 = arith.constant 0 : index
    %75 = vector.load %arg20[%c6, %c0_69] : memref<18x8xf32, #tpu.memory_space<vmem>>, vector<1x8xf32>
    tpu.vector_store %arg20[%c6, %c0_69], %74 {strides = array<i32>} : memref<18x8xf32, #tpu.memory_space<vmem>>, vector<1x8xf32>,
    %76 = vector.extract_strided_slice %51 {offsets = [12, 0], sizes = [2, 8], strides = [1, 1]} : vector<16x8xf32> to vector<2x8xf32>
    %cst_70 = arith.constant dense<0xFF800000> : vector<8xf32>
    %77 = vector.multi_reduction <maximumf>, %76, %cst_70 [0] : vector<2x8xf32> to vector<8xf32>
    %78 = vector.shape_cast %77 : vector<8xf32> to vector<1x8xf32>
    %c7 = arith.constant 7 : index
    %c0_71 = arith.constant 0 : index
    %79 = vector.load %arg20[%c7, %c0_71] : memref<18x8xf32, #tpu.memory_space<vmem>>, vector<1x8xf32>
    tpu.vector_store %arg20[%c7, %c0_71], %78 {strides = array<i32>} : memref<18x8xf32, #tpu.memory_space<vmem>>, vector<1x8xf32>,
    %80 = vector.extract_strided_slice %51 {offsets = [14, 0], sizes = [2, 8], strides = [1, 1]} : vector<16x8xf32> to vector<2x8xf32>
    %cst_72 = arith.constant dense<0xFF800000> : vector<8xf32>
    %81 = vector.multi_reduction <maximumf>, %80, %cst_72 [0] : vector<2x8xf32> to vector<8xf32>
    %82 = vector.shape_cast %81 : vector<8xf32> to vector<1x8xf32>
    %c8 = arith.constant 8 : index
    %c0_73 = arith.constant 0 : index
    %83 = vector.load %arg20[%c8, %c0_73] : memref<18x8xf32, #tpu.memory_space<vmem>>, vector<1x8xf32>
    tpu.vector_store %arg20[%c8, %c0_73], %82 {strides = array<i32>} : memref<18x8xf32, #tpu.memory_space<vmem>>, vector<1x8xf32>,
    %cst_74 = arith.constant 0.000000e+00 : f32
    %84 = vector.broadcast %cst_74 : f32 to vector<1x8xf32>
    %c0_75 = arith.constant 0 : index
    %c0_76 = arith.constant 0 : index
    %85 = vector.load %arg20[%c0_75, %c0_76] : memref<18x8xf32, #tpu.memory_space<vmem>>, vector<1x8xf32>
    tpu.vector_store %arg20[%c0_75, %c0_76], %84 {strides = array<i32>} : memref<18x8xf32, #tpu.memory_space<vmem>>, vector<1x8xf32>,
    %c9 = arith.constant 9 : index
    %c0_77 = arith.constant 0 : index
    %86 = vector.load %arg20[%c9, %c0_77] : memref<18x8xf32, #tpu.memory_space<vmem>>, vector<1x8xf32>
    tpu.vector_store %arg20[%c9, %c0_77], %84 {strides = array<i32>} : memref<18x8xf32, #tpu.memory_space<vmem>>, vector<1x8xf32>,
    %cst_78 = arith.constant 0.000000e+00 : f32
    %87 = vector.broadcast %cst_78 : f32 to vector<8x8xf32>
    %c0_79 = arith.constant 0 : index
    %c0_80 = arith.constant 0 : index
    %88 = vector.load %arg20[%c0_79, %c0_80] : memref<18x8xf32, #tpu.memory_space<vmem>>, vector<8x8xf32>
    %c0_81 = arith.constant 0 : index
    %c0_82 = arith.constant 0 : index
    %c0_83 = arith.constant 0 : index
    %89 = vector.load %arg5[%c0_81, %c0_82, %c0_83] : memref<3x8x8xf32, #tpu.memory_space<vmem>>, vector<1x8x8xf32>
    %90 = vector.shape_cast %89 : vector<1x8x8xf32> to vector<8x8xf32>
    %cst_84 = arith.constant dense<0.000000e+00> : vector<8x8xf32>
    %91 = tpu.matmul %88, %90, %cst_84 {dimension_numbers = #tpu.dot_dimension_numbers<[1], [0], [0], [1], [0, 0, 1, 1], [], []>} : vector<8x8xf32>, vector<8x8xf32>, vector<8x8xf32> -> vector<8x8xf32>
    %92 = arith.addf %87, %91 : vector<8x8xf32>
    %c1_85 = arith.constant 1 : index
    %c0_86 = arith.constant 0 : index
    %93 = vector.load %arg20[%c1_85, %c0_86] : memref<18x8xf32, #tpu.memory_space<vmem>>, vector<8x8xf32>
    %c1_87 = arith.constant 1 : index
    %c0_88 = arith.constant 0 : index
    %c0_89 = arith.constant 0 : index
    %94 = vector.load %arg5[%c1_87, %c0_88, %c0_89] : memref<3x8x8xf32, #tpu.memory_space<vmem>>, vector<1x8x8xf32>
    %95 = vector.shape_cast %94 : vector<1x8x8xf32> to vector<8x8xf32>
    %cst_90 = arith.constant dense<0.000000e+00> : vector<8x8xf32>
    %96 = tpu.matmul %93, %95, %cst_90 {dimension_numbers = #tpu.dot_dimension_numbers<[1], [0], [0], [1], [0, 0, 1, 1], [], []>} : vector<8x8xf32>, vector<8x8xf32>, vector<8x8xf32> -> vector<8x8xf32>
    %97 = arith.addf %92, %96 : vector<8x8xf32>
    %c2_91 = arith.constant 2 : index
    %c0_92 = arith.constant 0 : index
    %98 = vector.load %arg20[%c2_91, %c0_92] : memref<18x8xf32, #tpu.memory_space<vmem>>, vector<8x8xf32>
    %c2_93 = arith.constant 2 : index
    %c0_94 = arith.constant 0 : index
    %c0_95 = arith.constant 0 : index
    %99 = vector.load %arg5[%c2_93, %c0_94, %c0_95] : memref<3x8x8xf32, #tpu.memory_space<vmem>>, vector<1x8x8xf32>
    %100 = vector.shape_cast %99 : vector<1x8x8xf32> to vector<8x8xf32>
    %cst_96 = arith.constant dense<0.000000e+00> : vector<8x8xf32>
    %101 = tpu.matmul %98, %100, %cst_96 {dimension_numbers = #tpu.dot_dimension_numbers<[1], [0], [0], [1], [0, 0, 1, 1], [], []>} : vector<8x8xf32>, vector<8x8xf32>, vector<8x8xf32> -> vector<8x8xf32>
    %102 = arith.addf %97, %101 : vector<8x8xf32>
    %c0_97 = arith.constant 0 : index
    %c0_98 = arith.constant 0 : index
    %103 = vector.load %arg6[%c0_97, %c0_98] : memref<1x8xf32, #tpu.memory_space<vmem>>, vector<1x8xf32>
    %104 = vector.broadcast %103 : vector<1x8xf32> to vector<8x8xf32>
    %105 = arith.addf %102, %104 : vector<8x8xf32>
    %cst_99 = arith.constant 0.000000e+00 : f32
    %106 = vector.broadcast %cst_99 : f32 to vector<8x8xf32>
    %107 = arith.maximumf %105, %106 : vector<8x8xf32>
    %c1_100 = arith.constant 1 : index
    %c0_101 = arith.constant 0 : index
    %108 = vector.load %arg20[%c1_100, %c0_101] : memref<18x8xf32, #tpu.memory_space<vmem>>, vector<8x8xf32>
    tpu.vector_store %arg20[%c1_100, %c0_101], %107 {strides = array<i32>} : memref<18x8xf32, #tpu.memory_space<vmem>>, vector<8x8xf32>,
    %cst_102 = arith.constant 0.000000e+00 : f32
    %109 = vector.broadcast %cst_102 : f32 to vector<1x8xf32>
    %c0_103 = arith.constant 0 : index
    %c0_104 = arith.constant 0 : index
    %110 = vector.load %arg20[%c0_103, %c0_104] : memref<18x8xf32, #tpu.memory_space<vmem>>, vector<1x8xf32>
    tpu.vector_store %arg20[%c0_103, %c0_104], %109 {strides = array<i32>} : memref<18x8xf32, #tpu.memory_space<vmem>>, vector<1x8xf32>,
    %c9_105 = arith.constant 9 : index
    %c0_106 = arith.constant 0 : index
    %111 = vector.load %arg20[%c9_105, %c0_106] : memref<18x8xf32, #tpu.memory_space<vmem>>, vector<1x8xf32>
    tpu.vector_store %arg20[%c9_105, %c0_106], %109 {strides = array<i32>} : memref<18x8xf32, #tpu.memory_space<vmem>>, vector<1x8xf32>,
    %cst_107 = arith.constant 0.000000e+00 : f32
    %112 = vector.broadcast %cst_107 : f32 to vector<8x8xf32>
    %c0_108 = arith.constant 0 : index
    %c0_109 = arith.constant 0 : index
    %113 = vector.load %arg20[%c0_108, %c0_109] : memref<18x8xf32, #tpu.memory_space<vmem>>, vector<8x8xf32>
    %c0_110 = arith.constant 0 : index
    %c0_111 = arith.constant 0 : index
    %c0_112 = arith.constant 0 : index
    %114 = vector.load %arg7[%c0_110, %c0_111, %c0_112] : memref<3x8x8xf32, #tpu.memory_space<vmem>>, vector<1x8x8xf32>
    %115 = vector.shape_cast %114 : vector<1x8x8xf32> to vector<8x8xf32>
    %cst_113 = arith.constant dense<0.000000e+00> : vector<8x8xf32>
    %116 = tpu.matmul %113, %115, %cst_113 {dimension_numbers = #tpu.dot_dimension_numbers<[1], [0], [0], [1], [0, 0, 1, 1], [], []>} : vector<8x8xf32>, vector<8x8xf32>, vector<8x8xf32> -> vector<8x8xf32>
    %117 = arith.addf %112, %116 : vector<8x8xf32>
    %c1_114 = arith.constant 1 : index
    %c0_115 = arith.constant 0 : index
    %118 = vector.load %arg20[%c1_114, %c0_115] : memref<18x8xf32, #tpu.memory_space<vmem>>, vector<8x8xf32>
    %c1_116 = arith.constant 1 : index
    %c0_117 = arith.constant 0 : index
    %c0_118 = arith.constant 0 : index
    %119 = vector.load %arg7[%c1_116, %c0_117, %c0_118] : memref<3x8x8xf32, #tpu.memory_space<vmem>>, vector<1x8x8xf32>
    %120 = vector.shape_cast %119 : vector<1x8x8xf32> to vector<8x8xf32>
    %cst_119 = arith.constant dense<0.000000e+00> : vector<8x8xf32>
    %121 = tpu.matmul %118, %120, %cst_119 {dimension_numbers = #tpu.dot_dimension_numbers<[1], [0], [0], [1], [0, 0, 1, 1], [], []>} : vector<8x8xf32>, vector<8x8xf32>, vector<8x8xf32> -> vector<8x8xf32>
    %122 = arith.addf %117, %121 : vector<8x8xf32>
    %c2_120 = arith.constant 2 : index
    %c0_121 = arith.constant 0 : index
    %123 = vector.load %arg20[%c2_120, %c0_121] : memref<18x8xf32, #tpu.memory_space<vmem>>, vector<8x8xf32>
    %c2_122 = arith.constant 2 : index
    %c0_123 = arith.constant 0 : index
    %c0_124 = arith.constant 0 : index
    %124 = vector.load %arg7[%c2_122, %c0_123, %c0_124] : memref<3x8x8xf32, #tpu.memory_space<vmem>>, vector<1x8x8xf32>
    %125 = vector.shape_cast %124 : vector<1x8x8xf32> to vector<8x8xf32>
    %cst_125 = arith.constant dense<0.000000e+00> : vector<8x8xf32>
    %126 = tpu.matmul %123, %125, %cst_125 {dimension_numbers = #tpu.dot_dimension_numbers<[1], [0], [0], [1], [0, 0, 1, 1], [], []>} : vector<8x8xf32>, vector<8x8xf32>, vector<8x8xf32> -> vector<8x8xf32>
    %127 = arith.addf %122, %126 : vector<8x8xf32>
    %c0_126 = arith.constant 0 : index
    %c0_127 = arith.constant 0 : index
    %128 = vector.load %arg8[%c0_126, %c0_127] : memref<1x8xf32, #tpu.memory_space<vmem>>, vector<1x8xf32>
    %129 = vector.broadcast %128 : vector<1x8xf32> to vector<8x8xf32>
    %130 = arith.addf %127, %129 : vector<8x8xf32>
    %cst_128 = arith.constant 0.000000e+00 : f32
    %131 = vector.broadcast %cst_128 : f32 to vector<8x8xf32>
    %132 = arith.maximumf %130, %131 : vector<8x8xf32>
    %133 = vector.extract_strided_slice %132 {offsets = [0, 0], sizes = [2, 8], strides = [1, 1]} : vector<8x8xf32> to vector<2x8xf32>
    %cst_129 = arith.constant dense<0xFF800000> : vector<8xf32>
    %134 = vector.multi_reduction <maximumf>, %133, %cst_129 [0] : vector<2x8xf32> to vector<8xf32>
    %135 = vector.shape_cast %134 : vector<8xf32> to vector<1x8xf32>
    %c1_130 = arith.constant 1 : index
    %c0_131 = arith.constant 0 : index
    %136 = vector.load %arg20[%c1_130, %c0_131] : memref<18x8xf32, #tpu.memory_space<vmem>>, vector<1x8xf32>
    tpu.vector_store %arg20[%c1_130, %c0_131], %135 {strides = array<i32>} : memref<18x8xf32, #tpu.memory_space<vmem>>, vector<1x8xf32>,
    %137 = vector.extract_strided_slice %132 {offsets = [2, 0], sizes = [2, 8], strides = [1, 1]} : vector<8x8xf32> to vector<2x8xf32>
    %cst_132 = arith.constant dense<0xFF800000> : vector<8xf32>
    %138 = vector.multi_reduction <maximumf>, %137, %cst_132 [0] : vector<2x8xf32> to vector<8xf32>
    %139 = vector.shape_cast %138 : vector<8xf32> to vector<1x8xf32>
    %c2_133 = arith.constant 2 : index
    %c0_134 = arith.constant 0 : index
    %140 = vector.load %arg20[%c2_133, %c0_134] : memref<18x8xf32, #tpu.memory_space<vmem>>, vector<1x8xf32>
    tpu.vector_store %arg20[%c2_133, %c0_134], %139 {strides = array<i32>} : memref<18x8xf32, #tpu.memory_space<vmem>>, vector<1x8xf32>,
    %141 = vector.extract_strided_slice %132 {offsets = [4, 0], sizes = [2, 8], strides = [1, 1]} : vector<8x8xf32> to vector<2x8xf32>
    %cst_135 = arith.constant dense<0xFF800000> : vector<8xf32>
    %142 = vector.multi_reduction <maximumf>, %141, %cst_135 [0] : vector<2x8xf32> to vector<8xf32>
    %143 = vector.shape_cast %142 : vector<8xf32> to vector<1x8xf32>
    %c3_136 = arith.constant 3 : index
    %c0_137 = arith.constant 0 : index
    %144 = vector.load %arg20[%c3_136, %c0_137] : memref<18x8xf32, #tpu.memory_space<vmem>>, vector<1x8xf32>
    tpu.vector_store %arg20[%c3_136, %c0_137], %143 {strides = array<i32>} : memref<18x8xf32, #tpu.memory_space<vmem>>, vector<1x8xf32>,
    %145 = vector.extract_strided_slice %132 {offsets = [6, 0], sizes = [2, 8], strides = [1, 1]} : vector<8x8xf32> to vector<2x8xf32>
    %cst_138 = arith.constant dense<0xFF800000> : vector<8xf32>
    %146 = vector.multi_reduction <maximumf>, %145, %cst_138 [0] : vector<2x8xf32> to vector<8xf32>
    %147 = vector.shape_cast %146 : vector<8xf32> to vector<1x8xf32>
    %c4_139 = arith.constant 4 : index
    %c0_140 = arith.constant 0 : index
    %148 = vector.load %arg20[%c4_139, %c0_140] : memref<18x8xf32, #tpu.memory_space<vmem>>, vector<1x8xf32>
    tpu.vector_store %arg20[%c4_139, %c0_140], %147 {strides = array<i32>} : memref<18x8xf32, #tpu.memory_space<vmem>>, vector<1x8xf32>,
    %cst_141 = arith.constant 0.000000e+00 : f32
    %149 = vector.broadcast %cst_141 : f32 to vector<1x8xf32>
    %c0_142 = arith.constant 0 : index
    %c0_143 = arith.constant 0 : index
    %150 = vector.load %arg20[%c0_142, %c0_143] : memref<18x8xf32, #tpu.memory_space<vmem>>, vector<1x8xf32>
    tpu.vector_store %arg20[%c0_142, %c0_143], %149 {strides = array<i32>} : memref<18x8xf32, #tpu.memory_space<vmem>>, vector<1x8xf32>,
    %c5_144 = arith.constant 5 : index
    %c0_145 = arith.constant 0 : index
    %151 = vector.load %arg20[%c5_144, %c0_145] : memref<18x8xf32, #tpu.memory_space<vmem>>, vector<1x8xf32>
    tpu.vector_store %arg20[%c5_144, %c0_145], %149 {strides = array<i32>} : memref<18x8xf32, #tpu.memory_space<vmem>>, vector<1x8xf32>,
    %cst_146 = arith.constant 0.000000e+00 : f32
    %152 = vector.broadcast %cst_146 : f32 to vector<4x8xf32>
    %c0_147 = arith.constant 0 : index
    %c0_148 = arith.constant 0 : index
    %153 = vector.load %arg20[%c0_147, %c0_148] : memref<18x8xf32, #tpu.memory_space<vmem>>, vector<4x8xf32>
    %c0_149 = arith.constant 0 : index
    %c0_150 = arith.constant 0 : index
    %c0_151 = arith.constant 0 : index
    %154 = vector.load %arg9[%c0_149, %c0_150, %c0_151] : memref<3x8x8xf32, #tpu.memory_space<vmem>>, vector<1x8x8xf32>
    %155 = vector.shape_cast %154 : vector<1x8x8xf32> to vector<8x8xf32>
    %cst_152 = arith.constant dense<0.000000e+00> : vector<4x8xf32>
    %156 = tpu.matmul %153, %155, %cst_152 {dimension_numbers = #tpu.dot_dimension_numbers<[1], [0], [0], [1], [0, 0, 1, 1], [], []>} : vector<4x8xf32>, vector<8x8xf32>, vector<4x8xf32> -> vector<4x8xf32>
    %157 = arith.addf %152, %156 : vector<4x8xf32>
    %c1_153 = arith.constant 1 : index
    %c0_154 = arith.constant 0 : index
    %158 = vector.load %arg20[%c1_153, %c0_154] : memref<18x8xf32, #tpu.memory_space<vmem>>, vector<4x8xf32>
    %c1_155 = arith.constant 1 : index
    %c0_156 = arith.constant 0 : index
    %c0_157 = arith.constant 0 : index
    %159 = vector.load %arg9[%c1_155, %c0_156, %c0_157] : memref<3x8x8xf32, #tpu.memory_space<vmem>>, vector<1x8x8xf32>
    %160 = vector.shape_cast %159 : vector<1x8x8xf32> to vector<8x8xf32>
    %cst_158 = arith.constant dense<0.000000e+00> : vector<4x8xf32>
    %161 = tpu.matmul %158, %160, %cst_158 {dimension_numbers = #tpu.dot_dimension_numbers<[1], [0], [0], [1], [0, 0, 1, 1], [], []>} : vector<4x8xf32>, vector<8x8xf32>, vector<4x8xf32> -> vector<4x8xf32>
    %162 = arith.addf %157, %161 : vector<4x8xf32>
    %c2_159 = arith.constant 2 : index
    %c0_160 = arith.constant 0 : index
    %163 = vector.load %arg20[%c2_159, %c0_160] : memref<18x8xf32, #tpu.memory_space<vmem>>, vector<4x8xf32>
    %c2_161 = arith.constant 2 : index
    %c0_162 = arith.constant 0 : index
    %c0_163 = arith.constant 0 : index
    %164 = vector.load %arg9[%c2_161, %c0_162, %c0_163] : memref<3x8x8xf32, #tpu.memory_space<vmem>>, vector<1x8x8xf32>
    %165 = vector.shape_cast %164 : vector<1x8x8xf32> to vector<8x8xf32>
    %cst_164 = arith.constant dense<0.000000e+00> : vector<4x8xf32>
    %166 = tpu.matmul %163, %165, %cst_164 {dimension_numbers = #tpu.dot_dimension_numbers<[1], [0], [0], [1], [0, 0, 1, 1], [], []>} : vector<4x8xf32>, vector<8x8xf32>, vector<4x8xf32> -> vector<4x8xf32>
    %167 = arith.addf %162, %166 : vector<4x8xf32>
    %c0_165 = arith.constant 0 : index
    %c0_166 = arith.constant 0 : index
    %168 = vector.load %arg10[%c0_165, %c0_166] : memref<1x8xf32, #tpu.memory_space<vmem>>, vector<1x8xf32>
    %169 = vector.broadcast %168 : vector<1x8xf32> to vector<4x8xf32>
    %170 = arith.addf %167, %169 : vector<4x8xf32>
    %cst_167 = arith.constant 0.000000e+00 : f32
    %171 = vector.broadcast %cst_167 : f32 to vector<4x8xf32>
    %172 = arith.maximumf %170, %171 : vector<4x8xf32>
    %c1_168 = arith.constant 1 : index
    %c0_169 = arith.constant 0 : index
    %173 = vector.load %arg20[%c1_168, %c0_169] : memref<18x8xf32, #tpu.memory_space<vmem>>, vector<4x8xf32>
    tpu.vector_store %arg20[%c1_168, %c0_169], %172 {strides = array<i32>} : memref<18x8xf32, #tpu.memory_space<vmem>>, vector<4x8xf32>,
    %cst_170 = arith.constant 0.000000e+00 : f32
    %174 = vector.broadcast %cst_170 : f32 to vector<1x8xf32>
    %c0_171 = arith.constant 0 : index
    %c0_172 = arith.constant 0 : index
    %175 = vector.load %arg20[%c0_171, %c0_172] : memref<18x8xf32, #tpu.memory_space<vmem>>, vector<1x8xf32>
    tpu.vector_store %arg20[%c0_171, %c0_172], %174 {strides = array<i32>} : memref<18x8xf32, #tpu.memory_space<vmem>>, vector<1x8xf32>,
    %c5_173 = arith.constant 5 : index
    %c0_174 = arith.constant 0 : index
    %176 = vector.load %arg20[%c5_173, %c0_174] : memref<18x8xf32, #tpu.memory_space<vmem>>, vector<1x8xf32>
    tpu.vector_store %arg20[%c5_173, %c0_174], %174 {strides = array<i32>} : memref<18x8xf32, #tpu.memory_space<vmem>>, vector<1x8xf32>,
    %cst_175 = arith.constant 0.000000e+00 : f32
    %177 = vector.broadcast %cst_175 : f32 to vector<4x8xf32>
    %c0_176 = arith.constant 0 : index
    %c0_177 = arith.constant 0 : index
    %178 = vector.load %arg20[%c0_176, %c0_177] : memref<18x8xf32, #tpu.memory_space<vmem>>, vector<4x8xf32>
    %c0_178 = arith.constant 0 : index
    %c0_179 = arith.constant 0 : index
    %c0_180 = arith.constant 0 : index
    %179 = vector.load %arg11[%c0_178, %c0_179, %c0_180] : memref<3x8x8xf32, #tpu.memory_space<vmem>>, vector<1x8x8xf32>
    %180 = vector.shape_cast %179 : vector<1x8x8xf32> to vector<8x8xf32>
    %cst_181 = arith.constant dense<0.000000e+00> : vector<4x8xf32>
    %181 = tpu.matmul %178, %180, %cst_181 {dimension_numbers = #tpu.dot_dimension_numbers<[1], [0], [0], [1], [0, 0, 1, 1], [], []>} : vector<4x8xf32>, vector<8x8xf32>, vector<4x8xf32> -> vector<4x8xf32>
    %182 = arith.addf %177, %181 : vector<4x8xf32>
    %c1_182 = arith.constant 1 : index
    %c0_183 = arith.constant 0 : index
    %183 = vector.load %arg20[%c1_182, %c0_183] : memref<18x8xf32, #tpu.memory_space<vmem>>, vector<4x8xf32>
    %c1_184 = arith.constant 1 : index
    %c0_185 = arith.constant 0 : index
    %c0_186 = arith.constant 0 : index
    %184 = vector.load %arg11[%c1_184, %c0_185, %c0_186] : memref<3x8x8xf32, #tpu.memory_space<vmem>>, vector<1x8x8xf32>
    %185 = vector.shape_cast %184 : vector<1x8x8xf32> to vector<8x8xf32>
    %cst_187 = arith.constant dense<0.000000e+00> : vector<4x8xf32>
    %186 = tpu.matmul %183, %185, %cst_187 {dimension_numbers = #tpu.dot_dimension_numbers<[1], [0], [0], [1], [0, 0, 1, 1], [], []>} : vector<4x8xf32>, vector<8x8xf32>, vector<4x8xf32> -> vector<4x8xf32>
    %187 = arith.addf %182, %186 : vector<4x8xf32>
    %c2_188 = arith.constant 2 : index
    %c0_189 = arith.constant 0 : index
    %188 = vector.load %arg20[%c2_188, %c0_189] : memref<18x8xf32, #tpu.memory_space<vmem>>, vector<4x8xf32>
    %c2_190 = arith.constant 2 : index
    %c0_191 = arith.constant 0 : index
    %c0_192 = arith.constant 0 : index
    %189 = vector.load %arg11[%c2_190, %c0_191, %c0_192] : memref<3x8x8xf32, #tpu.memory_space<vmem>>, vector<1x8x8xf32>
    %190 = vector.shape_cast %189 : vector<1x8x8xf32> to vector<8x8xf32>
    %cst_193 = arith.constant dense<0.000000e+00> : vector<4x8xf32>
    %191 = tpu.matmul %188, %190, %cst_193 {dimension_numbers = #tpu.dot_dimension_numbers<[1], [0], [0], [1], [0, 0, 1, 1], [], []>} : vector<4x8xf32>, vector<8x8xf32>, vector<4x8xf32> -> vector<4x8xf32>
    %192 = arith.addf %187, %191 : vector<4x8xf32>
    %c0_194 = arith.constant 0 : index
    %c0_195 = arith.constant 0 : index
    %193 = vector.load %arg12[%c0_194, %c0_195] : memref<1x8xf32, #tpu.memory_space<vmem>>, vector<1x8xf32>
    %194 = vector.broadcast %193 : vector<1x8xf32> to vector<4x8xf32>
    %195 = arith.addf %192, %194 : vector<4x8xf32>
    %cst_196 = arith.constant 0.000000e+00 : f32
    %196 = vector.broadcast %cst_196 : f32 to vector<4x8xf32>
    %197 = arith.maximumf %195, %196 : vector<4x8xf32>
    %198 = vector.extract_strided_slice %197 {offsets = [0, 0], sizes = [2, 8], strides = [1, 1]} : vector<4x8xf32> to vector<2x8xf32>
    %cst_197 = arith.constant dense<0xFF800000> : vector<8xf32>
    %199 = vector.multi_reduction <maximumf>, %198, %cst_197 [0] : vector<2x8xf32> to vector<8xf32>
    %200 = vector.shape_cast %199 : vector<8xf32> to vector<1x8xf32>
    %c0_198 = arith.constant 0 : index
    %c0_199 = arith.constant 0 : index
    %c0_200 = arith.constant 0 : index
    %201 = vector.load %arg21[%c0_198, %c0_199, %c0_200] : memref<2x2x8xf32, #tpu.memory_space<vmem>>, vector<1x1x8xf32>
    %202 = vector.shape_cast %201 : vector<1x1x8xf32> to vector<1x8xf32>
    %203 = vector.shape_cast %200 : vector<1x8xf32> to vector<1x1x8xf32>
    tpu.vector_store %arg21[%c0_198, %c0_199, %c0_200], %203 {strides = array<i32>} : memref<2x2x8xf32, #tpu.memory_space<vmem>>, vector<1x1x8xf32>,
    %204 = vector.extract_strided_slice %197 {offsets = [2, 0], sizes = [2, 8], strides = [1, 1]} : vector<4x8xf32> to vector<2x8xf32>
    %cst_201 = arith.constant dense<0xFF800000> : vector<8xf32>
    %205 = vector.multi_reduction <maximumf>, %204, %cst_201 [0] : vector<2x8xf32> to vector<8xf32>
    %206 = vector.shape_cast %205 : vector<8xf32> to vector<1x8xf32>
    %c1_202 = arith.constant 1 : index
    %c0_203 = arith.constant 0 : index
    %c0_204 = arith.constant 0 : index
    %207 = vector.load %arg21[%c1_202, %c0_203, %c0_204] : memref<2x2x8xf32, #tpu.memory_space<vmem>>, vector<1x1x8xf32>
    %208 = vector.shape_cast %207 : vector<1x1x8xf32> to vector<1x8xf32>
    %209 = vector.shape_cast %206 : vector<1x8xf32> to vector<1x1x8xf32>
    tpu.vector_store %arg21[%c1_202, %c0_203, %c0_204], %209 {strides = array<i32>} : memref<2x2x8xf32, #tpu.memory_space<vmem>>, vector<1x1x8xf32>,
    %c1_205 = arith.constant 1 : index
    %c0_206 = arith.constant 0 : index
    %c0_207 = arith.constant 0 : index
    %210 = vector.load %arg0[%c1_205, %c0_206, %c0_207] : memref<2x16x4xf32, #tpu.memory_space<vmem>>, vector<1x16x4xf32>
    %211 = vector.shape_cast %210 : vector<1x16x4xf32> to vector<16x4xf32>
    %c1_208 = arith.constant 1 : index
    %c0_209 = arith.constant 0 : index
    %212 = vector.load %arg20[%c1_208, %c0_209] : memref<18x8xf32, #tpu.memory_space<vmem>>, vector<16x4xf32>
    tpu.vector_store %arg20[%c1_208, %c0_209], %211 {strides = array<i32>} : memref<18x8xf32, #tpu.memory_space<vmem>>, vector<16x4xf32>,
    %cst_210 = arith.constant 0.000000e+00 : f32
    %213 = vector.broadcast %cst_210 : f32 to vector<1x4xf32>
    %c0_211 = arith.constant 0 : index
    %c0_212 = arith.constant 0 : index
    %214 = vector.load %arg20[%c0_211, %c0_212] : memref<18x8xf32, #tpu.memory_space<vmem>>, vector<1x4xf32>
    tpu.vector_store %arg20[%c0_211, %c0_212], %213 {strides = array<i32>} : memref<18x8xf32, #tpu.memory_space<vmem>>, vector<1x4xf32>,
    %c17_213 = arith.constant 17 : index
    %c0_214 = arith.constant 0 : index
    %215 = vector.load %arg20[%c17_213, %c0_214] : memref<18x8xf32, #tpu.memory_space<vmem>>, vector<1x4xf32>
    tpu.vector_store %arg20[%c17_213, %c0_214], %213 {strides = array<i32>} : memref<18x8xf32, #tpu.memory_space<vmem>>, vector<1x4xf32>,
    %cst_215 = arith.constant 0.000000e+00 : f32
    %216 = vector.broadcast %cst_215 : f32 to vector<16x8xf32>
    %c0_216 = arith.constant 0 : index
    %c0_217 = arith.constant 0 : index
    %217 = vector.load %arg20[%c0_216, %c0_217] : memref<18x8xf32, #tpu.memory_space<vmem>>, vector<16x4xf32>
    %c0_218 = arith.constant 0 : index
    %c0_219 = arith.constant 0 : index
    %c0_220 = arith.constant 0 : index
    %218 = vector.load %arg1[%c0_218, %c0_219, %c0_220] : memref<3x4x8xf32, #tpu.memory_space<vmem>>, vector<1x4x8xf32>
    %219 = vector.shape_cast %218 : vector<1x4x8xf32> to vector<4x8xf32>
    %cst_221 = arith.constant dense<0.000000e+00> : vector<16x8xf32>
    %220 = tpu.matmul %217, %219, %cst_221 {dimension_numbers = #tpu.dot_dimension_numbers<[1], [0], [0], [1], [0, 0, 1, 1], [], []>} : vector<16x4xf32>, vector<4x8xf32>, vector<16x8xf32> -> vector<16x8xf32>
    %221 = arith.addf %216, %220 : vector<16x8xf32>
    %c1_222 = arith.constant 1 : index
    %c0_223 = arith.constant 0 : index
    %222 = vector.load %arg20[%c1_222, %c0_223] : memref<18x8xf32, #tpu.memory_space<vmem>>, vector<16x4xf32>
    %c1_224 = arith.constant 1 : index
    %c0_225 = arith.constant 0 : index
    %c0_226 = arith.constant 0 : index
    %223 = vector.load %arg1[%c1_224, %c0_225, %c0_226] : memref<3x4x8xf32, #tpu.memory_space<vmem>>, vector<1x4x8xf32>
    %224 = vector.shape_cast %223 : vector<1x4x8xf32> to vector<4x8xf32>
    %cst_227 = arith.constant dense<0.000000e+00> : vector<16x8xf32>
    %225 = tpu.matmul %222, %224, %cst_227 {dimension_numbers = #tpu.dot_dimension_numbers<[1], [0], [0], [1], [0, 0, 1, 1], [], []>} : vector<16x4xf32>, vector<4x8xf32>, vector<16x8xf32> -> vector<16x8xf32>
    %226 = arith.addf %221, %225 : vector<16x8xf32>
    %c2_228 = arith.constant 2 : index
    %c0_229 = arith.constant 0 : index
    %227 = vector.load %arg20[%c2_228, %c0_229] : memref<18x8xf32, #tpu.memory_space<vmem>>, vector<16x4xf32>
    %c2_230 = arith.constant 2 : index
    %c0_231 = arith.constant 0 : index
    %c0_232 = arith.constant 0 : index
    %228 = vector.load %arg1[%c2_230, %c0_231, %c0_232] : memref<3x4x8xf32, #tpu.memory_space<vmem>>, vector<1x4x8xf32>
    %229 = vector.shape_cast %228 : vector<1x4x8xf32> to vector<4x8xf32>
    %cst_233 = arith.constant dense<0.000000e+00> : vector<16x8xf32>
    %230 = tpu.matmul %227, %229, %cst_233 {dimension_numbers = #tpu.dot_dimension_numbers<[1], [0], [0], [1], [0, 0, 1, 1], [], []>} : vector<16x4xf32>, vector<4x8xf32>, vector<16x8xf32> -> vector<16x8xf32>
    %231 = arith.addf %226, %230 : vector<16x8xf32>
    %c0_234 = arith.constant 0 : index
    %c0_235 = arith.constant 0 : index
    %232 = vector.load %arg2[%c0_234, %c0_235] : memref<1x8xf32, #tpu.memory_space<vmem>>, vector<1x8xf32>
    %233 = vector.broadcast %232 : vector<1x8xf32> to vector<16x8xf32>
    %234 = arith.addf %231, %233 : vector<16x8xf32>
    %cst_236 = arith.constant 0.000000e+00 : f32
    %235 = vector.broadcast %cst_236 : f32 to vector<16x8xf32>
    %236 = arith.maximumf %234, %235 : vector<16x8xf32>
    %c1_237 = arith.constant 1 : index
    %c0_238 = arith.constant 0 : index
    %237 = vector.load %arg20[%c1_237, %c0_238] : memref<18x8xf32, #tpu.memory_space<vmem>>, vector<16x8xf32>
    tpu.vector_store %arg20[%c1_237, %c0_238], %236 {strides = array<i32>} : memref<18x8xf32, #tpu.memory_space<vmem>>, vector<16x8xf32>,
    %cst_239 = arith.constant 0.000000e+00 : f32
    %238 = vector.broadcast %cst_239 : f32 to vector<1x8xf32>
    %c0_240 = arith.constant 0 : index
    %c0_241 = arith.constant 0 : index
    %239 = vector.load %arg20[%c0_240, %c0_241] : memref<18x8xf32, #tpu.memory_space<vmem>>, vector<1x8xf32>
    tpu.vector_store %arg20[%c0_240, %c0_241], %238 {strides = array<i32>} : memref<18x8xf32, #tpu.memory_space<vmem>>, vector<1x8xf32>,
    %c17_242 = arith.constant 17 : index
    %c0_243 = arith.constant 0 : index
    %240 = vector.load %arg20[%c17_242, %c0_243] : memref<18x8xf32, #tpu.memory_space<vmem>>, vector<1x8xf32>
    tpu.vector_store %arg20[%c17_242, %c0_243], %238 {strides = array<i32>} : memref<18x8xf32, #tpu.memory_space<vmem>>, vector<1x8xf32>,
    %cst_244 = arith.constant 0.000000e+00 : f32
    %241 = vector.broadcast %cst_244 : f32 to vector<16x8xf32>
    %c0_245 = arith.constant 0 : index
    %c0_246 = arith.constant 0 : index
    %242 = vector.load %arg20[%c0_245, %c0_246] : memref<18x8xf32, #tpu.memory_space<vmem>>, vector<16x8xf32>
    %c0_247 = arith.constant 0 : index
    %c0_248 = arith.constant 0 : index
    %c0_249 = arith.constant 0 : index
    %243 = vector.load %arg3[%c0_247, %c0_248, %c0_249] : memref<3x8x8xf32, #tpu.memory_space<vmem>>, vector<1x8x8xf32>
    %244 = vector.shape_cast %243 : vector<1x8x8xf32> to vector<8x8xf32>
    %cst_250 = arith.constant dense<0.000000e+00> : vector<16x8xf32>
    %245 = tpu.matmul %242, %244, %cst_250 {dimension_numbers = #tpu.dot_dimension_numbers<[1], [0], [0], [1], [0, 0, 1, 1], [], []>} : vector<16x8xf32>, vector<8x8xf32>, vector<16x8xf32> -> vector<16x8xf32>
    %246 = arith.addf %241, %245 : vector<16x8xf32>
    %c1_251 = arith.constant 1 : index
    %c0_252 = arith.constant 0 : index
    %247 = vector.load %arg20[%c1_251, %c0_252] : memref<18x8xf32, #tpu.memory_space<vmem>>, vector<16x8xf32>
    %c1_253 = arith.constant 1 : index
    %c0_254 = arith.constant 0 : index
    %c0_255 = arith.constant 0 : index
    %248 = vector.load %arg3[%c1_253, %c0_254, %c0_255] : memref<3x8x8xf32, #tpu.memory_space<vmem>>, vector<1x8x8xf32>
    %249 = vector.shape_cast %248 : vector<1x8x8xf32> to vector<8x8xf32>
    %cst_256 = arith.constant dense<0.000000e+00> : vector<16x8xf32>
    %250 = tpu.matmul %247, %249, %cst_256 {dimension_numbers = #tpu.dot_dimension_numbers<[1], [0], [0], [1], [0, 0, 1, 1], [], []>} : vector<16x8xf32>, vector<8x8xf32>, vector<16x8xf32> -> vector<16x8xf32>
    %251 = arith.addf %246, %250 : vector<16x8xf32>
    %c2_257 = arith.constant 2 : index
    %c0_258 = arith.constant 0 : index
    %252 = vector.load %arg20[%c2_257, %c0_258] : memref<18x8xf32, #tpu.memory_space<vmem>>, vector<16x8xf32>
    %c2_259 = arith.constant 2 : index
    %c0_260 = arith.constant 0 : index
    %c0_261 = arith.constant 0 : index
    %253 = vector.load %arg3[%c2_259, %c0_260, %c0_261] : memref<3x8x8xf32, #tpu.memory_space<vmem>>, vector<1x8x8xf32>
    %254 = vector.shape_cast %253 : vector<1x8x8xf32> to vector<8x8xf32>
    %cst_262 = arith.constant dense<0.000000e+00> : vector<16x8xf32>
    %255 = tpu.matmul %252, %254, %cst_262 {dimension_numbers = #tpu.dot_dimension_numbers<[1], [0], [0], [1], [0, 0, 1, 1], [], []>} : vector<16x8xf32>, vector<8x8xf32>, vector<16x8xf32> -> vector<16x8xf32>
    %256 = arith.addf %251, %255 : vector<16x8xf32>
    %c0_263 = arith.constant 0 : index
    %c0_264 = arith.constant 0 : index
    %257 = vector.load %arg4[%c0_263, %c0_264] : memref<1x8xf32, #tpu.memory_space<vmem>>, vector<1x8xf32>
    %258 = vector.broadcast %257 : vector<1x8xf32> to vector<16x8xf32>
    %259 = arith.addf %256, %258 : vector<16x8xf32>
    %cst_265 = arith.constant 0.000000e+00 : f32
    %260 = vector.broadcast %cst_265 : f32 to vector<16x8xf32>
    %261 = arith.maximumf %259, %260 : vector<16x8xf32>
    %262 = vector.extract_strided_slice %261 {offsets = [0, 0], sizes = [2, 8], strides = [1, 1]} : vector<16x8xf32> to vector<2x8xf32>
    %cst_266 = arith.constant dense<0xFF800000> : vector<8xf32>
    %263 = vector.multi_reduction <maximumf>, %262, %cst_266 [0] : vector<2x8xf32> to vector<8xf32>
    %264 = vector.shape_cast %263 : vector<8xf32> to vector<1x8xf32>
    %c1_267 = arith.constant 1 : index
    %c0_268 = arith.constant 0 : index
    %265 = vector.load %arg20[%c1_267, %c0_268] : memref<18x8xf32, #tpu.memory_space<vmem>>, vector<1x8xf32>
    tpu.vector_store %arg20[%c1_267, %c0_268], %264 {strides = array<i32>} : memref<18x8xf32, #tpu.memory_space<vmem>>, vector<1x8xf32>,
    %266 = vector.extract_strided_slice %261 {offsets = [2, 0], sizes = [2, 8], strides = [1, 1]} : vector<16x8xf32> to vector<2x8xf32>
    %cst_269 = arith.constant dense<0xFF800000> : vector<8xf32>
    %267 = vector.multi_reduction <maximumf>, %266, %cst_269 [0] : vector<2x8xf32> to vector<8xf32>
    %268 = vector.shape_cast %267 : vector<8xf32> to vector<1x8xf32>
    %c2_270 = arith.constant 2 : index
    %c0_271 = arith.constant 0 : index
    %269 = vector.load %arg20[%c2_270, %c0_271] : memref<18x8xf32, #tpu.memory_space<vmem>>, vector<1x8xf32>
    tpu.vector_store %arg20[%c2_270, %c0_271], %268 {strides = array<i32>} : memref<18x8xf32, #tpu.memory_space<vmem>>, vector<1x8xf32>,
    %270 = vector.extract_strided_slice %261 {offsets = [4, 0], sizes = [2, 8], strides = [1, 1]} : vector<16x8xf32> to vector<2x8xf32>
    %cst_272 = arith.constant dense<0xFF800000> : vector<8xf32>
    %271 = vector.multi_reduction <maximumf>, %270, %cst_272 [0] : vector<2x8xf32> to vector<8xf32>
    %272 = vector.shape_cast %271 : vector<8xf32> to vector<1x8xf32>
    %c3_273 = arith.constant 3 : index
    %c0_274 = arith.constant 0 : index
    %273 = vector.load %arg20[%c3_273, %c0_274] : memref<18x8xf32, #tpu.memory_space<vmem>>, vector<1x8xf32>
    tpu.vector_store %arg20[%c3_273, %c0_274], %272 {strides = array<i32>} : memref<18x8xf32, #tpu.memory_space<vmem>>, vector<1x8xf32>,
    %274 = vector.extract_strided_slice %261 {offsets = [6, 0], sizes = [2, 8], strides = [1, 1]} : vector<16x8xf32> to vector<2x8xf32>
    %cst_275 = arith.constant dense<0xFF800000> : vector<8xf32>
    %275 = vector.multi_reduction <maximumf>, %274, %cst_275 [0] : vector<2x8xf32> to vector<8xf32>
    %276 = vector.shape_cast %275 : vector<8xf32> to vector<1x8xf32>
    %c4_276 = arith.constant 4 : index
    %c0_277 = arith.constant 0 : index
    %277 = vector.load %arg20[%c4_276, %c0_277] : memref<18x8xf32, #tpu.memory_space<vmem>>, vector<1x8xf32>
    tpu.vector_store %arg20[%c4_276, %c0_277], %276 {strides = array<i32>} : memref<18x8xf32, #tpu.memory_space<vmem>>, vector<1x8xf32>,
    %278 = vector.extract_strided_slice %261 {offsets = [8, 0], sizes = [2, 8], strides = [1, 1]} : vector<16x8xf32> to vector<2x8xf32>
    %cst_278 = arith.constant dense<0xFF800000> : vector<8xf32>
    %279 = vector.multi_reduction <maximumf>, %278, %cst_278 [0] : vector<2x8xf32> to vector<8xf32>
    %280 = vector.shape_cast %279 : vector<8xf32> to vector<1x8xf32>
    %c5_279 = arith.constant 5 : index
    %c0_280 = arith.constant 0 : index
    %281 = vector.load %arg20[%c5_279, %c0_280] : memref<18x8xf32, #tpu.memory_space<vmem>>, vector<1x8xf32>
    tpu.vector_store %arg20[%c5_279, %c0_280], %280 {strides = array<i32>} : memref<18x8xf32, #tpu.memory_space<vmem>>, vector<1x8xf32>,
    %282 = vector.extract_strided_slice %261 {offsets = [10, 0], sizes = [2, 8], strides = [1, 1]} : vector<16x8xf32> to vector<2x8xf32>
    %cst_281 = arith.constant dense<0xFF800000> : vector<8xf32>
    %283 = vector.multi_reduction <maximumf>, %282, %cst_281 [0] : vector<2x8xf32> to vector<8xf32>
    %284 = vector.shape_cast %283 : vector<8xf32> to vector<1x8xf32>
    %c6_282 = arith.constant 6 : index
    %c0_283 = arith.constant 0 : index
    %285 = vector.load %arg20[%c6_282, %c0_283] : memref<18x8xf32, #tpu.memory_space<vmem>>, vector<1x8xf32>
    tpu.vector_store %arg20[%c6_282, %c0_283], %284 {strides = array<i32>} : memref<18x8xf32, #tpu.memory_space<vmem>>, vector<1x8xf32>,
    %286 = vector.extract_strided_slice %261 {offsets = [12, 0], sizes = [2, 8], strides = [1, 1]} : vector<16x8xf32> to vector<2x8xf32>
    %cst_284 = arith.constant dense<0xFF800000> : vector<8xf32>
    %287 = vector.multi_reduction <maximumf>, %286, %cst_284 [0] : vector<2x8xf32> to vector<8xf32>
    %288 = vector.shape_cast %287 : vector<8xf32> to vector<1x8xf32>
    %c7_285 = arith.constant 7 : index
    %c0_286 = arith.constant 0 : index
    %289 = vector.load %arg20[%c7_285, %c0_286] : memref<18x8xf32, #tpu.memory_space<vmem>>, vector<1x8xf32>
    tpu.vector_store %arg20[%c7_285, %c0_286], %288 {strides = array<i32>} : memref<18x8xf32, #tpu.memory_space<vmem>>, vector<1x8xf32>,
    %290 = vector.extract_strided_slice %261 {offsets = [14, 0], sizes = [2, 8], strides = [1, 1]} : vector<16x8xf32> to vector<2x8xf32>
    %cst_287 = arith.constant dense<0xFF800000> : vector<8xf32>
    %291 = vector.multi_reduction <maximumf>, %290, %cst_287 [0] : vector<2x8xf32> to vector<8xf32>
    %292 = vector.shape_cast %291 : vector<8xf32> to vector<1x8xf32>
    %c8_288 = arith.constant 8 : index
    %c0_289 = arith.constant 0 : index
    %293 = vector.load %arg20[%c8_288, %c0_289] : memref<18x8xf32, #tpu.memory_space<vmem>>, vector<1x8xf32>
    tpu.vector_store %arg20[%c8_288, %c0_289], %292 {strides = array<i32>} : memref<18x8xf32, #tpu.memory_space<vmem>>, vector<1x8xf32>,
    %cst_290 = arith.constant 0.000000e+00 : f32
    %294 = vector.broadcast %cst_290 : f32 to vector<1x8xf32>
    %c0_291 = arith.constant 0 : index
    %c0_292 = arith.constant 0 : index
    %295 = vector.load %arg20[%c0_291, %c0_292] : memref<18x8xf32, #tpu.memory_space<vmem>>, vector<1x8xf32>
    tpu.vector_store %arg20[%c0_291, %c0_292], %294 {strides = array<i32>} : memref<18x8xf32, #tpu.memory_space<vmem>>, vector<1x8xf32>,
    %c9_293 = arith.constant 9 : index
    %c0_294 = arith.constant 0 : index
    %296 = vector.load %arg20[%c9_293, %c0_294] : memref<18x8xf32, #tpu.memory_space<vmem>>, vector<1x8xf32>
    tpu.vector_store %arg20[%c9_293, %c0_294], %294 {strides = array<i32>} : memref<18x8xf32, #tpu.memory_space<vmem>>, vector<1x8xf32>,
    %cst_295 = arith.constant 0.000000e+00 : f32
    %297 = vector.broadcast %cst_295 : f32 to vector<8x8xf32>
    %c0_296 = arith.constant 0 : index
    %c0_297 = arith.constant 0 : index
    %298 = vector.load %arg20[%c0_296, %c0_297] : memref<18x8xf32, #tpu.memory_space<vmem>>, vector<8x8xf32>
    %c0_298 = arith.constant 0 : index
    %c0_299 = arith.constant 0 : index
    %c0_300 = arith.constant 0 : index
    %299 = vector.load %arg5[%c0_298, %c0_299, %c0_300] : memref<3x8x8xf32, #tpu.memory_space<vmem>>, vector<1x8x8xf32>
    %300 = vector.shape_cast %299 : vector<1x8x8xf32> to vector<8x8xf32>
    %cst_301 = arith.constant dense<0.000000e+00> : vector<8x8xf32>
    %301 = tpu.matmul %298, %300, %cst_301 {dimension_numbers = #tpu.dot_dimension_numbers<[1], [0], [0], [1], [0, 0, 1, 1], [], []>} : vector<8x8xf32>, vector<8x8xf32>, vector<8x8xf32> -> vector<8x8xf32>
    %302 = arith.addf %297, %301 : vector<8x8xf32>
    %c1_302 = arith.constant 1 : index
    %c0_303 = arith.constant 0 : index
    %303 = vector.load %arg20[%c1_302, %c0_303] : memref<18x8xf32, #tpu.memory_space<vmem>>, vector<8x8xf32>
    %c1_304 = arith.constant 1 : index
    %c0_305 = arith.constant 0 : index
    %c0_306 = arith.constant 0 : index
    %304 = vector.load %arg5[%c1_304, %c0_305, %c0_306] : memref<3x8x8xf32, #tpu.memory_space<vmem>>, vector<1x8x8xf32>
    %305 = vector.shape_cast %304 : vector<1x8x8xf32> to vector<8x8xf32>
    %cst_307 = arith.constant dense<0.000000e+00> : vector<8x8xf32>
    %306 = tpu.matmul %303, %305, %cst_307 {dimension_numbers = #tpu.dot_dimension_numbers<[1], [0], [0], [1], [0, 0, 1, 1], [], []>} : vector<8x8xf32>, vector<8x8xf32>, vector<8x8xf32> -> vector<8x8xf32>
    %307 = arith.addf %302, %306 : vector<8x8xf32>
    %c2_308 = arith.constant 2 : index
    %c0_309 = arith.constant 0 : index
    %308 = vector.load %arg20[%c2_308, %c0_309] : memref<18x8xf32, #tpu.memory_space<vmem>>, vector<8x8xf32>
    %c2_310 = arith.constant 2 : index
    %c0_311 = arith.constant 0 : index
    %c0_312 = arith.constant 0 : index
    %309 = vector.load %arg5[%c2_310, %c0_311, %c0_312] : memref<3x8x8xf32, #tpu.memory_space<vmem>>, vector<1x8x8xf32>
    %310 = vector.shape_cast %309 : vector<1x8x8xf32> to vector<8x8xf32>
    %cst_313 = arith.constant dense<0.000000e+00> : vector<8x8xf32>
    %311 = tpu.matmul %308, %310, %cst_313 {dimension_numbers = #tpu.dot_dimension_numbers<[1], [0], [0], [1], [0, 0, 1, 1], [], []>} : vector<8x8xf32>, vector<8x8xf32>, vector<8x8xf32> -> vector<8x8xf32>
    %312 = arith.addf %307, %311 : vector<8x8xf32>
    %c0_314 = arith.constant 0 : index
    %c0_315 = arith.constant 0 : index
    %313 = vector.load %arg6[%c0_314, %c0_315] : memref<1x8xf32, #tpu.memory_space<vmem>>, vector<1x8xf32>
    %314 = vector.broadcast %313 : vector<1x8xf32> to vector<8x8xf32>
    %315 = arith.addf %312, %314 : vector<8x8xf32>
    %cst_316 = arith.constant 0.000000e+00 : f32
    %316 = vector.broadcast %cst_316 : f32 to vector<8x8xf32>
    %317 = arith.maximumf %315, %316 : vector<8x8xf32>
    %c1_317 = arith.constant 1 : index
    %c0_318 = arith.constant 0 : index
    %318 = vector.load %arg20[%c1_317, %c0_318] : memref<18x8xf32, #tpu.memory_space<vmem>>, vector<8x8xf32>
    tpu.vector_store %arg20[%c1_317, %c0_318], %317 {strides = array<i32>} : memref<18x8xf32, #tpu.memory_space<vmem>>, vector<8x8xf32>,
    %cst_319 = arith.constant 0.000000e+00 : f32
    %319 = vector.broadcast %cst_319 : f32 to vector<1x8xf32>
    %c0_320 = arith.constant 0 : index
    %c0_321 = arith.constant 0 : index
    %320 = vector.load %arg20[%c0_320, %c0_321] : memref<18x8xf32, #tpu.memory_space<vmem>>, vector<1x8xf32>
    tpu.vector_store %arg20[%c0_320, %c0_321], %319 {strides = array<i32>} : memref<18x8xf32, #tpu.memory_space<vmem>>, vector<1x8xf32>,
    %c9_322 = arith.constant 9 : index
    %c0_323 = arith.constant 0 : index
    %321 = vector.load %arg20[%c9_322, %c0_323] : memref<18x8xf32, #tpu.memory_space<vmem>>, vector<1x8xf32>
    tpu.vector_store %arg20[%c9_322, %c0_323], %319 {strides = array<i32>} : memref<18x8xf32, #tpu.memory_space<vmem>>, vector<1x8xf32>,
    %cst_324 = arith.constant 0.000000e+00 : f32
    %322 = vector.broadcast %cst_324 : f32 to vector<8x8xf32>
    %c0_325 = arith.constant 0 : index
    %c0_326 = arith.constant 0 : index
    %323 = vector.load %arg20[%c0_325, %c0_326] : memref<18x8xf32, #tpu.memory_space<vmem>>, vector<8x8xf32>
    %c0_327 = arith.constant 0 : index
    %c0_328 = arith.constant 0 : index
    %c0_329 = arith.constant 0 : index
    %324 = vector.load %arg7[%c0_327, %c0_328, %c0_329] : memref<3x8x8xf32, #tpu.memory_space<vmem>>, vector<1x8x8xf32>
    %325 = vector.shape_cast %324 : vector<1x8x8xf32> to vector<8x8xf32>
    %cst_330 = arith.constant dense<0.000000e+00> : vector<8x8xf32>
    %326 = tpu.matmul %323, %325, %cst_330 {dimension_numbers = #tpu.dot_dimension_numbers<[1], [0], [0], [1], [0, 0, 1, 1], [], []>} : vector<8x8xf32>, vector<8x8xf32>, vector<8x8xf32> -> vector<8x8xf32>
    %327 = arith.addf %322, %326 : vector<8x8xf32>
    %c1_331 = arith.constant 1 : index
    %c0_332 = arith.constant 0 : index
    %328 = vector.load %arg20[%c1_331, %c0_332] : memref<18x8xf32, #tpu.memory_space<vmem>>, vector<8x8xf32>
    %c1_333 = arith.constant 1 : index
    %c0_334 = arith.constant 0 : index
    %c0_335 = arith.constant 0 : index
    %329 = vector.load %arg7[%c1_333, %c0_334, %c0_335] : memref<3x8x8xf32, #tpu.memory_space<vmem>>, vector<1x8x8xf32>
    %330 = vector.shape_cast %329 : vector<1x8x8xf32> to vector<8x8xf32>
    %cst_336 = arith.constant dense<0.000000e+00> : vector<8x8xf32>
    %331 = tpu.matmul %328, %330, %cst_336 {dimension_numbers = #tpu.dot_dimension_numbers<[1], [0], [0], [1], [0, 0, 1, 1], [], []>} : vector<8x8xf32>, vector<8x8xf32>, vector<8x8xf32> -> vector<8x8xf32>
    %332 = arith.addf %327, %331 : vector<8x8xf32>
    %c2_337 = arith.constant 2 : index
    %c0_338 = arith.constant 0 : index
    %333 = vector.load %arg20[%c2_337, %c0_338] : memref<18x8xf32, #tpu.memory_space<vmem>>, vector<8x8xf32>
    %c2_339 = arith.constant 2 : index
    %c0_340 = arith.constant 0 : index
    %c0_341 = arith.constant 0 : index
    %334 = vector.load %arg7[%c2_339, %c0_340, %c0_341] : memref<3x8x8xf32, #tpu.memory_space<vmem>>, vector<1x8x8xf32>
    %335 = vector.shape_cast %334 : vector<1x8x8xf32> to vector<8x8xf32>
    %cst_342 = arith.constant dense<0.000000e+00> : vector<8x8xf32>
    %336 = tpu.matmul %333, %335, %cst_342 {dimension_numbers = #tpu.dot_dimension_numbers<[1], [0], [0], [1], [0, 0, 1, 1], [], []>} : vector<8x8xf32>, vector<8x8xf32>, vector<8x8xf32> -> vector<8x8xf32>
    %337 = arith.addf %332, %336 : vector<8x8xf32>
    %c0_343 = arith.constant 0 : index
    %c0_344 = arith.constant 0 : index
    %338 = vector.load %arg8[%c0_343, %c0_344] : memref<1x8xf32, #tpu.memory_space<vmem>>, vector<1x8xf32>
    %339 = vector.broadcast %338 : vector<1x8xf32> to vector<8x8xf32>
    %340 = arith.addf %337, %339 : vector<8x8xf32>
    %cst_345 = arith.constant 0.000000e+00 : f32
    %341 = vector.broadcast %cst_345 : f32 to vector<8x8xf32>
    %342 = arith.maximumf %340, %341 : vector<8x8xf32>
    %343 = vector.extract_strided_slice %342 {offsets = [0, 0], sizes = [2, 8], strides = [1, 1]} : vector<8x8xf32> to vector<2x8xf32>
    %cst_346 = arith.constant dense<0xFF800000> : vector<8xf32>
    %344 = vector.multi_reduction <maximumf>, %343, %cst_346 [0] : vector<2x8xf32> to vector<8xf32>
    %345 = vector.shape_cast %344 : vector<8xf32> to vector<1x8xf32>
    %c1_347 = arith.constant 1 : index
    %c0_348 = arith.constant 0 : index
    %346 = vector.load %arg20[%c1_347, %c0_348] : memref<18x8xf32, #tpu.memory_space<vmem>>, vector<1x8xf32>
    tpu.vector_store %arg20[%c1_347, %c0_348], %345 {strides = array<i32>} : memref<18x8xf32, #tpu.memory_space<vmem>>, vector<1x8xf32>,
    %347 = vector.extract_strided_slice %342 {offsets = [2, 0], sizes = [2, 8], strides = [1, 1]} : vector<8x8xf32> to vector<2x8xf32>
    %cst_349 = arith.constant dense<0xFF800000> : vector<8xf32>
    %348 = vector.multi_reduction <maximumf>, %347, %cst_349 [0] : vector<2x8xf32> to vector<8xf32>
    %349 = vector.shape_cast %348 : vector<8xf32> to vector<1x8xf32>
    %c2_350 = arith.constant 2 : index
    %c0_351 = arith.constant 0 : index
    %350 = vector.load %arg20[%c2_350, %c0_351] : memref<18x8xf32, #tpu.memory_space<vmem>>, vector<1x8xf32>
    tpu.vector_store %arg20[%c2_350, %c0_351], %349 {strides = array<i32>} : memref<18x8xf32, #tpu.memory_space<vmem>>, vector<1x8xf32>,
    %351 = vector.extract_strided_slice %342 {offsets = [4, 0], sizes = [2, 8], strides = [1, 1]} : vector<8x8xf32> to vector<2x8xf32>
    %cst_352 = arith.constant dense<0xFF800000> : vector<8xf32>
    %352 = vector.multi_reduction <maximumf>, %351, %cst_352 [0] : vector<2x8xf32> to vector<8xf32>
    %353 = vector.shape_cast %352 : vector<8xf32> to vector<1x8xf32>
    %c3_353 = arith.constant 3 : index
    %c0_354 = arith.constant 0 : index
    %354 = vector.load %arg20[%c3_353, %c0_354] : memref<18x8xf32, #tpu.memory_space<vmem>>, vector<1x8xf32>
    tpu.vector_store %arg20[%c3_353, %c0_354], %353 {strides = array<i32>} : memref<18x8xf32, #tpu.memory_space<vmem>>, vector<1x8xf32>,
    %355 = vector.extract_strided_slice %342 {offsets = [6, 0], sizes = [2, 8], strides = [1, 1]} : vector<8x8xf32> to vector<2x8xf32>
    %cst_355 = arith.constant dense<0xFF800000> : vector<8xf32>
    %356 = vector.multi_reduction <maximumf>, %355, %cst_355 [0] : vector<2x8xf32> to vector<8xf32>
    %357 = vector.shape_cast %356 : vector<8xf32> to vector<1x8xf32>
    %c4_356 = arith.constant 4 : index
    %c0_357 = arith.constant 0 : index
    %358 = vector.load %arg20[%c4_356, %c0_357] : memref<18x8xf32, #tpu.memory_space<vmem>>, vector<1x8xf32>
    tpu.vector_store %arg20[%c4_356, %c0_357], %357 {strides = array<i32>} : memref<18x8xf32, #tpu.memory_space<vmem>>, vector<1x8xf32>,
    %cst_358 = arith.constant 0.000000e+00 : f32
    %359 = vector.broadcast %cst_358 : f32 to vector<1x8xf32>
    %c0_359 = arith.constant 0 : index
    %c0_360 = arith.constant 0 : index
    %360 = vector.load %arg20[%c0_359, %c0_360] : memref<18x8xf32, #tpu.memory_space<vmem>>, vector<1x8xf32>
    tpu.vector_store %arg20[%c0_359, %c0_360], %359 {strides = array<i32>} : memref<18x8xf32, #tpu.memory_space<vmem>>, vector<1x8xf32>,
    %c5_361 = arith.constant 5 : index
    %c0_362 = arith.constant 0 : index
    %361 = vector.load %arg20[%c5_361, %c0_362] : memref<18x8xf32, #tpu.memory_space<vmem>>, vector<1x8xf32>
    tpu.vector_store %arg20[%c5_361, %c0_362], %359 {strides = array<i32>} : memref<18x8xf32, #tpu.memory_space<vmem>>, vector<1x8xf32>,
    %cst_363 = arith.constant 0.000000e+00 : f32
    %362 = vector.broadcast %cst_363 : f32 to vector<4x8xf32>
    %c0_364 = arith.constant 0 : index
    %c0_365 = arith.constant 0 : index
    %363 = vector.load %arg20[%c0_364, %c0_365] : memref<18x8xf32, #tpu.memory_space<vmem>>, vector<4x8xf32>
    %c0_366 = arith.constant 0 : index
    %c0_367 = arith.constant 0 : index
    %c0_368 = arith.constant 0 : index
    %364 = vector.load %arg9[%c0_366, %c0_367, %c0_368] : memref<3x8x8xf32, #tpu.memory_space<vmem>>, vector<1x8x8xf32>
    %365 = vector.shape_cast %364 : vector<1x8x8xf32> to vector<8x8xf32>
    %cst_369 = arith.constant dense<0.000000e+00> : vector<4x8xf32>
    %366 = tpu.matmul %363, %365, %cst_369 {dimension_numbers = #tpu.dot_dimension_numbers<[1], [0], [0], [1], [0, 0, 1, 1], [], []>} : vector<4x8xf32>, vector<8x8xf32>, vector<4x8xf32> -> vector<4x8xf32>
    %367 = arith.addf %362, %366 : vector<4x8xf32>
    %c1_370 = arith.constant 1 : index
    %c0_371 = arith.constant 0 : index
    %368 = vector.load %arg20[%c1_370, %c0_371] : memref<18x8xf32, #tpu.memory_space<vmem>>, vector<4x8xf32>
    %c1_372 = arith.constant 1 : index
    %c0_373 = arith.constant 0 : index
    %c0_374 = arith.constant 0 : index
    %369 = vector.load %arg9[%c1_372, %c0_373, %c0_374] : memref<3x8x8xf32, #tpu.memory_space<vmem>>, vector<1x8x8xf32>
    %370 = vector.shape_cast %369 : vector<1x8x8xf32> to vector<8x8xf32>
    %cst_375 = arith.constant dense<0.000000e+00> : vector<4x8xf32>
    %371 = tpu.matmul %368, %370, %cst_375 {dimension_numbers = #tpu.dot_dimension_numbers<[1], [0], [0], [1], [0, 0, 1, 1], [], []>} : vector<4x8xf32>, vector<8x8xf32>, vector<4x8xf32> -> vector<4x8xf32>
    %372 = arith.addf %367, %371 : vector<4x8xf32>
    %c2_376 = arith.constant 2 : index
    %c0_377 = arith.constant 0 : index
    %373 = vector.load %arg20[%c2_376, %c0_377] : memref<18x8xf32, #tpu.memory_space<vmem>>, vector<4x8xf32>
    %c2_378 = arith.constant 2 : index
    %c0_379 = arith.constant 0 : index
    %c0_380 = arith.constant 0 : index
    %374 = vector.load %arg9[%c2_378, %c0_379, %c0_380] : memref<3x8x8xf32, #tpu.memory_space<vmem>>, vector<1x8x8xf32>
    %375 = vector.shape_cast %374 : vector<1x8x8xf32> to vector<8x8xf32>
    %cst_381 = arith.constant dense<0.000000e+00> : vector<4x8xf32>
    %376 = tpu.matmul %373, %375, %cst_381 {dimension_numbers = #tpu.dot_dimension_numbers<[1], [0], [0], [1], [0, 0, 1, 1], [], []>} : vector<4x8xf32>, vector<8x8xf32>, vector<4x8xf32> -> vector<4x8xf32>
    %377 = arith.addf %372, %376 : vector<4x8xf32>
    %c0_382 = arith.constant 0 : index
    %c0_383 = arith.constant 0 : index
    %378 = vector.load %arg10[%c0_382, %c0_383] : memref<1x8xf32, #tpu.memory_space<vmem>>, vector<1x8xf32>
    %379 = vector.broadcast %378 : vector<1x8xf32> to vector<4x8xf32>
    %380 = arith.addf %377, %379 : vector<4x8xf32>
    %cst_384 = arith.constant 0.000000e+00 : f32
    %381 = vector.broadcast %cst_384 : f32 to vector<4x8xf32>
    %382 = arith.maximumf %380, %381 : vector<4x8xf32>
    %c1_385 = arith.constant 1 : index
    %c0_386 = arith.constant 0 : index
    %383 = vector.load %arg20[%c1_385, %c0_386] : memref<18x8xf32, #tpu.memory_space<vmem>>, vector<4x8xf32>
    tpu.vector_store %arg20[%c1_385, %c0_386], %382 {strides = array<i32>} : memref<18x8xf32, #tpu.memory_space<vmem>>, vector<4x8xf32>,
    %cst_387 = arith.constant 0.000000e+00 : f32
    %384 = vector.broadcast %cst_387 : f32 to vector<1x8xf32>
    %c0_388 = arith.constant 0 : index
    %c0_389 = arith.constant 0 : index
    %385 = vector.load %arg20[%c0_388, %c0_389] : memref<18x8xf32, #tpu.memory_space<vmem>>, vector<1x8xf32>
    tpu.vector_store %arg20[%c0_388, %c0_389], %384 {strides = array<i32>} : memref<18x8xf32, #tpu.memory_space<vmem>>, vector<1x8xf32>,
    %c5_390 = arith.constant 5 : index
    %c0_391 = arith.constant 0 : index
    %386 = vector.load %arg20[%c5_390, %c0_391] : memref<18x8xf32, #tpu.memory_space<vmem>>, vector<1x8xf32>
    tpu.vector_store %arg20[%c5_390, %c0_391], %384 {strides = array<i32>} : memref<18x8xf32, #tpu.memory_space<vmem>>, vector<1x8xf32>,
    %cst_392 = arith.constant 0.000000e+00 : f32
    %387 = vector.broadcast %cst_392 : f32 to vector<4x8xf32>
    %c0_393 = arith.constant 0 : index
    %c0_394 = arith.constant 0 : index
    %388 = vector.load %arg20[%c0_393, %c0_394] : memref<18x8xf32, #tpu.memory_space<vmem>>, vector<4x8xf32>
    %c0_395 = arith.constant 0 : index
    %c0_396 = arith.constant 0 : index
    %c0_397 = arith.constant 0 : index
    %389 = vector.load %arg11[%c0_395, %c0_396, %c0_397] : memref<3x8x8xf32, #tpu.memory_space<vmem>>, vector<1x8x8xf32>
    %390 = vector.shape_cast %389 : vector<1x8x8xf32> to vector<8x8xf32>
    %cst_398 = arith.constant dense<0.000000e+00> : vector<4x8xf32>
    %391 = tpu.matmul %388, %390, %cst_398 {dimension_numbers = #tpu.dot_dimension_numbers<[1], [0], [0], [1], [0, 0, 1, 1], [], []>} : vector<4x8xf32>, vector<8x8xf32>, vector<4x8xf32> -> vector<4x8xf32>
    %392 = arith.addf %387, %391 : vector<4x8xf32>
    %c1_399 = arith.constant 1 : index
    %c0_400 = arith.constant 0 : index
    %393 = vector.load %arg20[%c1_399, %c0_400] : memref<18x8xf32, #tpu.memory_space<vmem>>, vector<4x8xf32>
    %c1_401 = arith.constant 1 : index
    %c0_402 = arith.constant 0 : index
    %c0_403 = arith.constant 0 : index
    %394 = vector.load %arg11[%c1_401, %c0_402, %c0_403] : memref<3x8x8xf32, #tpu.memory_space<vmem>>, vector<1x8x8xf32>
    %395 = vector.shape_cast %394 : vector<1x8x8xf32> to vector<8x8xf32>
    %cst_404 = arith.constant dense<0.000000e+00> : vector<4x8xf32>
    %396 = tpu.matmul %393, %395, %cst_404 {dimension_numbers = #tpu.dot_dimension_numbers<[1], [0], [0], [1], [0, 0, 1, 1], [], []>} : vector<4x8xf32>, vector<8x8xf32>, vector<4x8xf32> -> vector<4x8xf32>
    %397 = arith.addf %392, %396 : vector<4x8xf32>
    %c2_405 = arith.constant 2 : index
    %c0_406 = arith.constant 0 : index
    %398 = vector.load %arg20[%c2_405, %c0_406] : memref<18x8xf32, #tpu.memory_space<vmem>>, vector<4x8xf32>
    %c2_407 = arith.constant 2 : index
    %c0_408 = arith.constant 0 : index
    %c0_409 = arith.constant 0 : index
    %399 = vector.load %arg11[%c2_407, %c0_408, %c0_409] : memref<3x8x8xf32, #tpu.memory_space<vmem>>, vector<1x8x8xf32>
    %400 = vector.shape_cast %399 : vector<1x8x8xf32> to vector<8x8xf32>
    %cst_410 = arith.constant dense<0.000000e+00> : vector<4x8xf32>
    %401 = tpu.matmul %398, %400, %cst_410 {dimension_numbers = #tpu.dot_dimension_numbers<[1], [0], [0], [1], [0, 0, 1, 1], [], []>} : vector<4x8xf32>, vector<8x8xf32>, vector<4x8xf32> -> vector<4x8xf32>
    %402 = arith.addf %397, %401 : vector<4x8xf32>
    %c0_411 = arith.constant 0 : index
    %c0_412 = arith.constant 0 : index
    %403 = vector.load %arg12[%c0_411, %c0_412] : memref<1x8xf32, #tpu.memory_space<vmem>>, vector<1x8xf32>
    %404 = vector.broadcast %403 : vector<1x8xf32> to vector<4x8xf32>
    %405 = arith.addf %402, %404 : vector<4x8xf32>
    %cst_413 = arith.constant 0.000000e+00 : f32
    %406 = vector.broadcast %cst_413 : f32 to vector<4x8xf32>
    %407 = arith.maximumf %405, %406 : vector<4x8xf32>
    %408 = vector.extract_strided_slice %407 {offsets = [0, 0], sizes = [2, 8], strides = [1, 1]} : vector<4x8xf32> to vector<2x8xf32>
    %cst_414 = arith.constant dense<0xFF800000> : vector<8xf32>
    %409 = vector.multi_reduction <maximumf>, %408, %cst_414 [0] : vector<2x8xf32> to vector<8xf32>
    %410 = vector.shape_cast %409 : vector<8xf32> to vector<1x8xf32>
    %c0_415 = arith.constant 0 : index
    %c1_416 = arith.constant 1 : index
    %c0_417 = arith.constant 0 : index
    %411 = vector.load %arg21[%c0_415, %c1_416, %c0_417] : memref<2x2x8xf32, #tpu.memory_space<vmem>>, vector<1x1x8xf32>
    %412 = vector.shape_cast %411 : vector<1x1x8xf32> to vector<1x8xf32>
    %413 = vector.shape_cast %410 : vector<1x8xf32> to vector<1x1x8xf32>
    tpu.vector_store %arg21[%c0_415, %c1_416, %c0_417], %413 {strides = array<i32>} : memref<2x2x8xf32, #tpu.memory_space<vmem>>, vector<1x1x8xf32>,
    %414 = vector.extract_strided_slice %407 {offsets = [2, 0], sizes = [2, 8], strides = [1, 1]} : vector<4x8xf32> to vector<2x8xf32>
    %cst_418 = arith.constant dense<0xFF800000> : vector<8xf32>
    %415 = vector.multi_reduction <maximumf>, %414, %cst_418 [0] : vector<2x8xf32> to vector<8xf32>
    %416 = vector.shape_cast %415 : vector<8xf32> to vector<1x8xf32>
    %c1_419 = arith.constant 1 : index
    %c1_420 = arith.constant 1 : index
    %c0_421 = arith.constant 0 : index
    %417 = vector.load %arg21[%c1_419, %c1_420, %c0_421] : memref<2x2x8xf32, #tpu.memory_space<vmem>>, vector<1x1x8xf32>
    %418 = vector.shape_cast %417 : vector<1x1x8xf32> to vector<1x8xf32>
    %419 = vector.shape_cast %416 : vector<1x8xf32> to vector<1x1x8xf32>
    tpu.vector_store %arg21[%c1_419, %c1_420, %c0_421], %419 {strides = array<i32>} : memref<2x2x8xf32, #tpu.memory_space<vmem>>, vector<1x1x8xf32>,
    %cst_422 = arith.constant 0.000000e+00 : f32
    %420 = vector.broadcast %cst_422 : f32 to vector<2x32xf32>
    %c0_423 = arith.constant 0 : index
    %c0_424 = arith.constant 0 : index
    %c0_425 = arith.constant 0 : index
    %421 = vector.load %arg21[%c0_423, %c0_424, %c0_425] : memref<2x2x8xf32, #tpu.memory_space<vmem>>, vector<1x2x8xf32>
    %422 = vector.shape_cast %421 : vector<1x2x8xf32> to vector<2x8xf32>
    %c0_426 = arith.constant 0 : index
    %c0_427 = arith.constant 0 : index
    %c0_428 = arith.constant 0 : index
    %423 = vector.load %arg13[%c0_426, %c0_427, %c0_428] : memref<2x8x32xf32, #tpu.memory_space<vmem>>, vector<1x8x32xf32>
    %424 = vector.shape_cast %423 : vector<1x8x32xf32> to vector<8x32xf32>
    %cst_429 = arith.constant dense<0.000000e+00> : vector<2x32xf32>
    %425 = tpu.matmul %422, %424, %cst_429 {dimension_numbers = #tpu.dot_dimension_numbers<[1], [0], [0], [1], [0, 0, 1, 1], [], []>} : vector<2x8xf32>, vector<8x32xf32>, vector<2x32xf32> -> vector<2x32xf32>
    %426 = arith.addf %420, %425 : vector<2x32xf32>
    %c1_430 = arith.constant 1 : index
    %c0_431 = arith.constant 0 : index
    %c0_432 = arith.constant 0 : index
    %427 = vector.load %arg21[%c1_430, %c0_431, %c0_432] : memref<2x2x8xf32, #tpu.memory_space<vmem>>, vector<1x2x8xf32>
    %428 = vector.shape_cast %427 : vector<1x2x8xf32> to vector<2x8xf32>
    %c1_433 = arith.constant 1 : index
    %c0_434 = arith.constant 0 : index
    %c0_435 = arith.constant 0 : index
    %429 = vector.load %arg13[%c1_433, %c0_434, %c0_435] : memref<2x8x32xf32, #tpu.memory_space<vmem>>, vector<1x8x32xf32>
    %430 = vector.shape_cast %429 : vector<1x8x32xf32> to vector<8x32xf32>
    %cst_436 = arith.constant dense<0.000000e+00> : vector<2x32xf32>
    %431 = tpu.matmul %428, %430, %cst_436 {dimension_numbers = #tpu.dot_dimension_numbers<[1], [0], [0], [1], [0, 0, 1, 1], [], []>} : vector<2x8xf32>, vector<8x32xf32>, vector<2x32xf32> -> vector<2x32xf32>
    %432 = arith.addf %426, %431 : vector<2x32xf32>
    %c0_437 = arith.constant 0 : index
    %c0_438 = arith.constant 0 : index
    %433 = vector.load %arg14[%c0_437, %c0_438] : memref<1x32xf32, #tpu.memory_space<vmem>>, vector<1x32xf32>
    %434 = vector.broadcast %433 : vector<1x32xf32> to vector<2x32xf32>
    %435 = arith.addf %432, %434 : vector<2x32xf32>
    %cst_439 = arith.constant 0.000000e+00 : f32
    %436 = vector.broadcast %cst_439 : f32 to vector<2x32xf32>
    %437 = arith.maximumf %435, %436 : vector<2x32xf32>
    %c0_440 = arith.constant 0 : index
    %c0_441 = arith.constant 0 : index
    %438 = vector.load %arg15[%c0_440, %c0_441] : memref<32x16xf32, #tpu.memory_space<vmem>>, vector<32x16xf32>
    %cst_442 = arith.constant dense<0.000000e+00> : vector<2x16xf32>
    %439 = tpu.matmul %437, %438, %cst_442 {dimension_numbers = #tpu.dot_dimension_numbers<[1], [0], [0], [1], [0, 0, 1, 1], [], []>} : vector<2x32xf32>, vector<32x16xf32>, vector<2x16xf32> -> vector<2x16xf32>
    %c0_443 = arith.constant 0 : index
    %c0_444 = arith.constant 0 : index
    %440 = vector.load %arg16[%c0_443, %c0_444] : memref<1x16xf32, #tpu.memory_space<vmem>>, vector<1x16xf32>
    %441 = vector.broadcast %440 : vector<1x16xf32> to vector<2x16xf32>
    %442 = arith.addf %439, %441 : vector<2x16xf32>
    %cst_445 = arith.constant 0.000000e+00 : f32
    %443 = vector.broadcast %cst_445 : f32 to vector<2x16xf32>
    %444 = arith.maximumf %442, %443 : vector<2x16xf32>
    %c0_446 = arith.constant 0 : index
    %c0_447 = arith.constant 0 : index
    %445 = vector.load %arg17[%c0_446, %c0_447] : memref<16x4xf32, #tpu.memory_space<vmem>>, vector<16x4xf32>
    %cst_448 = arith.constant dense<0.000000e+00> : vector<2x4xf32>
    %446 = tpu.matmul %444, %445, %cst_448 {dimension_numbers = #tpu.dot_dimension_numbers<[1], [0], [0], [1], [0, 0, 1, 1], [], []>} : vector<2x16xf32>, vector<16x4xf32>, vector<2x4xf32> -> vector<2x4xf32>
    %c0_449 = arith.constant 0 : index
    %c0_450 = arith.constant 0 : index
    %447 = vector.load %arg18[%c0_449, %c0_450] : memref<1x4xf32, #tpu.memory_space<vmem>>, vector<1x4xf32>
    %448 = vector.broadcast %447 : vector<1x4xf32> to vector<2x4xf32>
    %449 = arith.addf %446, %448 : vector<2x4xf32>
    %c0_451 = arith.constant 0 : index
    %c0_452 = arith.constant 0 : index
    %450 = vector.load %arg19[%c0_451, %c0_452] : memref<2x4xf32, #tpu.memory_space<vmem>>, vector<2x4xf32>
    tpu.vector_store %arg19[%c0_451, %c0_452], %449 {strides = array<i32>} : memref<2x4xf32, #tpu.memory_space<vmem>>, vector<2x4xf32>,
    return
  }
}

</mosaic_0001>

<bundles_post_ra>
// kernel: _lambda_.1
= control target key start
LH: loop header
LB: loop body
LE: loop exit
PB: predicated region body
PF: predicated region fallthrough
CT: control target
= control target key end

     0   :  { %s5247_s0 = inlined_call_operand.vmem [shape: f32[2,16,4], index: 0, kind: input, shape index: {}]   ;;  %s5248_s1 = inlined_call_operand.hbm [shape: f32[3,4,8], index: 1, kind: input, shape index: {}]   ;;  %s5249_s2 = inlined_call_operand.hbm [shape: f32[1,8], index: 2, kind: input, shape index: {}]   ;;  %s5250_s3 = inlined_call_operand.hbm [shape: f32[3,8,8], index: 3, kind: input, shape index: {}]   ;;  %s5251_s4 = inlined_call_operand.hbm [shape: f32[1,8], index: 4, kind: input, shape index: {}]   ;;  %s5252_s5 = inlined_call_operand.hbm [shape: f32[3,8,8], index: 5, kind: input, shape index: {}]   ;;  %s5253_s6 = inlined_call_operand.hbm [shape: f32[1,8], index: 6, kind: input, shape index: {}]   ;;  %s5254_s7 = inlined_call_operand.hbm [shape: f32[3,8,8], index: 7, kind: input, shape index: {}]   ;;  %s5255_s8 = inlined_call_operand.hbm [shape: f32[1,8], index: 8, kind: input, shape index: {}]   ;;  %s5256_s9 = inlined_call_operand.vmem [shape: f32[3,8,8], index: 9, kind: input, shape index: {}]   ;;  %s5257_s10 = inlined_call_operand.hbm [shape: f32[1,8], index: 10, kind: input, shape index: {}]   ;;  %s5258_s11 = inlined_call_operand.vmem [shape: f32[3,8,8], index: 11, kind: input, shape index: {}]   ;;  %s5259_s12 = inlined_call_operand.hbm [shape: f32[1,8], index: 12, kind: input, shape index: {}]   ;;  %s5260_s13 = inlined_call_operand.hbm [shape: f32[2,8,32], index: 13, kind: input, shape index: {}]   ;;  %s5261_s14 = inlined_call_operand.hbm [shape: f32[1,32], index: 14, kind: input, shape index: {}]   ;;  %s5262_s15 = inlined_call_operand.vmem [shape: f32[32,16], index: 15, kind: input, shape index: {}]   ;;  %s5263_s16 = inlined_call_operand.vmem [shape: f32[1,16], index: 16, kind: input, shape index: {}]   ;;  %s5264_s17 = inlined_call_operand.vmem [shape: f32[16,4], index: 17, kind: input, shape index: {}]   ;;  %s5265_s18 = inlined_call_operand.vmem [shape: f32[1,4], index: 18, kind: input, shape index: {}]   ;;  %s5266_s19 = inlined_call_operand.hbm [shape: f32[2,4], index: 19, kind: output, shape index: {}]  }
   0x1   :  { %5271 = sst [smem:[#allocation33_spill]] %s5247_s0 }
   0x2   :  { %5272 = sst [smem:[#allocation34_spill]] %s5248_s1 }
   0x3   :  { %5273 = sst [smem:[#allocation35_spill]] %s5249_s2 }
   0x4   :  { %5274 = sst [smem:[#allocation36_spill]] %s5250_s3 }
   0x5   :  { %24 = vsyncpa [#allocation5], 0 }
   0x6   :  { %25 = vsyncpa [#allocation8], 0 }
   0x7   :  { %26 = vsyncpa [#allocation11], 0 }
   0x8   :  { %27 = vsyncpa [#allocation14], 0 }
   0x9   :  { %28 = vsyncpa [#allocation17], 0 }
   0xa   :  { %29 = vsyncpa [#allocation20], 0 }
   0xb   :  { %30 = vsyncpa [#allocation23], 0 }
   0xc   :  { %31 = vsyncpa [#allocation6], 0  ;;  %s4544_s0 = smov [#allocation7]   ;;  %s4545_s20 = smov [#allocation10]  }
   0xd   :  { %s52_s30 = sshll.u32 %s4544_s0, 4  ;;  %s74_s21 = sshll.u32 %s4545_s20, 4  ;;  %s53_s30 = int_to_ptr.vmem [resolvable:$true] %s52_s30  ;;  %s75_s21 = int_to_ptr.vmem [resolvable:$true] %s74_s21 }
   0xe   :  { %s5275_s2 = sld [smem:[#allocation35_spill]] }
  0x14   :  { %s4242_s23 = scalar_lea.hbm %s5275_s2, 16 }
  0x15   :  { %p4243_p0 = scmp.ne.s32.totalorder %s5275_s2, %s4242_s23  ;;  %p4246_p1 = scmp.lt.u32.totalorder %s4242_s23, %s5275_s2 }
  0x17   :  { %p4248_p2 = pnand %p4246_p1, %p4243_p0 }
  0x19   :  { %4251 = shalt.err (!%p4248_p2)
}
  0x1a   :  { %s4252_s27 = scalar_lea.vmem %s53_s30, 16  ;;  %s4256_s28 = scalar_lea.vmem %s53_s30, 32 }
  0x1b   :  { %p4253_p3 = scmp.ne.s32.totalorder %s53_s30, %s4252_s27  ;;  %p4257_p4 = scmp.lt.s32.totalorder %s53_s30, %s53_s30 }
  0x1c   :  { %p4258_p5 = scmp.lt.s32.totalorder %s4256_s28, %s4252_s27 }
  0x1e   :  { %p4259_p6 = por %p4258_p5, %p4257_p4 }
  0x20   :  { %p4260_p7 = pnand %p4259_p6, %p4253_p3 }
  0x22   :  { %4263 = shalt.err (!%p4260_p7)
}
  0x23   :  { %55 = dma.hbm_to_vmem [thread:$0]  %s5275_s2, 16, %s53_s30, [#allocation8]  }
  0x24   :  { %s4264_s22 = scalar_lea.hbm %s5251_s4, 16 }
  0x25   :  { %p4265_p8 = scmp.ne.s32.totalorder %s5251_s4, %s4264_s22  ;;  %p4268_p9 = scmp.lt.u32.totalorder %s4264_s22, %s5251_s4 }
  0x27   :  { %p4270_p10 = pnand %p4268_p9, %p4265_p8 }
  0x29   :  { %4273 = shalt.err (!%p4270_p10)
}
  0x2a   :  { %s4274_s26 = scalar_lea.vmem %s75_s21, 16  ;;  %s4278_s27 = scalar_lea.vmem %s75_s21, 32 }
  0x2b   :  { %p4275_p11 = scmp.ne.s32.totalorder %s75_s21, %s4274_s26  ;;  %p4279_p12 = scmp.lt.s32.totalorder %s75_s21, %s75_s21 }
  0x2c   :  { %p4280_p13 = scmp.lt.s32.totalorder %s4278_s27, %s4274_s26 }
  0x2e   :  { %p4281_p0 = por %p4280_p13, %p4279_p12 }
  0x30   :  { %p4282_p1 = pnand %p4281_p0, %p4275_p11 }
  0x32   :  { %4285 = shalt.err (!%p4282_p1)
}
  0x33   :  { %77 = dma.hbm_to_vmem [thread:$0]  %s5251_s4, 16, %s75_s21, [#allocation11]  }
  0x34   :  { %s4546_s28 = smov [#allocation13]   ;;  %s4547_s0 = smov [#allocation16]  }
  0x35   :  { %s96_s29 = sshll.u32 %s4546_s28, 4  ;;  %s118_s20 = sshll.u32 %s4547_s0, 4  ;;  %s97_s29 = int_to_ptr.vmem [resolvable:$true] %s96_s29  ;;  %s119_s20 = int_to_ptr.vmem [resolvable:$true] %s118_s20 }
  0x36   :  { %s4286_s24 = scalar_lea.hbm %s5253_s6, 16 }
  0x37   :  { %p4287_p2 = scmp.ne.s32.totalorder %s5253_s6, %s4286_s24  ;;  %p4290_p3 = scmp.lt.u32.totalorder %s4286_s24, %s5253_s6 }
  0x39   :  { %p4292_p4 = pnand %p4290_p3, %p4287_p2 }
  0x3b   :  { %4295 = shalt.err (!%p4292_p4)
}
  0x3c   :  { %s4296_s4 = scalar_lea.vmem %s97_s29, 16  ;;  %s4300_s21 = scalar_lea.vmem %s97_s29, 32 }
  0x3d   :  { %p4297_p5 = scmp.ne.s32.totalorder %s97_s29, %s4296_s4  ;;  %p4301_p6 = scmp.lt.s32.totalorder %s97_s29, %s97_s29 }
  0x3e   :  { %p4302_p7 = scmp.lt.s32.totalorder %s4300_s21, %s4296_s4 }
  0x40   :  { %p4303_p8 = por %p4302_p7, %p4301_p6 }
  0x42   :  { %p4304_p9 = pnand %p4303_p8, %p4297_p5 }
  0x44   :  { %4307 = shalt.err (!%p4304_p9)
}
  0x45   :  { %99 = dma.hbm_to_vmem [thread:$0]  %s5253_s6, 16, %s97_s29, [#allocation14]  }
  0x46   :  { %s4308_s0 = scalar_lea.hbm %s5255_s8, 16 }
  0x47   :  { %p4309_p10 = scmp.ne.s32.totalorder %s5255_s8, %s4308_s0  ;;  %p4312_p11 = scmp.lt.u32.totalorder %s4308_s0, %s5255_s8 }
  0x49   :  { %p4314_p12 = pnand %p4312_p11, %p4309_p10 }
  0x4b   :  { %4317 = shalt.err (!%p4314_p12)
}
  0x4c   :  { %s4318_s25 = scalar_lea.vmem %s119_s20, 16  ;;  %s4322_s3 = scalar_lea.vmem %s119_s20, 32 }
  0x4d   :  { %p4319_p13 = scmp.ne.s32.totalorder %s119_s20, %s4318_s25  ;;  %p4323_p0 = scmp.lt.s32.totalorder %s119_s20, %s119_s20 }
  0x4e   :  { %p4324_p1 = scmp.lt.s32.totalorder %s4322_s3, %s4318_s25 }
  0x50   :  { %p4325_p2 = por %p4324_p1, %p4323_p0 }
  0x52   :  { %p4326_p3 = pnand %p4325_p2, %p4319_p13 }
  0x54   :  { %4329 = shalt.err (!%p4326_p3)
}
  0x55   :  { %121 = dma.hbm_to_vmem [thread:$0]  %s5255_s8, 16, %s119_s20, [#allocation17]  }
  0x56   :  { %s4548_s26 = smov [#allocation19]   ;;  %s4549_s21 = smov [#allocation4]  }
  0x57   :  { %s142_s4 = sshll.u32 %s4548_s26, 4  ;;  %s39_s27 = sshll.u32 %s4549_s21, 4  ;;  %s143_s4 = int_to_ptr.vmem [resolvable:$true] %s142_s4  ;;  %s4712_s27 = int_to_ptr.vmem [resolvable:$true] %s39_s27 }
  0x58   :  { %s4330_s28 = scalar_lea.hbm %s5259_s12, 16 }
  0x59   :  { %p4331_p4 = scmp.ne.s32.totalorder %s5259_s12, %s4330_s28  ;;  %p4334_p5 = scmp.lt.u32.totalorder %s4330_s28, %s5259_s12 }
  0x5b   :  { %p4336_p6 = pnand %p4334_p5, %p4331_p4 }
  0x5d   :  { %4339 = shalt.err (!%p4336_p6)
}
  0x5e   :  { %s4340_s8 = scalar_lea.vmem %s143_s4, 16  ;;  %s4344_s20 = scalar_lea.vmem %s143_s4, 32 }
  0x5f   :  { %p4341_p7 = scmp.ne.s32.totalorder %s143_s4, %s4340_s8  ;;  %p4345_p8 = scmp.lt.s32.totalorder %s143_s4, %s143_s4 }
  0x60   :  { %p4346_p9 = scmp.lt.s32.totalorder %s4344_s20, %s4340_s8 }
  0x62   :  { %p4347_p10 = por %p4346_p9, %p4345_p8 }
  0x64   :  { %p4348_p11 = pnand %p4347_p10, %p4341_p7 }
  0x66   :  { %4351 = shalt.err (!%p4348_p11)
}
  0x67   :  { %145 = dma.hbm_to_vmem [thread:$0]  %s5259_s12, 16, %s143_s4, [#allocation20]  }
  0x68   :  { %s5276_s29 = sld [smem:[#allocation34_spill]] }
  0x6e   :  { %s4352_s26 = scalar_lea.hbm %s5276_s29, 192 }
  0x6f   :  { %p4353_p12 = scmp.ne.s32.totalorder %s5276_s29, %s4352_s26  ;;  %p4356_p13 = scmp.lt.u32.totalorder %s4352_s26, %s5276_s29 }
  0x71   :  { %p4358_p0 = pnand %p4356_p13, %p4353_p12 }
  0x73   :  { %4361 = shalt.err (!%p4358_p0)
}
  0x74   :  { %s4362_s0 = scalar_lea.vmem %s4712_s27, 192  ;;  %p4367_p2 = scmp.lt.s32.totalorder %s4712_s27, %s4712_s27 }
  0x75   :  { %p4363_p1 = scmp.ne.s32.totalorder %s4712_s27, %s4362_s0  ;;  %p4368_p3 = scmp.lt.s32.totalorder %s4362_s0, %s4362_s0 }
  0x77   :  { %p4369_p4 = por %p4368_p3, %p4367_p2 }
  0x79   :  { %p4370_p5 = pnand %p4369_p4, %p4363_p1 }
  0x7b   :  { %4373 = shalt.err (!%p4370_p5)
}
  0x7c   :  { %s4550_s12 = smov 64   ;;  %s4551_s4 = smov 4  }
  0x7d   :  { %45 = dma.hbm_to_vmem [thread:$0]  %s5276_s29, 192, %s4712_s27, [#allocation5], %s4550_s12, %s4550_s12, %s4551_s4  }
  0x7e   :  { %s4552_s24 = smov [#allocation9]   ;;  %s5277_s25 = sld [smem:[#allocation36_spill]] }
  0x7f   :  { %s61_s8 = sshll.u32 %s4552_s24, 4  ;;  %s62_s8 = int_to_ptr.vmem [resolvable:$true] %s61_s8 }
  0x84   :  { %s4374_s3 = scalar_lea.hbm %s5277_s25, 384 }
  0x85   :  { %p4375_p6 = scmp.ne.s32.totalorder %s5277_s25, %s4374_s3  ;;  %p4378_p7 = scmp.lt.u32.totalorder %s4374_s3, %s5277_s25 }
  0x87   :  { %p4380_p8 = pnand %p4378_p7, %p4375_p6 }
  0x89   :  { %4383 = shalt.err (!%p4380_p8)
}
  0x8a   :  { %s4384_s2 = scalar_lea.vmem %s62_s8, 384  ;;  %p4389_p10 = scmp.lt.s32.totalorder %s62_s8, %s62_s8 }
  0x8b   :  { %p4385_p9 = scmp.ne.s32.totalorder %s62_s8, %s4384_s2  ;;  %p4390_p11 = scmp.lt.s32.totalorder %s4384_s2, %s4384_s2 }
  0x8d   :  { %p4391_p12 = por %p4390_p11, %p4389_p10 }
  0x8f   :  { %p4392_p13 = pnand %p4391_p12, %p4385_p9 }
  0x91   :  { %4395 = shalt.err (!%p4392_p13)
}
  0x92   :  { %s4553_s27 = smov 128   ;;  %s4554_s29 = smov 8  }
  0x93   :  { %67 = dma.hbm_to_vmem [thread:$0]  %s5277_s25, 384, %s62_s8, [#allocation8], %s4553_s27, %s4553_s27, %s4554_s29  }
  0x94   :  { %s4555_s12 = smov [#allocation12]   ;;  %s4556_s1 = smov [#allocation15]  }
  0x95   :  { %s83_s4 = sshll.u32 %s4555_s12, 4  ;;  %s105_s22 = sshll.u32 %s4556_s1, 4  ;;  %s84_s4 = int_to_ptr.vmem [resolvable:$true] %s83_s4  ;;  %s106_s22 = int_to_ptr.vmem [resolvable:$true] %s105_s22 }
  0x96   :  { %s4396_s23 = scalar_lea.hbm %s5252_s5, 384 }
  0x97   :  { %p4397_p0 = scmp.ne.s32.totalorder %s5252_s5, %s4396_s23  ;;  %p4400_p1 = scmp.lt.u32.totalorder %s4396_s23, %s5252_s5 }
  0x99   :  { %p4402_p2 = pnand %p4400_p1, %p4397_p0 }
  0x9b   :  { %4405 = shalt.err (!%p4402_p2)
}
  0x9c   :  { %s4406_s8 = scalar_lea.vmem %s84_s4, 384  ;;  %p4411_p4 = scmp.lt.s32.totalorder %s84_s4, %s84_s4 }
  0x9d   :  { %p4407_p3 = scmp.ne.s32.totalorder %s84_s4, %s4406_s8  ;;  %p4412_p5 = scmp.lt.s32.totalorder %s4406_s8, %s4406_s8 }
  0x9f   :  { %p4413_p6 = por %p4412_p5, %p4411_p4 }
  0xa1   :  { %p4414_p7 = pnand %p4413_p6, %p4407_p3 }
  0xa3   :  { %4417 = shalt.err (!%p4414_p7)
}
  0xa4   :  { %89 = dma.hbm_to_vmem [thread:$0]  %s5252_s5, 384, %s84_s4, [#allocation11], %s4553_s27, %s4553_s27, %s4554_s29  }
  0xa5   :  { %s4418_s0 = scalar_lea.hbm %s5254_s7, 384 }
  0xa6   :  { %p4419_p8 = scmp.ne.s32.totalorder %s5254_s7, %s4418_s0  ;;  %p4422_p9 = scmp.lt.u32.totalorder %s4418_s0, %s5254_s7 }
  0xa8   :  { %p4424_p10 = pnand %p4422_p9, %p4419_p8 }
  0xaa   :  { %4427 = shalt.err (!%p4424_p10)
}
  0xab   :  { %s4428_s23 = scalar_lea.vmem %s106_s22, 384  ;;  %p4433_p12 = scmp.lt.s32.totalorder %s106_s22, %s106_s22 }
  0xac   :  { %p4429_p11 = scmp.ne.s32.totalorder %s106_s22, %s4428_s23  ;;  %p4434_p13 = scmp.lt.s32.totalorder %s4428_s23, %s4428_s23 }
  0xae   :  { %p4435_p0 = por %p4434_p13, %p4433_p12 }
  0xb0   :  { %p4436_p1 = pnand %p4435_p0, %p4429_p11 }
  0xb2   :  { %4439 = shalt.err (!%p4436_p1)
}
  0xb3   :  { %111 = dma.hbm_to_vmem [thread:$0]  %s5254_s7, 384, %s106_s22, [#allocation14], %s4553_s27, %s4553_s27, %s4554_s29  }
  0xb4   :  { %s4557_s3 = smov [#allocation18]   ;;  %s4558_s26 = smov [#allocation21]  }
  0xb5   :  { %s130_s6 = sshll.u32 %s4557_s3, 4  ;;  %s151_s21 = sshll.u32 %s4558_s26, 4  ;;  %s131_s6 = int_to_ptr.vmem [resolvable:$true] %s130_s6  ;;  %s152_s21 = int_to_ptr.vmem [resolvable:$true] %s151_s21 }
  0xb6   :  { %s4440_s30 = scalar_lea.hbm %s5257_s10, 16 }
  0xb7   :  { %p4441_p2 = scmp.ne.s32.totalorder %s5257_s10, %s4440_s30  ;;  %p4444_p3 = scmp.lt.u32.totalorder %s4440_s30, %s5257_s10 }
  0xb9   :  { %p4446_p4 = pnand %p4444_p3, %p4441_p2 }
  0xbb   :  { %4449 = shalt.err (!%p4446_p4)
}
  0xbc   :  { %s4450_s7 = scalar_lea.vmem %s131_s6, 16  ;;  %s4454_s22 = scalar_lea.vmem %s131_s6, 32 }
  0xbd   :  { %p4451_p5 = scmp.ne.s32.totalorder %s131_s6, %s4450_s7  ;;  %p4455_p6 = scmp.lt.s32.totalorder %s131_s6, %s131_s6 }
  0xbe   :  { %p4456_p7 = scmp.lt.s32.totalorder %s4454_s22, %s4450_s7 }
  0xc0   :  { %p4457_p8 = por %p4456_p7, %p4455_p6 }
  0xc2   :  { %p4458_p9 = pnand %p4457_p8, %p4451_p5 }
  0xc4   :  { %4461 = shalt.err (!%p4458_p9)
}
  0xc5   :  { %133 = dma.hbm_to_vmem [thread:$0]  %s5257_s10, 16, %s131_s6, [#allocation17]  }
  0xc6   :  { %s4462_s5 = scalar_lea.hbm %s5260_s13, 256 }
  0xc7   :  { %p4463_p10 = scmp.ne.s32.totalorder %s5260_s13, %s4462_s5  ;;  %p4466_p11 = scmp.lt.u32.totalorder %s4462_s5, %s5260_s13 }
  0xc9   :  { %p4468_p12 = pnand %p4466_p11, %p4463_p10 }
  0xcb   :  { %4471 = shalt.err (!%p4468_p12)
}
  0xcc   :  { %s4472_s25 = scalar_lea.vmem %s152_s21, 256  ;;  %p4477_p0 = scmp.lt.s32.totalorder %s152_s21, %s152_s21 }
  0xcd   :  { %p4473_p13 = scmp.ne.s32.totalorder %s152_s21, %s4472_s25  ;;  %p4478_p1 = scmp.lt.s32.totalorder %s4472_s25, %s4472_s25 }
  0xcf   :  { %p4479_p2 = por %p4478_p1, %p4477_p0 }
  0xd1   :  { %p4480_p3 = pnand %p4479_p2, %p4473_p13 }
  0xd3   :  { %4483 = shalt.err (!%p4480_p3)
}
  0xd4   :  { %157 = dma.hbm_to_vmem [thread:$0]  %s5260_s13, 256, %s152_s21, [#allocation20], %s4553_s27, %s4553_s27, %s4554_s29  }
  0xd5   :  { %s4559_s30 = smov [#allocation22]   ;;  %s4484_s12 = scalar_lea.hbm %s5261_s14, 16 }
  0xd6   :  { %s164_s2 = sshll.u32 %s4559_s30, 4  ;;  %p4485_p4 = scmp.ne.s32.totalorder %s5261_s14, %s4484_s12  ;;  %s165_s2 = int_to_ptr.vmem [resolvable:$true] %s164_s2 }
  0xd7   :  { %p4488_p5 = scmp.lt.u32.totalorder %s4484_s12, %s5261_s14 }
  0xd9   :  { %p4490_p6 = pnand %p4488_p5, %p4485_p4 }
  0xdb   :  { %4493 = shalt.err (!%p4490_p6)
}
  0xdc   :  { %s4494_s20 = scalar_lea.vmem %s165_s2, 16  ;;  %s4498_s13 = scalar_lea.vmem %s165_s2, 32 }
  0xdd   :  { %p4495_p7 = scmp.ne.s32.totalorder %s165_s2, %s4494_s20  ;;  %p4499_p8 = scmp.lt.s32.totalorder %s165_s2, %s165_s2 }
  0xde   :  { %p4500_p9 = scmp.lt.s32.totalorder %s4498_s13, %s4494_s20 }
  0xe0   :  { %p4501_p10 = por %p4500_p9, %p4499_p8 }
  0xe2   :  { %p4502_p11 = pnand %p4501_p10, %p4495_p7 }
  0xe4   :  { %4505 = shalt.err (!%p4502_p11)
}
  0xe5   :  { %167 = dma.hbm_to_vmem [thread:$0]  %s5261_s14, 16, %s165_s2, [#allocation23]  }
  0xe6   :  { %4528 = dma.done.wait [#allocation5], 192  }
  0xe7   :  { %4529 = vsyncadd [#allocation5], 4294967104 }
  0xe8   :  { %4530 = dma.done.wait [#allocation8], 400  }
  0xe9   :  { %4531 = vsyncadd [#allocation8], 4294966896 }
  0xea   :  { %4532 = dma.done.wait [#allocation11], 400  }
  0xeb   :  { %4533 = vsyncadd [#allocation11], 4294966896 }
  0xec   :  { %4534 = dma.done.wait [#allocation14], 400  }
  0xed   :  { %4535 = vsyncadd [#allocation14], 4294966896 }
  0xee   :  { %4536 = dma.done.wait [#allocation17], 32  }
  0xef   :  { %4537 = vsyncadd [#allocation17], 4294967264 }
  0xf0   :  { %4538 = dma.done.wait [#allocation20], 272  }
  0xf1   :  { %4539 = vsyncadd [#allocation20], 4294967024 }
  0xf2   :  { %4540 = dma.done.wait [#allocation23], 16  }
  0xf3   :  { %4541 = vsyncadd [#allocation23], 4294967280  ;;  %vm217_vm0 = vcmask 24576   ;;  %v4560_v0 = vmov 0.0   ;;  %vm233_vm1 = vcmask 1043456   ;;  %vm214_vm2 = vcmask 31744  }
  0xf4   :  { %218 = vst.msk [vmem:[#allocation2] sm:$0x1] %vm217_vm0, %v4560_v0  ;;  %219 = vst.msk [vmem:[#allocation2 + $0x11] sm:$0x1] %vm217_vm0, %v4560_v0  ;;  %v226_v1 = vld [vmem:[#allocation4 + $0x4] sm:$0xf] }
  0xf5   :  { %s5278_s23 = sld [smem:[#allocation33_spill]]  ;;  %v222_v3 = vld [vmem:[#allocation4] sm:$0xf]  ;;  %3989 = vmatprep.subr.msk.mxu0 %vm233_vm1, %v226_v1  ;;  %v399_v8 = vld [vmem:[#allocation4 + $0x8] sm:$0xf]  ;;  %vm500_vm3 = vcmask 57344  }
  0xf6   :  { %3990 = vmatpush3.msk.msra.mxu0 %vm233_vm1, %v226_v1  ;;  %v4856_v12 = vld [vmem:[#allocation9 + $0x8] sm:$0xff]  ;;  %v4860_v13 = vld [vmem:[#allocation9] sm:$0xff]  ;;  %v4863_v14 = vld [vmem:[#allocation7] ss:$0 sm:$0xff]  ;;  %vm497_vm4 = vcmask 64512   ;;  %vm4561_vm5 = vmmov 0  }
  0xf7   :  { %3994 = vmatprep.subr.msk.mxu0 %vm233_vm1, %v222_v3  ;;  %4004 = vmatprep.subr.mxu1 %v4856_v12  ;;  %v4876_v27 = vld [vmem:[#allocation9 + $0x10] sm:$0xff]  ;;  %v4887_v28 = vld [vmem:[#allocation12 + $0x8] sm:$0xff]  ;;  %v4889_v29 = vld [vmem:[#allocation12] sm:$0xff]  ;;  %vm770_vm6 = vcmask 58368   ;;  %vm779_vm7 = vcmask 60418   ;;  %vm788_vm8 = vcmask 62468  }
  0xf8   :  { %4005 = vmatpush3.msra.mxu1 %v4856_v12  ;;  %v4899_v30 = vld [vmem:[#allocation10] ss:$0 sm:$0xff]  ;;  %vm797_vm9 = vcmask 64518   ;;  %vm1588_vm10 = vcmask 60416   ;;  %vm3629_vm11 = vcmask 261120   ;;  %vm3713_vm12 = vcmask 130048  }
  0xf9   :  { %4009 = vmatprep.subr.mxu1 %v4860_v13  ;;  %s4563_s6 = smov [#allocation24]   ;;  %vm3787_vm13 = vcmask 25600  }
  0xfb   :  { %v212_v2 = vld [vmem:[%s5278_s23] sm:$0xff]  ;;  %v213_v4 = vld [vmem:[%s5278_s23 + $0x8] sm:$0xff] }
  0xfc   :  { %215 = vst.msk [vmem:[#allocation2 + $0x1] sm:$0xff] %vm214_vm2, %v212_v2  ;;  %216 = vst.msk [vmem:[#allocation2 + $0x9] sm:$0xff] %vm214_vm2, %v213_v4 }
 0x103   :  { %v220_v5 = vld [vmem:[#allocation2] sm:$0xff]  ;;  %v224_v7 = vld [vmem:[#allocation2 + $0x9] sm:$0xff] }
 0x104   :  { %v223_v6 = vld [vmem:[#allocation2 + $0x1] sm:$0xff]  ;;  %v397_v11 = vld [vmem:[#allocation2 + $0xa] sm:$0xff]  ;;  %501 = vst.msk [vmem:[#allocation2] sm:$0x1] %vm500_vm3, %v4560_v0 }
 0x105   :  { %3991 = vmatprep.mubr.msk.f32.mxu0 %vm214_vm2, %v223_v6  ;;  %v221_v9 = vld [vmem:[#allocation2 + $0x8] sm:$0xff]  ;;  %502 = vst.msk [vmem:[#allocation2 + $0x11] sm:$0x1] %vm500_vm3, %v4560_v0 }
 0x106   :  { %3992 = vmatmul.mubr.msk.f32.vlgmr.msra.gmra.mrb[0].mxu0 %vm214_vm2, %v224_v7  ;;  %v396_v10 = vld [vmem:[#allocation2 + $0x2] sm:$0xff] }
 0x107   :  { %3995 = vmatpush3.msk.msra.mxu0 %vm233_vm1, %v222_v3  ;;  %3996 = vmatprep.mubr.msk.f32.mxu0 %vm214_vm2, %v220_v5 }
 0x108   :  { %3999 = vmatprep.subr.msk.mxu0 %vm233_vm1, %v399_v8 }
 0x10e   :  { %3997 = vmatmul.mubr.msk.f32.vlgmr.msra.gmra.mrb[0].mxu0 %vm214_vm2, %v221_v9 }
 0x10f   :  { %4000 = vmatpush3.msk.msra.mxu0 %vm233_vm1, %v399_v8  ;;  %4001 = vmatprep.mubr.msk.f32.mxu0 %vm214_vm2, %v396_v10 }
 0x110   :  { %4019 = vmatprep.subr.mxu0 %v4560_v0 }
 0x116   :  { %4002 = vmatmul.mubr.msk.f32.vlgmr.msra.gmra.mrb[0].mxu0 %vm214_vm2, %v397_v11 }
 0x117   :  { %4020 = vmatpush3.msra.mxu0 %v4887_v28  ;;  %4021 = vmatprep.mubr.msk.f32.mxu0 %vm4561_vm5, %v4560_v0 }
 0x118   :  { %4029 = vmatprep.subr.mxu0 %v4560_v0 }
 0x1e9   :  { %v4003_v15 = vpop.f32.mrb[0].mxu0 }
 0x1ea   :  { %v494_v16 = vadd.f32 %v4003_v15, %v4863_v14  ;;  %v475_v17 = vpop.f32.mrb[1].mxu0 }
 0x1eb   :  { %v493_v18 = vadd.f32 %v4863_v14, %v475_v17 }
 0x1ec   :  { %v496_v19 = vmax.f32 %v494_v16, 0.0 }
 0x1ed   :  { %v495_v20 = vmax.f32 %v493_v18, 0.0 }
 0x1ee   :  { %499 = vst.msk [vmem:[#allocation2 + $0x9] sm:$0xff] %vm497_vm4, %v496_v19 }
 0x1ef   :  { %498 = vst.msk [vmem:[#allocation2 + $0x1] sm:$0xff] %vm497_vm4, %v495_v20 }
 0x1f5   :  { %v507_v21 = vld [vmem:[#allocation2 + $0x9] sm:$0xff] }
 0x1f6   :  { %v673_v22 = vld [vmem:[#allocation2 + $0xa] sm:$0xff]  ;;  %v503_v23 = vld [vmem:[#allocation2] sm:$0xff] }
 0x1f7   :  { %v504_v24 = vld [vmem:[#allocation2 + $0x8] sm:$0xff]  ;;  %1852 = vst.msk [vmem:[#allocation2 + $0x11] sm:$0x1] %vm217_vm0, %v4560_v0 }
 0x1f8   :  { %v672_v25 = vld [vmem:[#allocation2 + $0x2] sm:$0xff]  ;;  %838 = vst.msk [vmem:[#allocation2] sm:$0x1] %vm500_vm3, %v4560_v0 }
 0x1f9   :  { %v506_v26 = vld [vmem:[#allocation2 + $0x1] sm:$0xff]  ;;  %839 = vst.msk [vmem:[#allocation2 + $0x9] sm:$0x1] %vm500_vm3, %v4560_v0 }
 0x1fa   :  { %4006 = vmatprep.mubr.msk.f32.mxu1 %vm497_vm4, %v506_v26 }
 0x1fb   :  { %4007 = vmatmul.mubr.msk.f32.vlgmr.msra.gmra.mrb[0].mxu1 %vm497_vm4, %v507_v21 }
 0x1fc   :  { %4010 = vmatpush3.msra.mxu1 %v4860_v13  ;;  %4011 = vmatprep.mubr.msk.f32.mxu1 %vm497_vm4, %v503_v23 }
 0x1fd   :  { %4014 = vmatprep.subr.mxu1 %v4876_v27 }
 0x203   :  { %4012 = vmatmul.mubr.msk.f32.vlgmr.msra.gmra.mrb[0].mxu1 %vm497_vm4, %v504_v24 }
 0x204   :  { %4015 = vmatpush3.msra.mxu1 %v4876_v27  ;;  %4016 = vmatprep.mubr.msk.f32.mxu1 %vm497_vm4, %v672_v25 }
 0x205   :  { %4024 = vmatprep.subr.mxu1 %v4560_v0 }
 0x20b   :  { %4017 = vmatmul.mubr.msk.f32.vlgmr.msra.gmra.mrb[0].mxu1 %vm497_vm4, %v673_v22 }
 0x20c   :  { %4025 = vmatpush3.msra.mxu1 %v4889_v29  ;;  %4026 = vmatprep.mubr.msk.f32.mxu1 %vm4561_vm5, %v4560_v0 }
 0x20d   :  { %4034 = vmatprep.subr.mxu1 %v4560_v0 }
 0x2de   :  { %v4018_v31 = vpop.f32.mrb[0].mxu1 }
 0x2df   :  { %v767_v32 = vadd.f32 %v4018_v31, %v4899_v30  ;;  %v748_v33 = vpop.f32.mrb[1].mxu1 }
 0x2e0   :  { %v766_v34 = vadd.f32 %v4899_v30, %v748_v33 }
 0x2e1   :  { %v769_v35 = vmax.f32 %v767_v32, 0.0 }
 0x2e2   :  { %v768_v36 = vmax.f32 %v766_v34, 0.0 }
 0x2e3   :  { %v806_v37 = vsel %vm770_vm6, %v769_v35, -inf  ;;  %v814_v38 = vsel %vm779_vm7, %v769_v35, -inf  ;;  %v822_v39 = vsel %vm788_vm8, %v769_v35, -inf  ;;  %v830_v40 = vsel %vm797_vm9, %v769_v35, -inf }
 0x2e4   :  { %v807_v41 = vrot.slane %v806_v37, 4  ;;  %v815_v42 = vrot.slane %v814_v38, 4  ;;  %v823_v43 = vrot.slane %v822_v39, 4  ;;  %v831_v44 = vrot.slane %v830_v40, 4 }
 0x2e5   :  { %v771_v45 = vsel %vm770_vm6, %v768_v36, -inf  ;;  %v780_v46 = vsel %vm779_vm7, %v768_v36, -inf  ;;  %v789_v47 = vsel %vm788_vm8, %v768_v36, -inf  ;;  %v798_v48 = vsel %vm797_vm9, %v768_v36, -inf }
 0x2e6   :  { %v808_v49 = vmax.f32 %v806_v37, %v807_v41  ;;  %v816_v50 = vmax.f32 %v814_v38, %v815_v42  ;;  %v824_v51 = vmax.f32 %v822_v39, %v823_v43  ;;  %v832_v52 = vmax.f32 %v830_v40, %v831_v44  ;;  %v4919_v37 = vld [vmem:[#allocation12 + $0x10] sm:$0xff]  ;;  %v4936_v41 = vld [vmem:[#allocation15 + $0x8] sm:$0xff]  ;;  %v4938_v42 = vld [vmem:[#allocation15] sm:$0xff] }
 0x2e7   :  { %v772_v53 = vrot.slane %v771_v45, 4  ;;  %v781_v54 = vrot.slane %v780_v46, 4  ;;  %v790_v55 = vrot.slane %v789_v47, 4  ;;  %v799_v56 = vrot.slane %v798_v48, 4 }
 0x2e8   :  { %v809_v57 = vrot.slane %v808_v49, 2  ;;  %v817_v58 = vrot.slane %v816_v50, 2  ;;  %v825_v59 = vrot.slane %v824_v51, 2  ;;  %v833_v60 = vrot.slane %v832_v52, 2 }
 0x2e9   :  { %v773_v61 = vmax.f32 %v771_v45, %v772_v53  ;;  %v782_v62 = vmax.f32 %v780_v46, %v781_v54  ;;  %v791_v63 = vmax.f32 %v789_v47, %v790_v55  ;;  %v800_v1 = vmax.f32 %v798_v48, %v799_v56  ;;  %v4948_v54 = vld [vmem:[#allocation15 + $0x10] sm:$0xff] }
 0x2ea   :  { %v810_v2 = vmax.f32 %v808_v49, %v809_v57  ;;  %v818_v3 = vmax.f32 %v816_v50, %v817_v58  ;;  %v826_v4 = vmax.f32 %v824_v51, %v825_v59  ;;  %v834_v5 = vmax.f32 %v832_v52, %v833_v60  ;;  %v4944_v49 = vld [vmem:[#allocation13] ss:$0 sm:$0xff]  ;;  %v4968_v58 = vld [vmem:[%s5256_s9 + $0x8] sm:$0xff]  ;;  %v4973_v59 = vld [vmem:[%s5256_s9] sm:$0xff] }
 0x2eb   :  { %v774_v6 = vrot.slane %v773_v61, 2  ;;  %v783_v7 = vrot.slane %v782_v62, 2  ;;  %v792_v8 = vrot.slane %v791_v63, 2  ;;  %v801_v9 = vrot.slane %v800_v1, 2 }
 0x2ec   :  { %v811_v10 = vrot.slane %v810_v2, 1  ;;  %v819_v11 = vrot.slane %v818_v3, 1  ;;  %v827_v15 = vrot.slane %v826_v4, 1  ;;  %v835_v16 = vrot.slane %v834_v5, 1 }
 0x2ed   :  { %v775_v17 = vmax.f32 %v773_v61, %v774_v6  ;;  %v784_v18 = vmax.f32 %v782_v62, %v783_v7  ;;  %v793_v19 = vmax.f32 %v791_v63, %v792_v8  ;;  %v802_v20 = vmax.f32 %v800_v1, %v801_v9 }
 0x2ee   :  { %v812_v21 = vmax.f32 %v810_v2, %v811_v10  ;;  %v820_v22 = vmax.f32 %v818_v3, %v819_v11  ;;  %v828_v23 = vmax.f32 %v826_v4, %v827_v15  ;;  %v836_v24 = vmax.f32 %v834_v5, %v835_v16  ;;  %v4979_v3 = vld [vmem:[#allocation16] ss:$0 sm:$0xff] }
 0x2ef   :  { %v776_v25 = vrot.slane %v775_v17, 1  ;;  %v785_v26 = vrot.slane %v784_v18, 1  ;;  %v794_v31 = vrot.slane %v793_v19, 1  ;;  %v803_v32 = vrot.slane %v802_v20, 1 }
 0x2f0   :  { %813 = vst.msk [vmem:[#allocation2 + $0x5] sm:$0x1] %vm500_vm3, %v812_v21  ;;  %821 = vst.msk [vmem:[#allocation2 + $0x6] sm:$0x1] %vm500_vm3, %v820_v22 }
 0x2f1   :  { %829 = vst.msk [vmem:[#allocation2 + $0x7] sm:$0x1] %vm500_vm3, %v828_v23  ;;  %837 = vst.msk [vmem:[#allocation2 + $0x8] sm:$0x1] %vm500_vm3, %v836_v24  ;;  %v777_v33 = vmax.f32 %v775_v17, %v776_v25  ;;  %v786_v34 = vmax.f32 %v784_v18, %v785_v26  ;;  %v795_v35 = vmax.f32 %v793_v19, %v794_v31 }
 0x2f2   :  { %v804_v36 = vmax.f32 %v802_v20, %v803_v32 }
 0x2f3   :  { %778 = vst.msk [vmem:[#allocation2 + $0x1] sm:$0x1] %vm500_vm3, %v777_v33  ;;  %787 = vst.msk [vmem:[#allocation2 + $0x2] sm:$0x1] %vm500_vm3, %v786_v34 }
 0x2f4   :  { %796 = vst.msk [vmem:[#allocation2 + $0x3] sm:$0x1] %vm500_vm3, %v795_v35  ;;  %805 = vst.msk [vmem:[#allocation2 + $0x4] sm:$0x1] %vm500_vm3, %v804_v36 }
 0x2fb   :  { %v840_v38 = vld [vmem:[#allocation2] sm:$0xff] }
 0x2fc   :  { %v842_v39 = vld [vmem:[#allocation2 + $0x1] sm:$0xff]  ;;  %1078 = vst.msk [vmem:[#allocation2] sm:$0x1] %vm500_vm3, %v4560_v0  ;;  %4027 = vmatmul.mubr.msk.f32.vlgmr.msra.gmra.mrb[2].mxu1 %vm497_vm4, %v840_v38 }
 0x2fd   :  { %v991_v40 = vld [vmem:[#allocation2 + $0x2] sm:$0xff]  ;;  %4022 = vmatmul.mubr.msk.f32.vlgmr.msra.gmra.mrb[2].mxu0 %vm497_vm4, %v842_v39  ;;  %4036 = vmatprep.mubr.msk.f32.mxu1 %vm4561_vm5, %v4560_v0 }
 0x2fe   :  { %1079 = vst.msk [vmem:[#allocation2 + $0x9] sm:$0x1] %vm500_vm3, %v4560_v0  ;;  %4030 = vmatpush3.msra.mxu0 %v4919_v37  ;;  %4031 = vmatprep.mubr.msk.f32.mxu0 %vm4561_vm5, %v4560_v0 }
 0x2ff   :  { %4039 = vmatprep.subr.mxu0 %v4560_v0  ;;  %4035 = vmatpush3.msra.mxu1 %v4936_v41 }
 0x300   :  { %4044 = vmatprep.subr.mxu1 %v4560_v0 }
 0x301   :  { %4032 = vmatmul.mubr.msk.f32.vlgmr.msra.gmra.mrb[4].mxu0 %vm497_vm4, %v991_v40 }
 0x302   :  { %4041 = vmatprep.mubr.msk.f32.mxu0 %vm4561_vm5, %v4560_v0  ;;  %4040 = vmatpush3.msra.mxu0 %v4938_v42 }
 0x303   :  { %4049 = vmatprep.subr.mxu0 %v4560_v0 }
 0x3cf   :  { %v987_v44 = vpop.f32.mrb[2].mxu1 }
 0x3d0   :  { %v914_v43 = vpop.f32.mrb[2].mxu0  ;;  %v4028_v47 = vpop.f32.mrb[3].mxu1 }
 0x3d1   :  { %v988_v45 = vadd.f32 %v987_v44, %v914_v43  ;;  %v4023_v46 = vpop.f32.mrb[3].mxu0 }
 0x3d2   :  { %v4993_v46 = vld [vmem:[%s5256_s9 + $0x10] sm:$0xff]  ;;  %s3795_s9 = sshll.u32 %s4563_s6, 4  ;;  %s3796_s9 = int_to_ptr.vmem [resolvable:$true] %s3795_s9 }
 0x3d3   :  { %p4511_p13 = scmp.lt.s32.totalorder %s3796_s9, %s3796_s9 }
 0x3d4   :  { %v1063_v48 = vpop.f32.mrb[4].mxu0 }
 0x3d5   :  { %v1067_v50 = vadd.f32 %v1063_v48, %v988_v45  ;;  %v4033_v51 = vpop.f32.mrb[5].mxu0 }
 0x3d6   :  { %v5013_v51 = vld [vmem:[%s5258_s11 + $0x8] sm:$0xff] }
 0x3d7   :  { %v1075_v52 = vadd.f32 %v4944_v49, %v1067_v50 }
 0x3d9   :  { %v1076_v53 = vmax.f32 %v1075_v52, 0.0  ;;  %v5018_v52 = vld [vmem:[%s5258_s11] sm:$0xff] }
 0x3db   :  { %1077 = vst.msk [vmem:[#allocation2 + $0x1] sm:$0xff] %vm497_vm4, %v1076_v53  ;;  %v3848_v53 = vld [vmem:[%s5278_s23 + $0x18] sm:$0xff] }
 0x3e2   :  { %v1080_v55 = vld [vmem:[#allocation2] sm:$0xff] }
 0x3e3   :  { %v1082_v56 = vld [vmem:[#allocation2 + $0x1] sm:$0xff]  ;;  %1349 = vst.msk [vmem:[#allocation2] sm:$0x1] %vm500_vm3, %v4560_v0  ;;  %4042 = vmatmul.mubr.msk.f32.vlgmr.msra.gmra.mrb[6].mxu0 %vm497_vm4, %v1080_v55 }
 0x3e4   :  { %v1231_v57 = vld [vmem:[#allocation2 + $0x2] sm:$0xff]  ;;  %4037 = vmatmul.mubr.msk.f32.vlgmr.msra.gmra.mrb[4].mxu1 %vm497_vm4, %v1082_v56  ;;  %4051 = vmatprep.mubr.msk.f32.mxu0 %vm4561_vm5, %v4560_v0 }
 0x3e5   :  { %1350 = vst.msk [vmem:[#allocation2 + $0x5] sm:$0x1] %vm500_vm3, %v4560_v0  ;;  %4045 = vmatpush3.msra.mxu1 %v4948_v54  ;;  %4046 = vmatprep.mubr.msk.f32.mxu1 %vm4561_vm5, %v4560_v0  ;;  %v1858_v55 = vld [vmem:[#allocation4 + $0x4] sm:$0xf] }
 0x3e6   :  { %4054 = vmatprep.subr.mxu1 %v4560_v0  ;;  %4050 = vmatpush3.msra.mxu0 %v4968_v58  ;;  %1850 = vst.msk [vmem:[#allocation2 + $0x9] sm:$0xff] %vm214_vm2, %v3848_v53 }
 0x3e7   :  { %4059 = vmatprep.subr.mxu0 %v4560_v0 }
 0x3e8   :  { %4047 = vmatmul.mubr.msk.f32.vlgmr.msra.gmra.mrb[6].mxu1 %vm497_vm4, %v1231_v57 }
 0x3e9   :  { %4056 = vmatprep.mubr.msk.f32.mxu1 %vm4561_vm5, %v4560_v0  ;;  %4055 = vmatpush3.msra.mxu1 %v4973_v59 }
 0x3ea   :  { %4064 = vmatprep.subr.mxu1 %v4560_v0 }
 0x3ed   :  { %v2028_v56 = vld [vmem:[#allocation2 + $0xa] sm:$0xff] }
 0x3ee   :  { %2130 = vst.msk [vmem:[#allocation2 + $0x11] sm:$0x1] %vm500_vm3, %v4560_v0 }
 0x4b6   :  { %v1227_v61 = vpop.f32.mrb[6].mxu0 }
 0x4b7   :  { %v1154_v60 = vpop.f32.mrb[4].mxu1  ;;  %v4043_v1 = vpop.f32.mrb[7].mxu0 }
 0x4b8   :  { %v1228_v62 = vadd.f32 %v1227_v61, %v1154_v60  ;;  %v4038_v63 = vpop.f32.mrb[5].mxu1 }
 0x4bb   :  { %v1303_v2 = vpop.f32.mrb[6].mxu1 }
 0x4bc   :  { %v1307_v4 = vadd.f32 %v1303_v2, %v1228_v62  ;;  %v4048_v5 = vpop.f32.mrb[7].mxu1  ;;  %v5030_v2 = vld [vmem:[#allocation18] ss:$0 sm:$0xff] }
 0x4be   :  { %v1315_v6 = vadd.f32 %v4979_v3, %v1307_v4 }
 0x4c0   :  { %v1316_v7 = vmax.f32 %v1315_v6, 0.0 }
 0x4c2   :  { %v1317_v8 = vsel %vm770_vm6, %v1316_v7, -inf  ;;  %v1325_v9 = vsel %vm779_vm7, %v1316_v7, -inf  ;;  %v1333_v10 = vsel %vm788_vm8, %v1316_v7, -inf  ;;  %v1341_v11 = vsel %vm797_vm9, %v1316_v7, -inf }
 0x4c3   :  { %v1318_v15 = vrot.slane %v1317_v8, 4  ;;  %v1326_v16 = vrot.slane %v1325_v9, 4  ;;  %v1334_v17 = vrot.slane %v1333_v10, 4  ;;  %v1342_v18 = vrot.slane %v1341_v11, 4 }
 0x4c5   :  { %v1319_v19 = vmax.f32 %v1317_v8, %v1318_v15  ;;  %v1327_v20 = vmax.f32 %v1325_v9, %v1326_v16  ;;  %v1335_v21 = vmax.f32 %v1333_v10, %v1334_v17  ;;  %v1343_v22 = vmax.f32 %v1341_v11, %v1342_v18  ;;  %v3847_v8 = vld [vmem:[%s5278_s23 + $0x10] sm:$0xff]  ;;  %v1855_v16 = vld [vmem:[#allocation4] sm:$0xf] }
 0x4c6   :  { %v5040_v9 = vld [vmem:[%s5258_s11 + $0x10] sm:$0xff] }
 0x4c7   :  { %v1320_v23 = vrot.slane %v1319_v19, 2  ;;  %v1328_v24 = vrot.slane %v1327_v20, 2  ;;  %v1336_v25 = vrot.slane %v1335_v21, 2  ;;  %v1344_v26 = vrot.slane %v1343_v22, 2  ;;  %v1857_v17 = vld [vmem:[#allocation2 + $0x9] sm:$0xff] }
 0x4c9   :  { %v1321_v31 = vmax.f32 %v1319_v19, %v1320_v23  ;;  %v1329_v32 = vmax.f32 %v1327_v20, %v1328_v24  ;;  %v1337_v33 = vmax.f32 %v1335_v21, %v1336_v25  ;;  %v1345_v34 = vmax.f32 %v1343_v22, %v1344_v26  ;;  %v2029_v20 = vld [vmem:[#allocation4 + $0x8] sm:$0xf] }
 0x4cb   :  { %v1322_v35 = vrot.slane %v1321_v31, 1  ;;  %v1330_v36 = vrot.slane %v1329_v32, 1  ;;  %v1338_v38 = vrot.slane %v1337_v33, 1  ;;  %v1346_v39 = vrot.slane %v1345_v34, 1 }
 0x4cd   :  { %v1323_v40 = vmax.f32 %v1321_v31, %v1322_v35  ;;  %v1331_v43 = vmax.f32 %v1329_v32, %v1330_v36  ;;  %v1339_v44 = vmax.f32 %v1337_v33, %v1338_v38  ;;  %v1347_v45 = vmax.f32 %v1345_v34, %v1346_v39  ;;  %v5072_v32 = vld [vmem:[#allocation19] ss:$0 sm:$0xff] }
 0x4cf   :  { %1324 = vst.msk [vmem:[#allocation2 + $0x1] sm:$0x1] %vm500_vm3, %v1323_v40  ;;  %1332 = vst.msk [vmem:[#allocation2 + $0x2] sm:$0x1] %vm500_vm3, %v1331_v43 }
 0x4d0   :  { %1340 = vst.msk [vmem:[#allocation2 + $0x3] sm:$0x1] %vm500_vm3, %v1339_v44  ;;  %1348 = vst.msk [vmem:[#allocation2 + $0x4] sm:$0x1] %vm500_vm3, %v1347_v45 }
 0x4d7   :  { %v1351_v47 = vld [vmem:[#allocation2] sm:$0xf] }
 0x4d8   :  { %v1353_v48 = vld [vmem:[#allocation2 + $0x1] sm:$0xf]  ;;  %1590 = vst.msk [vmem:[#allocation2] sm:$0x1] %vm500_vm3, %v4560_v0  ;;  %4057 = vmatmul.mubr.msk.f32.vlgmr.msra.gmra.mrb[8].mxu1 %vm497_vm4, %v1351_v47 }
 0x4d9   :  { %v1502_v50 = vld [vmem:[#allocation2 + $0x2] sm:$0xf]  ;;  %4052 = vmatmul.mubr.msk.f32.vlgmr.msra.gmra.mrb[8].mxu0 %vm497_vm4, %v1353_v48  ;;  %4066 = vmatprep.mubr.msk.f32.mxu1 %vm4561_vm5, %v4560_v0 }
 0x4da   :  { %1591 = vst.msk [vmem:[#allocation2 + $0x5] sm:$0x1] %vm500_vm3, %v4560_v0  ;;  %4060 = vmatpush3.msra.mxu0 %v4993_v46  ;;  %4061 = vmatprep.mubr.msk.f32.mxu0 %vm4561_vm5, %v4560_v0 }
 0x4db   :  { %4069 = vmatprep.subr.mxu0 %v4560_v0  ;;  %4065 = vmatpush3.msra.mxu1 %v5013_v51 }
 0x4dc   :  { %4074 = vmatprep.subr.mxu1 %v4560_v0 }
 0x4dd   :  { %4062 = vmatmul.mubr.msk.f32.vlgmr.msra.gmra.mrb[10].mxu0 %vm497_vm4, %v1502_v50 }
 0x4de   :  { %4071 = vmatprep.mubr.msk.f32.mxu0 %vm4561_vm5, %v4560_v0  ;;  %4070 = vmatpush3.msra.mxu0 %v5018_v52 }
 0x4df   :  { %4079 = vmatprep.subr.msk.mxu0 %vm233_vm1, %v1858_v55 }
 0x5ab   :  { %v1498_v60 = vpop.f32.mrb[8].mxu1 }
 0x5ac   :  { %v1425_v57 = vpop.f32.mrb[8].mxu0  ;;  %v4058_v63 = vpop.f32.mrb[9].mxu1 }
 0x5ad   :  { %v1499_v61 = vadd.f32 %v1498_v60, %v1425_v57  ;;  %v4053_v62 = vpop.f32.mrb[9].mxu0 }
 0x5b0   :  { %v1574_v1 = vpop.f32.mrb[10].mxu0 }
 0x5b1   :  { %v1578_v4 = vadd.f32 %v1574_v1, %v1499_v61  ;;  %v4063_v5 = vpop.f32.mrb[11].mxu0 }
 0x5b3   :  { %v1586_v6 = vadd.f32 %v5030_v2, %v1578_v4 }
 0x5b5   :  { %v1587_v7 = vmax.f32 %v1586_v6, 0.0 }
 0x5b7   :  { %1589 = vst.msk [vmem:[#allocation2 + $0x1] sm:$0xf] %vm1588_vm10, %v1587_v7 }
 0x5be   :  { %v1592_v10 = vld [vmem:[#allocation2] sm:$0xf] }
 0x5bf   :  { %v1594_v11 = vld [vmem:[#allocation2 + $0x1] sm:$0xf]  ;;  %1851 = vst.msk [vmem:[#allocation2] sm:$0x1] %vm217_vm0, %v4560_v0  ;;  %4072 = vmatmul.mubr.msk.f32.vlgmr.msra.gmra.mrb[12].mxu0 %vm497_vm4, %v1592_v10 }
 0x5c0   :  { %v1743_v15 = vld [vmem:[#allocation2 + $0x2] sm:$0xf]  ;;  %4067 = vmatmul.mubr.msk.f32.vlgmr.msra.gmra.mrb[10].mxu1 %vm497_vm4, %v1594_v11  ;;  %4080 = vmatpush3.msk.msra.mxu0 %vm233_vm1, %v1858_v55 }
 0x5c1   :  { %1849 = vst.msk [vmem:[#allocation2 + $0x1] sm:$0xff] %vm214_vm2, %v3847_v8  ;;  %4075 = vmatpush3.msra.mxu1 %v5040_v9  ;;  %4076 = vmatprep.mubr.msk.f32.mxu1 %vm4561_vm5, %v4560_v0 }
 0x5c2   :  { %4094 = vmatprep.subr.mxu1 %v4856_v12  ;;  %4084 = vmatprep.subr.msk.mxu0 %vm233_vm1, %v1855_v16 }
 0x5c4   :  { %4077 = vmatmul.mubr.msk.f32.vlgmr.msra.gmra.mrb[12].mxu1 %vm497_vm4, %v1743_v15 }
 0x5c5   :  { %4095 = vmatpush3.msra.mxu1 %v4856_v12 }
 0x5c6   :  { %4099 = vmatprep.subr.mxu1 %v4860_v13 }
 0x5c8   :  { %v1853_v18 = vld [vmem:[#allocation2] sm:$0xff]  ;;  %v1854_v12 = vld [vmem:[#allocation2 + $0x8] sm:$0xff] }
 0x5c9   :  { %v1856_v19 = vld [vmem:[#allocation2 + $0x1] sm:$0xff]  ;;  %2129 = vst.msk [vmem:[#allocation2] sm:$0x1] %vm500_vm3, %v4560_v0 }
 0x5ca   :  { %4081 = vmatprep.mubr.msk.f32.mxu0 %vm214_vm2, %v1856_v19  ;;  %v2027_v21 = vld [vmem:[#allocation2 + $0x2] sm:$0xff] }
 0x5cb   :  { %4082 = vmatmul.mubr.msk.f32.vlgmr.msra.gmra.mrb[14].mxu0 %vm214_vm2, %v1857_v17 }
 0x5cc   :  { %4085 = vmatpush3.msk.msra.mxu0 %vm233_vm1, %v1855_v16  ;;  %4086 = vmatprep.mubr.msk.f32.mxu0 %vm214_vm2, %v1853_v18 }
 0x5cd   :  { %4089 = vmatprep.subr.msk.mxu0 %vm233_vm1, %v2029_v20 }
 0x5d3   :  { %4087 = vmatmul.mubr.msk.f32.vlgmr.msra.gmra.mrb[14].mxu0 %vm214_vm2, %v1854_v12 }
 0x5d4   :  { %4090 = vmatpush3.msk.msra.mxu0 %vm233_vm1, %v2029_v20  ;;  %4091 = vmatprep.mubr.msk.f32.mxu0 %vm214_vm2, %v2027_v21 }
 0x5d5   :  { %4109 = vmatprep.subr.mxu0 %v4560_v0 }
 0x5db   :  { %4092 = vmatmul.mubr.msk.f32.vlgmr.msra.gmra.mrb[14].mxu0 %vm214_vm2, %v2028_v56 }
 0x5dc   :  { %4110 = vmatpush3.msra.mxu0 %v4887_v28  ;;  %4111 = vmatprep.mubr.msk.f32.mxu0 %vm4561_vm5, %v4560_v0 }
 0x5dd   :  { %4119 = vmatprep.subr.mxu0 %v4560_v0 }
 0x692   :  { %v1739_v23 = vpop.f32.mrb[12].mxu0 }
 0x693   :  { %v1666_v22 = vpop.f32.mrb[10].mxu1  ;;  %v4073_v26 = vpop.f32.mrb[13].mxu0 }
 0x694   :  { %v1740_v24 = vadd.f32 %v1739_v23, %v1666_v22  ;;  %v4068_v25 = vpop.f32.mrb[11].mxu1 }
 0x697   :  { %v1815_v31 = vpop.f32.mrb[12].mxu1 }
 0x698   :  { %v1819_v33 = vadd.f32 %v1815_v31, %v1740_v24  ;;  %v4078_v34 = vpop.f32.mrb[13].mxu1 }
 0x69a   :  { %v1827_v35 = vadd.f32 %v5072_v32, %v1819_v33 }
 0x69c   :  { %v1828_v36 = vmax.f32 %v1827_v35, 0.0 }
 0x69e   :  { %v1829_v28 = vsel %vm770_vm6, %v1828_v36, -inf  ;;  %v1837_v38 = vsel %vm779_vm7, %v1828_v36, -inf }
 0x69f   :  { %v1830_v39 = vrot.slane %v1829_v28, 4  ;;  %v1838_v40 = vrot.slane %v1837_v38, 4 }
 0x6a1   :  { %v1831_v43 = vmax.f32 %v1829_v28, %v1830_v39  ;;  %v1839_v44 = vmax.f32 %v1837_v38, %v1838_v40 }
 0x6a3   :  { %v1832_v45 = vrot.slane %v1831_v43, 2  ;;  %v1840_v47 = vrot.slane %v1839_v44, 2 }
 0x6a5   :  { %v1833_v48 = vmax.f32 %v1831_v43, %v1832_v45  ;;  %v1841_v50 = vmax.f32 %v1839_v44, %v1840_v47 }
 0x6a7   :  { %v1834_v53 = vrot.slane %v1833_v48, 1  ;;  %v1842_v55 = vrot.slane %v1841_v50, 1 }
 0x6a9   :  { %v1835_v56 = vmax.f32 %v1833_v48, %v1834_v53  ;;  %v1843_v57 = vmax.f32 %v1841_v50, %v1842_v55 }
 0x6ab   :  { %1836 = vst.msk [vmem:[#allocation3] sm:$0x1] %vm500_vm3, %v1835_v56  ;;  %1845 = vst.msk [vmem:[#allocation3 + $0x2] sm:$0x1] %vm500_vm3, %v1843_v57 }
 0x6ae   :  { %v4093_v60 = vpop.f32.mrb[14].mxu0 }
 0x6af   :  { %v2124_v61 = vadd.f32 %v4093_v60, %v4863_v14  ;;  %v2105_v62 = vpop.f32.mrb[15].mxu0 }
 0x6b0   :  { %v2123_v63 = vadd.f32 %v4863_v14, %v2105_v62 }
 0x6b1   :  { %v2126_v1 = vmax.f32 %v2124_v61, 0.0 }
 0x6b2   :  { %v2125_v4 = vmax.f32 %v2123_v63, 0.0 }
 0x6b3   :  { %2128 = vst.msk [vmem:[#allocation2 + $0x9] sm:$0xff] %vm497_vm4, %v2126_v1 }
 0x6b4   :  { %2127 = vst.msk [vmem:[#allocation2 + $0x1] sm:$0xff] %vm497_vm4, %v2125_v4 }
 0x6ba   :  { %v2135_v7 = vld [vmem:[#allocation2 + $0x9] sm:$0xff] }
 0x6bb   :  { %v2134_v5 = vld [vmem:[#allocation2 + $0x1] sm:$0xff]  ;;  %v2300_v14 = vld [vmem:[#allocation2 + $0xa] sm:$0xff] }
 0x6bc   :  { %v2131_v6 = vld [vmem:[#allocation2] sm:$0xff]  ;;  %4096 = vmatprep.mubr.msk.f32.mxu1 %vm497_vm4, %v2134_v5  ;;  %v2132_v10 = vld [vmem:[#allocation2 + $0x8] sm:$0xff] }
 0x6bd   :  { %v2299_v8 = vld [vmem:[#allocation2 + $0x2] sm:$0xff]  ;;  %2460 = vst.msk [vmem:[#allocation2] sm:$0x1] %vm500_vm3, %v4560_v0  ;;  %4097 = vmatmul.mubr.msk.f32.vlgmr.msra.gmra.mrb[14].mxu1 %vm497_vm4, %v2135_v7 }
 0x6be   :  { %2461 = vst.msk [vmem:[#allocation2 + $0x9] sm:$0x1] %vm500_vm3, %v4560_v0  ;;  %4100 = vmatpush3.msra.mxu1 %v4860_v13  ;;  %4101 = vmatprep.mubr.msk.f32.mxu1 %vm497_vm4, %v2131_v6 }
 0x6bf   :  { %4104 = vmatprep.subr.mxu1 %v4876_v27 }
 0x6c5   :  { %4102 = vmatmul.mubr.msk.f32.vlgmr.msra.gmra.mrb[14].mxu1 %vm497_vm4, %v2132_v10 }
 0x6c6   :  { %4105 = vmatpush3.msra.mxu1 %v4876_v27  ;;  %4106 = vmatprep.mubr.msk.f32.mxu1 %vm497_vm4, %v2299_v8 }
 0x6c7   :  { %4114 = vmatprep.subr.mxu1 %v4560_v0 }
 0x6cd   :  { %4107 = vmatmul.mubr.msk.f32.vlgmr.msra.gmra.mrb[14].mxu1 %vm497_vm4, %v2300_v14 }
 0x6ce   :  { %4115 = vmatpush3.msra.mxu1 %v4889_v29  ;;  %4116 = vmatprep.mubr.msk.f32.mxu1 %vm4561_vm5, %v4560_v0 }
 0x6cf   :  { %4124 = vmatprep.subr.mxu1 %v4560_v0 }
 0x7a0   :  { %v4108_v13 = vpop.f32.mrb[14].mxu1 }
 0x7a1   :  { %v2393_v11 = vadd.f32 %v4108_v13, %v4899_v30  ;;  %v2374_v15 = vpop.f32.mrb[15].mxu1 }
 0x7a2   :  { %v2392_v27 = vadd.f32 %v4899_v30, %v2374_v15 }
 0x7a3   :  { %v2395_v16 = vmax.f32 %v2393_v11, 0.0 }
 0x7a4   :  { %v2394_v17 = vmax.f32 %v2392_v27, 0.0 }
 0x7a5   :  { %v2428_v18 = vsel %vm770_vm6, %v2395_v16, -inf  ;;  %v2436_v19 = vsel %vm779_vm7, %v2395_v16, -inf  ;;  %v2444_v20 = vsel %vm788_vm8, %v2395_v16, -inf  ;;  %v2452_v29 = vsel %vm797_vm9, %v2395_v16, -inf }
 0x7a6   :  { %v2429_v12 = vrot.slane %v2428_v18, 4  ;;  %v2437_v21 = vrot.slane %v2436_v19, 4  ;;  %v2445_v22 = vrot.slane %v2444_v20, 4  ;;  %v2453_v23 = vrot.slane %v2452_v29, 4 }
 0x7a7   :  { %v2396_v24 = vsel %vm770_vm6, %v2394_v17, -inf  ;;  %v2404_v25 = vsel %vm779_vm7, %v2394_v17, -inf  ;;  %v2412_v30 = vsel %vm788_vm8, %v2394_v17, -inf  ;;  %v2420_v26 = vsel %vm797_vm9, %v2394_v17, -inf }
 0x7a8   :  { %v2430_v31 = vmax.f32 %v2428_v18, %v2429_v12  ;;  %v2438_v33 = vmax.f32 %v2436_v19, %v2437_v21  ;;  %v2446_v34 = vmax.f32 %v2444_v20, %v2445_v22  ;;  %v2454_v35 = vmax.f32 %v2452_v29, %v2453_v23 }
 0x7a9   :  { %v2397_v36 = vrot.slane %v2396_v24, 4  ;;  %v2405_v28 = vrot.slane %v2404_v25, 4  ;;  %v2413_v38 = vrot.slane %v2412_v30, 4  ;;  %v2421_v39 = vrot.slane %v2420_v26, 4 }
 0x7aa   :  { %v2431_v40 = vrot.slane %v2430_v31, 2  ;;  %v2439_v43 = vrot.slane %v2438_v33, 2  ;;  %v2447_v44 = vrot.slane %v2446_v34, 2  ;;  %v2455_v45 = vrot.slane %v2454_v35, 2 }
 0x7ab   :  { %v2398_v47 = vmax.f32 %v2396_v24, %v2397_v36  ;;  %v2406_v48 = vmax.f32 %v2404_v25, %v2405_v28  ;;  %v2414_v50 = vmax.f32 %v2412_v30, %v2413_v38  ;;  %v2422_v53 = vmax.f32 %v2420_v26, %v2421_v39 }
 0x7ac   :  { %v2432_v55 = vmax.f32 %v2430_v31, %v2431_v40  ;;  %v2440_v56 = vmax.f32 %v2438_v33, %v2439_v43  ;;  %v2448_v57 = vmax.f32 %v2446_v34, %v2447_v44  ;;  %v2456_v60 = vmax.f32 %v2454_v35, %v2455_v45 }
 0x7ad   :  { %v2399_v61 = vrot.slane %v2398_v47, 2  ;;  %v2407_v62 = vrot.slane %v2406_v48, 2  ;;  %v2415_v63 = vrot.slane %v2414_v50, 2  ;;  %v2423_v1 = vrot.slane %v2422_v53, 2 }
 0x7ae   :  { %v2433_v4 = vrot.slane %v2432_v55, 1  ;;  %v2441_v5 = vrot.slane %v2440_v56, 1  ;;  %v2449_v6 = vrot.slane %v2448_v57, 1  ;;  %v2457_v7 = vrot.slane %v2456_v60, 1 }
 0x7af   :  { %v2400_v8 = vmax.f32 %v2398_v47, %v2399_v61  ;;  %v2408_v10 = vmax.f32 %v2406_v48, %v2407_v62  ;;  %v2416_v14 = vmax.f32 %v2414_v50, %v2415_v63  ;;  %v2424_v13 = vmax.f32 %v2422_v53, %v2423_v1 }
 0x7b0   :  { %v2434_v11 = vmax.f32 %v2432_v55, %v2433_v4  ;;  %v2442_v15 = vmax.f32 %v2440_v56, %v2441_v5  ;;  %v2450_v27 = vmax.f32 %v2448_v57, %v2449_v6  ;;  %v2458_v16 = vmax.f32 %v2456_v60, %v2457_v7 }
 0x7b1   :  { %v2401_v17 = vrot.slane %v2400_v8, 1  ;;  %v2409_v18 = vrot.slane %v2408_v10, 1  ;;  %v2417_v19 = vrot.slane %v2416_v14, 1  ;;  %v2425_v20 = vrot.slane %v2424_v13, 1 }
 0x7b2   :  { %2435 = vst.msk [vmem:[#allocation2 + $0x5] sm:$0x1] %vm500_vm3, %v2434_v11  ;;  %2443 = vst.msk [vmem:[#allocation2 + $0x6] sm:$0x1] %vm500_vm3, %v2442_v15 }
 0x7b3   :  { %2451 = vst.msk [vmem:[#allocation2 + $0x7] sm:$0x1] %vm500_vm3, %v2450_v27  ;;  %2459 = vst.msk [vmem:[#allocation2 + $0x8] sm:$0x1] %vm500_vm3, %v2458_v16  ;;  %v2402_v29 = vmax.f32 %v2400_v8, %v2401_v17  ;;  %v2410_v12 = vmax.f32 %v2408_v10, %v2409_v18  ;;  %v2418_v21 = vmax.f32 %v2416_v14, %v2417_v19 }
 0x7b4   :  { %v2426_v22 = vmax.f32 %v2424_v13, %v2425_v20 }
 0x7b5   :  { %2403 = vst.msk [vmem:[#allocation2 + $0x1] sm:$0x1] %vm500_vm3, %v2402_v29  ;;  %2411 = vst.msk [vmem:[#allocation2 + $0x2] sm:$0x1] %vm500_vm3, %v2410_v12 }
 0x7b6   :  { %2419 = vst.msk [vmem:[#allocation2 + $0x3] sm:$0x1] %vm500_vm3, %v2418_v21  ;;  %2427 = vst.msk [vmem:[#allocation2 + $0x4] sm:$0x1] %vm500_vm3, %v2426_v22 }
 0x7bd   :  { %v2464_v23 = vld [vmem:[#allocation2 + $0x1] sm:$0xff] }
 0x7be   :  { %v2462_v24 = vld [vmem:[#allocation2] sm:$0xff]  ;;  %4112 = vmatmul.mubr.msk.f32.vlgmr.msra.gmra.mrb[16].mxu0 %vm497_vm4, %v2464_v23 }
 0x7bf   :  { %v2612_v25 = vld [vmem:[#allocation2 + $0x2] sm:$0xff]  ;;  %4117 = vmatmul.mubr.msk.f32.vlgmr.msra.gmra.mrb[16].mxu1 %vm497_vm4, %v2462_v24  ;;  %2698 = vst.msk [vmem:[#allocation2] sm:$0x1] %vm500_vm3, %v4560_v0  ;;  %4120 = vmatpush3.msra.mxu0 %v4919_v37 }
 0x7c0   :  { %2699 = vst.msk [vmem:[#allocation2 + $0x9] sm:$0x1] %vm500_vm3, %v4560_v0  ;;  %4121 = vmatprep.mubr.msk.f32.mxu0 %vm4561_vm5, %v4560_v0  ;;  %4125 = vmatpush3.msra.mxu1 %v4936_v41 }
 0x7c1   :  { %4129 = vmatprep.subr.mxu0 %v4560_v0  ;;  %4126 = vmatprep.mubr.msk.f32.mxu1 %vm4561_vm5, %v4560_v0 }
 0x7c2   :  { %4134 = vmatprep.subr.mxu1 %v4560_v0  ;;  %4122 = vmatmul.mubr.msk.f32.vlgmr.msra.gmra.mrb[18].mxu0 %vm497_vm4, %v2612_v25 }
 0x7c3   :  { %4130 = vmatpush3.msra.mxu0 %v4938_v42  ;;  %4131 = vmatprep.mubr.msk.f32.mxu0 %vm4561_vm5, %v4560_v0 }
 0x7c4   :  { %4139 = vmatprep.subr.mxu0 %v4560_v0 }
 0x891   :  { %v2535_v37 = vpop.f32.mrb[16].mxu0 }
 0x892   :  { %v2608_v30 = vpop.f32.mrb[16].mxu1  ;;  %v4113_v41 = vpop.f32.mrb[17].mxu0 }
 0x893   :  { %v2609_v26 = vadd.f32 %v2608_v30, %v2535_v37  ;;  %v4118_v31 = vpop.f32.mrb[17].mxu1 }
 0x895   :  { %v2683_v33 = vpop.f32.mrb[18].mxu0 }
 0x896   :  { %v2687_v34 = vadd.f32 %v2683_v33, %v2609_v26  ;;  %v4123_v35 = vpop.f32.mrb[19].mxu0 }
 0x897   :  { %v3459_v35 = vld [vmem:[#allocation21] sm:$0xff] }
 0x898   :  { %v2695_v36 = vadd.f32 %v4944_v49, %v2687_v34  ;;  %v3462_v34 = vld [vmem:[#allocation21 + $0x8] sm:$0xff] }
 0x89a   :  { %v2696_v28 = vmax.f32 %v2695_v36, 0.0  ;;  %v4562_v36 = vmov 0.0|0.0  }
 0x89c   :  { %2697 = vst.msk [vmem:[#allocation2 + $0x1] sm:$0xff] %vm497_vm4, %v2696_v28 }
 0x8a3   :  { %v2702_v38 = vld [vmem:[#allocation2 + $0x1] sm:$0xff] }
 0x8a4   :  { %v2700_v42 = vld [vmem:[#allocation2] sm:$0xff]  ;;  %4127 = vmatmul.mubr.msk.f32.vlgmr.msra.gmra.mrb[18].mxu1 %vm497_vm4, %v2702_v38 }
 0x8a5   :  { %v2850_v39 = vld [vmem:[#allocation2 + $0x2] sm:$0xff]  ;;  %4132 = vmatmul.mubr.msk.f32.vlgmr.msra.gmra.mrb[20].mxu0 %vm497_vm4, %v2700_v42  ;;  %2967 = vst.msk [vmem:[#allocation2] sm:$0x1] %vm500_vm3, %v4560_v0  ;;  %4135 = vmatpush3.msra.mxu1 %v4948_v54 }
 0x8a6   :  { %2968 = vst.msk [vmem:[#allocation2 + $0x5] sm:$0x1] %vm500_vm3, %v4560_v0  ;;  %4136 = vmatprep.mubr.msk.f32.mxu1 %vm4561_vm5, %v4560_v0  ;;  %4140 = vmatpush3.msra.mxu0 %v4968_v58 }
 0x8a7   :  { %4144 = vmatprep.subr.mxu1 %v4560_v0  ;;  %4141 = vmatprep.mubr.msk.f32.mxu0 %vm4561_vm5, %v4560_v0 }
 0x8a8   :  { %4149 = vmatprep.subr.mxu0 %v4560_v0  ;;  %4137 = vmatmul.mubr.msk.f32.vlgmr.msra.gmra.mrb[20].mxu1 %vm497_vm4, %v2850_v39 }
 0x8a9   :  { %4145 = vmatpush3.msra.mxu1 %v4973_v59  ;;  %4146 = vmatprep.mubr.msk.f32.mxu1 %vm4561_vm5, %v4560_v0 }
 0x8aa   :  { %4154 = vmatprep.subr.mxu1 %v4560_v0 }
 0x977   :  { %v2773_v49 = vpop.f32.mrb[18].mxu1 }
 0x978   :  { %v2846_v54 = vpop.f32.mrb[20].mxu0  ;;  %v4128_v58 = vpop.f32.mrb[19].mxu1 }
 0x979   :  { %v2847_v40 = vadd.f32 %v2846_v54, %v2773_v49  ;;  %v4133_v43 = vpop.f32.mrb[21].mxu0 }
 0x97b   :  { %v2921_v44 = vpop.f32.mrb[20].mxu1 }
 0x97c   :  { %v2925_v45 = vadd.f32 %v2921_v44, %v2847_v40  ;;  %v4138_v47 = vpop.f32.mrb[21].mxu1 }
 0x97e   :  { %v2933_v48 = vadd.f32 %v4979_v3, %v2925_v45 }
 0x980   :  { %v2934_v50 = vmax.f32 %v2933_v48, 0.0 }
 0x982   :  { %v2935_v53 = vsel %vm770_vm6, %v2934_v50, -inf  ;;  %v2943_v59 = vsel %vm779_vm7, %v2934_v50, -inf  ;;  %v2951_v55 = vsel %vm788_vm8, %v2934_v50, -inf  ;;  %v2959_v56 = vsel %vm797_vm9, %v2934_v50, -inf }
 0x983   :  { %v2936_v57 = vrot.slane %v2935_v53, 4  ;;  %v2944_v60 = vrot.slane %v2943_v59, 4  ;;  %v2952_v61 = vrot.slane %v2951_v55, 4  ;;  %v2960_v62 = vrot.slane %v2959_v56, 4 }
 0x985   :  { %v2937_v63 = vmax.f32 %v2935_v53, %v2936_v57  ;;  %v2945_v1 = vmax.f32 %v2943_v59, %v2944_v60  ;;  %v2953_v4 = vmax.f32 %v2951_v55, %v2952_v61  ;;  %v2961_v5 = vmax.f32 %v2959_v56, %v2960_v62 }
 0x987   :  { %v2938_v6 = vrot.slane %v2937_v63, 2  ;;  %v2946_v7 = vrot.slane %v2945_v1, 2  ;;  %v2954_v3 = vrot.slane %v2953_v4, 2  ;;  %v2962_v8 = vrot.slane %v2961_v5, 2 }
 0x989   :  { %v2939_v10 = vmax.f32 %v2937_v63, %v2938_v6  ;;  %v2947_v14 = vmax.f32 %v2945_v1, %v2946_v7  ;;  %v2955_v13 = vmax.f32 %v2953_v4, %v2954_v3  ;;  %v2963_v11 = vmax.f32 %v2961_v5, %v2962_v8  ;;  %v3618_v4 = vld [vmem:[%s5262_s15] sm:$0xff]  ;;  %v3619_v5 = vld [vmem:[%s5262_s15 + $0x8] sm:$0xff]  ;;  %v3620_v7 = vld [vmem:[%s5262_s15 + $0x10] sm:$0xff] }
 0x98a   :  { %v4198_v6 = vpack.c.bf16 %v3619_v5, %v3618_v4  ;;  %v3621_v3 = vld [vmem:[%s5262_s15 + $0x18] sm:$0xff] }
 0x98b   :  { %v2940_v15 = vrot.slane %v2939_v10, 1  ;;  %v2948_v27 = vrot.slane %v2947_v14, 1  ;;  %v2956_v16 = vrot.slane %v2955_v13, 1  ;;  %v2964_v17 = vrot.slane %v2963_v11, 1 }
 0x98d   :  { %v2941_v18 = vmax.f32 %v2939_v10, %v2940_v15  ;;  %v2949_v19 = vmax.f32 %v2947_v14, %v2948_v27  ;;  %v2957_v20 = vmax.f32 %v2955_v13, %v2956_v16  ;;  %v2965_v29 = vmax.f32 %v2963_v11, %v2964_v17  ;;  %v3888_v14 = vld [vmem:[#allocation22] ss:$0 sm:$0xff]  ;;  %v3704_v17 = vld [vmem:[%s5264_s17] sm:$0xff] }
 0x98f   :  { %2942 = vst.msk [vmem:[#allocation2 + $0x1] sm:$0x1] %vm500_vm3, %v2941_v18  ;;  %2950 = vst.msk [vmem:[#allocation2 + $0x2] sm:$0x1] %vm500_vm3, %v2949_v19  ;;  %v3705_v18 = vld [vmem:[%s5264_s17 + $0x8] sm:$0xff]  ;;  %s4506_s17 = scalar_lea.vmem %s3796_s9, 32 }
 0x990   :  { %2958 = vst.msk [vmem:[#allocation2 + $0x3] sm:$0x1] %vm500_vm3, %v2957_v20  ;;  %2966 = vst.msk [vmem:[#allocation2 + $0x4] sm:$0x1] %vm500_vm3, %v2965_v29  ;;  %v4204_v19 = vpack.c.bf16 %v3705_v18, %v3704_v17  ;;  %v3889_v20 = vld [vmem:[%s5263_s16] ss:$0 sm:$0xff]  ;;  %p4507_p12 = scmp.ne.s32.totalorder %s3796_s9, %s4506_s17  ;;  %p4512_p0 = scmp.lt.s32.totalorder %s4506_s17, %s4506_s17 }
 0x992   :  { %p4513_p1 = por %p4512_p0, %p4511_p13 }
 0x994   :  { %p4514_p2 = pnand %p4513_p1, %p4507_p12 }
 0x997   :  { %v2971_v12 = vld [vmem:[#allocation2 + $0x1] sm:$0xf] }
 0x998   :  { %v2969_v21 = vld [vmem:[#allocation2] sm:$0xf]  ;;  %4142 = vmatmul.mubr.msk.f32.vlgmr.msra.gmra.mrb[22].mxu0 %vm497_vm4, %v2971_v12 }
 0x999   :  { %v3119_v22 = vld [vmem:[#allocation2 + $0x2] sm:$0xf]  ;;  %4147 = vmatmul.mubr.msk.f32.vlgmr.msra.gmra.mrb[22].mxu1 %vm497_vm4, %v2969_v21  ;;  %3205 = vst.msk [vmem:[#allocation2] sm:$0x1] %vm500_vm3, %v4560_v0  ;;  %4150 = vmatpush3.msra.mxu0 %v4993_v46 }
 0x99a   :  { %3206 = vst.msk [vmem:[#allocation2 + $0x5] sm:$0x1] %vm500_vm3, %v4560_v0  ;;  %4151 = vmatprep.mubr.msk.f32.mxu0 %vm4561_vm5, %v4560_v0  ;;  %4155 = vmatpush3.msra.mxu1 %v5013_v51 }
 0x99b   :  { %4159 = vmatprep.subr.mxu0 %v4560_v0  ;;  %4156 = vmatprep.mubr.msk.f32.mxu1 %vm4561_vm5, %v4560_v0 }
 0x99c   :  { %4164 = vmatprep.subr.mxu1 %v4560_v0  ;;  %4152 = vmatmul.mubr.msk.f32.vlgmr.msra.gmra.mrb[24].mxu0 %vm497_vm4, %v3119_v22 }
 0x99d   :  { %4160 = vmatpush3.msra.mxu0 %v5018_v52  ;;  %4161 = vmatprep.mubr.msk.f32.mxu0 %vm4561_vm5, %v4560_v0 }
 0x99e   :  { %4169 = vmatprep.subr.mxu0 %v4560_v0 }
 0xa6b   :  { %v3042_v46 = vpop.f32.mrb[22].mxu0 }
 0xa6c   :  { %v3115_v23 = vpop.f32.mrb[22].mxu1  ;;  %v4143_v51 = vpop.f32.mrb[23].mxu0 }
 0xa6d   :  { %v3116_v24 = vadd.f32 %v3115_v23, %v3042_v46  ;;  %v4148_v25 = vpop.f32.mrb[23].mxu1  ;;  %v3891_v46 = vld [vmem:[%s5265_s18] ss:$0 sm:$0xff] }
 0xa6f   :  { %v3190_v37 = vpop.f32.mrb[24].mxu0 }
 0xa70   :  { %v3194_v30 = vadd.f32 %v3190_v37, %v3116_v24  ;;  %v4153_v26 = vpop.f32.mrb[25].mxu0 }
 0xa72   :  { %v3202_v41 = vadd.f32 %v5030_v2, %v3194_v30 }
 0xa74   :  { %v3203_v31 = vmax.f32 %v3202_v41, 0.0 }
 0xa76   :  { %3204 = vst.msk [vmem:[#allocation2 + $0x1] sm:$0xf] %vm1588_vm10, %v3203_v31 }
 0xa7d   :  { %v3209_v33 = vld [vmem:[#allocation2 + $0x1] sm:$0xf] }
 0xa7e   :  { %v3207_v52 = vld [vmem:[#allocation2] sm:$0xf]  ;;  %4157 = vmatmul.mubr.msk.f32.vlgmr.msra.gmra.mrb[24].mxu1 %vm497_vm4, %v3209_v33 }
 0xa7f   :  { %4162 = vmatmul.mubr.msk.f32.vlgmr.msra.gmra.mrb[26].mxu0 %vm497_vm4, %v3207_v52  ;;  %4165 = vmatpush3.msra.mxu1 %v5040_v9  ;;  %v3357_v2 = vld [vmem:[#allocation2 + $0x2] sm:$0xf] }
 0xa80   :  { %4166 = vmatprep.mubr.msk.f32.mxu1 %vm4561_vm5, %v4560_v0  ;;  %4174 = vmatprep.subr.mxu1 %v4560_v0 }
 0xa81   :  { %4171 = vmatprep.mubr.msk.f32.mxu0 %vm4561_vm5, %v4560_v0  ;;  %4170 = vmatpush3.msra.mxu0 %v3462_v34 }
 0xa82   :  { %4167 = vmatmul.mubr.msk.f32.vlgmr.msra.gmra.mrb[26].mxu1 %vm497_vm4, %v3357_v2  ;;  %4197 = vmatprep.subr.bf16.mxu0 %v4562_v36 }
 0xa83   :  { %4176 = vmatprep.mubr.msk.f32.mxu1 %vm4561_vm5, %v4560_v0  ;;  %4175 = vmatpush3.msra.mxu1 %v3459_v35 }
 0xa84   :  { %4203 = vmatprep.subr.bf16.mxu1 %v4562_v36 }
 0xb51   :  { %v3280_v9 = vpop.f32.mrb[24].mxu1 }
 0xb52   :  { %v3353_v28 = vpop.f32.mrb[26].mxu0  ;;  %v4158_v42 = vpop.f32.mrb[25].mxu1 }
 0xb53   :  { %v3354_v38 = vadd.f32 %v3353_v28, %v3280_v9  ;;  %v4163_v39 = vpop.f32.mrb[27].mxu0 }
 0xb55   :  { %v3428_v49 = vpop.f32.mrb[26].mxu1 }
 0xb56   :  { %v3432_v54 = vadd.f32 %v3428_v49, %v3354_v38  ;;  %v4168_v40 = vpop.f32.mrb[27].mxu1 }
 0xb58   :  { %v3440_v58 = vadd.f32 %v5072_v32, %v3432_v54 }
 0xb5a   :  { %v3441_v43 = vmax.f32 %v3440_v58, 0.0 }
 0xb5c   :  { %v3442_v44 = vsel %vm770_vm6, %v3441_v43, -inf  ;;  %v3450_v45 = vsel %vm779_vm7, %v3441_v43, -inf }
 0xb5d   :  { %v3443_v47 = vrot.slane %v3442_v44, 4  ;;  %v3451_v48 = vrot.slane %v3450_v45, 4 }
 0xb5f   :  { %v3444_v50 = vmax.f32 %v3442_v44, %v3443_v47  ;;  %v3452_v53 = vmax.f32 %v3450_v45, %v3451_v48 }
 0xb61   :  { %v3445_v59 = vrot.slane %v3444_v50, 2  ;;  %v3453_v55 = vrot.slane %v3452_v53, 2 }
 0xb63   :  { %v3446_v56 = vmax.f32 %v3444_v50, %v3445_v59  ;;  %v3454_v57 = vmax.f32 %v3452_v53, %v3453_v55 }
 0xb65   :  { %v3447_v60 = vrot.slane %v3446_v56, 1  ;;  %v3455_v61 = vrot.slane %v3454_v57, 1 }
 0xb67   :  { %v3448_v62 = vmax.f32 %v3446_v56, %v3447_v60  ;;  %v3456_v63 = vmax.f32 %v3454_v57, %v3455_v61 }
 0xb69   :  { %3449 = vst.msk [vmem:[#allocation3 + $0x1] sm:$0x1] %vm500_vm3, %v3448_v62  ;;  %3457 = vst.msk [vmem:[#allocation3 + $0x3] sm:$0x1] %vm500_vm3, %v3456_v63 }
 0xb70   :  { %v3460_v32 = vld [vmem:[#allocation3 + $0x2] sm:$0x3]  ;;  %v3458_v1 = vld [vmem:[#allocation3] sm:$0x3] }
 0xb71   :  { %4172 = vmatmul.mubr.msk.f32.vlgmr.msra.gmra.mrb[28].mxu0 %vm497_vm4, %v3460_v32  ;;  %4177 = vmatmul.mubr.msk.f32.vlgmr.msra.gmra.mrb[28].mxu1 %vm497_vm4, %v3458_v1 }
 0xb72   :  { %4187 = vmatprep.mubr.msk.f32.mxu0 %vm4561_vm5, %v4560_v0  ;;  %4194 = vmatprep.mubr.msk.f32.mxu1 %vm4561_vm5, %v4560_v0  ;;  %v4201_v0 = vpack.c.bf16 %v3621_v3, %v3620_v7 }
 0xb73   :  { %4199 = vmatpush3.bf16.msra.mxu0 %v4198_v6  ;;  %4205 = vmatpush3.bf16.msra.mxu1 %v4204_v19 }
 0xb74   :  { %4200 = vmatprep.subr.bf16.mxu0 %v4562_v36 }
 0xb77   :  { %4202 = vmatpush3.bf16.msra.mxu0 %v4201_v0 }
 0xc44   :  { %v3532_v8 = vpop.f32.mrb[28].mxu0  ;;  %v3605_v10 = vpop.f32.mrb[28].mxu1 }
 0xc45   :  { %v3606_v13 = vadd.f32 %v3605_v10, %v3532_v8  ;;  %v4173_v11 = vpop.f32.mrb[29].mxu0  ;;  %v4178_v15 = vpop.f32.mrb[29].mxu1 }
 0xc47   :  { %v3616_v27 = vadd.f32 %v3888_v14, %v3606_v13 }
 0xc49   :  { %v3617_v16 = vmax.f32 %v3616_v27, 0.0 }
 0xc4b   :  { %4188 = vmatmul.mubr.msk.f32.vlgmr.msra.gmra.mrb[30].mxu0 %vm3629_vm11, %v3617_v16 }
 0xd1e   :  { %v3699_v29 = vpop.f32.mrb[30].mxu0 }
 0xd1f   :  { %v3700_v12 = vadd.f32 %v3889_v20, %v3699_v29  ;;  %v4189_v21 = vpop.f32.mrb[31].mxu0 }
 0xd21   :  { %v3703_v22 = vmax.f32 %v3700_v12, 0.0 }
 0xd23   :  { %4195 = vmatmul.mubr.msk.f32.vlgmr.msra.gmra.mrb[30].mxu1 %vm3713_vm12, %v3703_v22 }
 0xdf6   :  { %v3783_v23 = vpop.f32.mrb[30].mxu1 }
 0xdf7   :  { %v3784_v24 = vadd.f32 %v3891_v46, %v3783_v23  ;;  %v4196_v51 = vpop.f32.mrb[31].mxu1 }
 0xdf9   :  { %3788 = vst.msk [vmem:[#allocation24] sm:$0x3] %vm3787_vm13, %v3784_v24 }
 0xdfa   :  { %4517 = shalt.err (!%p4514_p2)
}
 0xdfb   :  { %s4518_s2 = scalar_lea.hbm %s5266_s19, 32 }
 0xdfc   :  { %p4519_p3 = scmp.ne.s32.totalorder %s5266_s19, %s4518_s2  ;;  %p4522_p4 = scmp.lt.u32.totalorder %s4518_s2, %s5266_s19 }
 0xdfe   :  { %p4524_p5 = pnand %p4522_p4, %p4519_p3 }
 0xe00   :  { %4527 = shalt.err (!%p4524_p5)
}
 0xe01   :  { %3798 = dma.vmem_to_hbm [thread:$0]  %s3796_s9, 32, %s5266_s19, [#allocation6]  }
 0xe02   :  { %4542 = dma.done.wait [#allocation6], 32  }
 0xe03   :  { %4543 = vsyncadd [#allocation6], 4294967264 }
 0xe04   :  { %3802 = vsyncpa [#allocation5], 1 }
 0xe05   :  { %3803 = vsyncpa [#allocation8], 1 }
 0xe06   :  { %3804 = vsyncpa [#allocation11], 1 }
 0xe07   :  { %3805 = vsyncpa [#allocation14], 1 }
 0xe08   :  { %3806 = vsyncpa [#allocation17], 1 }
 0xe09   :  { %3807 = vsyncpa [#allocation20], 1 }
 0xe0a   :  { %3808 = vsyncpa [#allocation23], 1 }
 0xe0b   :  { %3809 = vsyncpa [#allocation6], 1 }

</bundles_post_ra>
